<compile_context>
chip_gen: v7x
topology: tpu7x:2x2x1
jax: 0.10.0
libtpu: 0.0.40
codegen_flags: <defaults>
</compile_context>

<pallas_src>
import jax
import jax.numpy as jnp
import numpy as np
from jax.experimental import pallas as pl
from jax.experimental.pallas import tpu as pltpu


# ---------------------------------------------------------------------------
# Fused kernel.  Activation rows are (spatial_row, batch) throughout, so
# pooling / windowing are aligned sublane slices; lanes are (channel, x).
# ---------------------------------------------------------------------------
def _make_kernel(bt, compute_dtype):
    def kernel(x_ref, t1_ref, b1_ref, p1w_ref, t2_ref, b2_ref, p2w_ref,
               wf1_ref, bf1_ref, wf2_ref, bf2_ref, wf3_ref, bf3_ref, o_ref):
        def mm(a, b):
            return jnp.dot(a.astype(compute_dtype), b.astype(compute_dtype),
                           preferred_element_type=jnp.float32)

        # ---- conv1 + bias + ReLU: rows (oy, b), lanes co*24 + ox ----------
        x = x_ref[...]                                        # (28, bt, 28)
        acc1 = None
        for dy in range(5):
            win = x[dy:dy + 24].reshape(24 * bt, 28)          # rows (oy, b)
            term = mm(win, t1_ref[dy])                        # (24*bt, 144)
            acc1 = term if acc1 is None else acc1 + term
        a1 = jnp.maximum(acc1 + b1_ref[...], 0.0)             # (24*bt, 144)

        # ---- maxpool 2x2 after conv1: row pairs are contiguous aligned
        #      sublane blocks (VPU max); column pairs via a tiny constant
        #      right-matmul padded to 128 output lanes. ---------------------
        parts = []
        for py in range(12):
            r0 = a1[(2 * py) * bt:(2 * py + 1) * bt, :]
            r1 = a1[(2 * py + 1) * bt:(2 * py + 2) * bt, :]
            h = jnp.maximum(r0, r1)                           # (bt, 144)
            parts.append(jnp.maximum(mm(h, p1w_ref[0]), mm(h, p1w_ref[1])))
        p1 = jnp.concatenate(parts, axis=0)                   # (12*bt, 128), rows (iy, b)

        # ---- conv2 + bias + ReLU: windows are contiguous aligned slices ---
        acc2 = None
        for dy in range(5):
            win = p1[dy * bt:(dy + 8) * bt, :]                # (8*bt, 128), rows (oy, b)
            term = mm(win, t2_ref[dy])                        # (8*bt, 128)
            acc2 = term if acc2 is None else acc2 + term
        a2 = jnp.maximum(acc2 + b2_ref[...], 0.0)             # (8*bt, 128), lanes co*8+ox

        # ---- maxpool 2x2 after conv2, fused with the NCHW flatten ---------
        zp = []
        for py in range(4):
            r0 = a2[(2 * py) * bt:(2 * py + 1) * bt, :]
            r1 = a2[(2 * py + 1) * bt:(2 * py + 2) * bt, :]
            h = jnp.maximum(r0, r1)                           # (bt, 128)
            zp.append(jnp.maximum(mm(h, p2w_ref[0]), mm(h, p2w_ref[1])))
        zin = jnp.concatenate(zp, axis=-1)                    # (bt, 256), rows b

        # ---- fc1 / fc2 / fc3 (all lane widths zero-padded to 128) ---------
        z1 = jnp.maximum(mm(zin, wf1_ref[...]) + bf1_ref[...], 0.0)   # (bt, 128)
        z2 = jnp.maximum(mm(z1, wf2_ref[...]) + bf2_ref[...], 0.0)    # (bt, 128)
        o_ref[...] = mm(z2, wf3_ref[...]) + bf3_ref[...]              # (bt, 128)

    return kernel


# ---------------------------------------------------------------------------
# One-time (weight-sized) constant / weight preparation done in the wrapper.
# ---------------------------------------------------------------------------
def _toeplitz(w, in_w, out_w):
    """w: (Cout, Cin, KH, KW) -> (KH, Cin*in_w, Cout*out_w) with
    T[dy, ci*in_w+iw, co*out_w+ox] = w[co, ci, dy, iw-ox] (0 <= iw-ox < KW)."""
    cout, cin, kh, kw = w.shape
    m = np.zeros((kw, in_w, out_w), np.float32)
    for dx in range(kw):
        for ox in range(out_w):
            m[dx, ox + dx, ox] = 1.0
    t = jnp.einsum("kcjd,dwx->jcwkx", w, jnp.asarray(m))
    return t.reshape(kh, cin * in_w, cout * out_w)


def _lane_pool_select(c, w_in):
    """0/1 matrices mapping lanes ci*w_in + (2*px+s) -> ci*(w_in//2) + px."""
    w_out = w_in // 2
    p = np.zeros((2, c * w_in, c * w_out), np.float32)
    for s in range(2):
        for ci in range(c):
            for px in range(w_out):
                p[s, ci * w_in + 2 * px + s, ci * w_out + px] = 1.0
    return p


# ---------------------------------------------------------------------------
# LeNet forward: one fused pallas_call, batch-tiled grid.
# ---------------------------------------------------------------------------
def lenet_forward(x_nchw, p, *, batch_tile=32, compute_dtype=jnp.float32):
    B = int(x_nchw.shape[0])
    bt = int(batch_tile)
    assert bt >= 8 and bt % 8 == 0, "batch_tile must be a multiple of 8"
    if B < bt:
        bt = max(8, ((B + 7) // 8) * 8)     # keep slices sublane-tile aligned
    bpad = ((B + bt - 1) // bt) * bt
    nsteps = bpad // bt

    # y-major input: (B,1,28,28) -> (28, bpad, 28), so conv windows / pooling
    # are contiguous aligned sublane slices inside the kernel (no MXU gathers).
    x2 = jnp.transpose(x_nchw.reshape(B, 28, 28), (1, 0, 2))
    if bpad != B:
        x2 = jnp.pad(x2, ((0, 0), (0, bpad - B), (0, 0)))

    wd = compute_dtype
    # Conv taps as Toeplitz panels; conv2's contraction padded 72 -> 128.
    t1 = _toeplitz(p["w_conv1"], 28, 24).astype(wd)                       # (5, 28, 144)
    t2 = jnp.pad(_toeplitz(p["w_conv2"], 12, 8),
                 ((0, 0), (0, 56), (0, 0))).astype(wd)                    # (5, 128, 128)
    b1 = jnp.repeat(p["b_conv1"], 24).reshape(1, 144)                     # f32 epilogue
    b2 = jnp.repeat(p["b_conv2"], 8).reshape(1, 128)
    # Column-pool selections (bt-independent); p1w output padded to 128 lanes.
    p1w = jnp.pad(jnp.asarray(_lane_pool_select(6, 24)),
                  ((0, 0), (0, 0), (0, 56))).astype(wd)                   # (2, 144, 128)
    p2w = jnp.asarray(_lane_pool_select(16, 8)).astype(wd)                # (2, 128, 64)

    # fc1 rows reordered to the kernel's flatten order (py*64 + co*4 + px),
    # reproducing PyTorch's NCHW x.reshape(B, -1); lane widths padded to 128.
    wf1 = jnp.transpose(p["w_fc1"].reshape(120, 16, 4, 4), (2, 1, 3, 0)).reshape(256, 120)
    wf1 = jnp.pad(wf1, ((0, 0), (0, 8))).astype(wd)                       # (256, 128)
    bf1 = jnp.pad(p["b_fc1"], (0, 8)).reshape(1, 128)
    wf2 = jnp.pad(p["w_fc2"].T, ((0, 8), (0, 44))).astype(wd)             # (128, 128)
    bf2 = jnp.pad(p["b_fc2"], (0, 44)).reshape(1, 128)
    wf3 = jnp.pad(p["w_fc3"].T, ((0, 44), (0, 118))).astype(wd)           # (128, 128)
    bf3 = jnp.pad(p["b_fc3"], (0, 118)).reshape(1, 128)

    consts = (t1, b1, p1w, t2, b2, p2w, wf1, bf1, wf2, bf2, wf3, bf3)

    def full_spec(a):
        nd = a.ndim
        shape = tuple(int(s) for s in a.shape)
        return pl.BlockSpec(shape, lambda i, nd=nd: (0,) * nd)

    in_specs = [pl.BlockSpec((28, bt, 28), lambda i: (0, i, 0))]
    in_specs += [full_spec(a) for a in consts]

    # Advisory cost estimate (per-tile matmul FLOPs x grid, HBM bytes moved).
    flops_tile = 2 * (
        5 * (24 * bt) * 28 * 144        # conv1 Toeplitz matmuls
        + 12 * 2 * bt * 144 * 128       # pool1 column selections
        + 5 * (8 * bt) * 128 * 128      # conv2 Toeplitz matmuls
        + 4 * 2 * bt * 128 * 64         # pool2 column selections
        + bt * 256 * 128                # fc1
        + bt * 128 * 128                # fc2
        + bt * 128 * 128)               # fc3
    const_bytes = sum(int(np.prod(a.shape)) * a.dtype.itemsize for a in consts)
    cost = pl.CostEstimate(
        flops=flops_tile * nsteps,
        transcendentals=0,
        bytes_accessed=int(x2.size) * 4 + const_bytes + bpad * 128 * 4)

    out = pl.pallas_call(
        _make_kernel(bt, compute_dtype),
        out_shape=jax.ShapeDtypeStruct((bpad, 128), jnp.float32),
        grid=(nsteps,),
        in_specs=in_specs,
        out_specs=pl.BlockSpec((bt, 128), lambda i: (i, 0)),
        compiler_params=pltpu.CompilerParams(
            dimension_semantics=("parallel",),
            vmem_limit_bytes=32 * 1024 * 1024),
        cost_estimate=cost,
    )(x2, *consts)
    return out[:B, :10]


# ---------------------------------------------------------------------------
# Deterministic parameter init (PyTorch default-style uniform(-1/sqrt(fan_in)))
# ---------------------------------------------------------------------------
def init_params(key):
    ks = jax.random.split(key, 10)

    def u(k, shape, fan_in):
        bound = 1.0 / np.sqrt(fan_in)
        return jax.random.uniform(k, shape, jnp.float32, -bound, bound)

    return dict(
        w_conv1=u(ks[0], (6, 1, 5, 5), 25),    b_conv1=u(ks[1], (6,), 25),
        w_conv2=u(ks[2], (16, 6, 5, 5), 150),  b_conv2=u(ks[3], (16,), 150),
        w_fc1=u(ks[4], (120, 256), 256),       b_fc1=u(ks[5], (120,), 256),
        w_fc2=u(ks[6], (84, 120), 120),        b_fc2=u(ks[7], (84,), 120),
        w_fc3=u(ks[8], (10, 84), 84),          b_fc3=u(ks[9], (10,), 84),
    )


# Pure-JAX reference (high precision) for the correctness check.
def lenet_reference(x, p):
    hp = jax.lax.Precision.HIGHEST

    def conv(x, w, b):
        y = jax.lax.conv_general_dilated(
            x, w, (1, 1), "VALID",
            dimension_numbers=("NCHW", "OIHW", "NCHW"), precision=hp)
        return y + b[None, :, None, None]

    def pool(y):
        return jax.lax.reduce_window(
            y, -jnp.inf, jax.lax.max, (1, 1, 2, 2), (1, 1, 2, 2), "VALID")

    y = pool(jax.nn.relu(conv(x, p["w_conv1"], p["b_conv1"])))
    y = pool(jax.nn.relu(conv(y, p["w_conv2"], p["b_conv2"])))
    y = y.reshape(y.shape[0], -1)
    y = jax.nn.relu(jnp.dot(y, p["w_fc1"].T, precision=hp) + p["b_fc1"])
    y = jax.nn.relu(jnp.dot(y, p["w_fc2"].T, precision=hp) + p["b_fc2"])
    return jnp.dot(y, p["w_fc3"].T, precision=hp) + p["b_fc3"]


if __name__ == "__main__":
    key = jax.random.PRNGKey(0)
    pkey, xkey = jax.random.split(key)
    params = init_params(pkey)

    fwd = jax.jit(lenet_forward)

    # MNIST-shaped input: (batch=2, channels=1, 28, 28) — fixed by the FC dims.
    x = jax.random.normal(xkey, (2, 1, 28, 28), jnp.float32)
    out = jax.block_until_ready(fwd(x, params))
    assert out.shape == (2, 10)
    ref = lenet_reference(x, params)
    np.testing.assert_allclose(np.asarray(out), np.asarray(ref),
                               rtol=1e-3, atol=1e-3)

    # Exercise the multi-step grid + batch-padding path (2 grid steps, last
    # tile partially padded) to validate the tiled layout end to end.
    xb = jax.random.normal(jax.random.PRNGKey(1), (40, 1, 28, 28), jnp.float32)
    outb = jax.block_until_ready(fwd(xb, params))
    refb = lenet_reference(xb, params)
    np.testing.assert_allclose(np.asarray(outb), np.asarray(refb),
                               rtol=1e-3, atol=1e-3)

    print("KERNEL_OK")
</pallas_src>

<mosaic_0001>
module attributes {stable_mosaic.version = 11 : i64} {
  func.func @kernel(%arg0: i32, %arg1: memref<28x8x28xf32, #tpu.memory_space<vmem>>, %arg2: memref<5x28x144xf32, #tpu.memory_space<vmem>>, %arg3: memref<1x144xf32, #tpu.memory_space<vmem>>, %arg4: memref<2x144x128xf32, #tpu.memory_space<vmem>>, %arg5: memref<5x128x128xf32, #tpu.memory_space<vmem>>, %arg6: memref<1x128xf32, #tpu.memory_space<vmem>>, %arg7: memref<2x128x64xf32, #tpu.memory_space<vmem>>, %arg8: memref<256x128xf32, #tpu.memory_space<vmem>>, %arg9: memref<1x128xf32, #tpu.memory_space<vmem>>, %arg10: memref<128x128xf32, #tpu.memory_space<vmem>>, %arg11: memref<1x128xf32, #tpu.memory_space<vmem>>, %arg12: memref<128x128xf32, #tpu.memory_space<vmem>>, %arg13: memref<1x128xf32, #tpu.memory_space<vmem>>, %arg14: memref<8x128xf32, #tpu.memory_space<vmem>>) attributes {dimension_semantics = [#tpu.dimension_semantics<parallel>], iteration_bounds = array<i64: 1>, scalar_prefetch = 0 : i64, scratch_operands = 0 : i64, tpu.core_type = #tpu.core_type<tc>, window_params = [{transform_indices = @transform_0, window_bounds = array<i64: 28, 8, 28>}, {pipeline_mode = #tpu.pipeline_mode<synchronous>, transform_indices = @transform_1, window_bounds = array<i64: 5, 28, 144>}, {pipeline_mode = #tpu.pipeline_mode<synchronous>, transform_indices = @transform_2, window_bounds = array<i64: 1, 144>}, {pipeline_mode = #tpu.pipeline_mode<synchronous>, transform_indices = @transform_3, window_bounds = array<i64: 2, 144, 128>}, {pipeline_mode = #tpu.pipeline_mode<synchronous>, transform_indices = @transform_4, window_bounds = array<i64: 5, 128, 128>}, {pipeline_mode = #tpu.pipeline_mode<synchronous>, transform_indices = @transform_5, window_bounds = array<i64: 1, 128>}, {pipeline_mode = #tpu.pipeline_mode<synchronous>, transform_indices = @transform_6, window_bounds = array<i64: 2, 128, 64>}, {pipeline_mode = #tpu.pipeline_mode<synchronous>, transform_indices = @transform_7, window_bounds = array<i64: 256, 128>}, {pipeline_mode = #tpu.pipeline_mode<synchronous>, transform_indices = @transform_8, window_bounds = array<i64: 1, 128>}, {pipeline_mode = #tpu.pipeline_mode<synchronous>, transform_indices = @transform_9, window_bounds = array<i64: 128, 128>}, {pipeline_mode = #tpu.pipeline_mode<synchronous>, transform_indices = @transform_10, window_bounds = array<i64: 1, 128>}, {pipeline_mode = #tpu.pipeline_mode<synchronous>, transform_indices = @transform_11, window_bounds = array<i64: 128, 128>}, {pipeline_mode = #tpu.pipeline_mode<synchronous>, transform_indices = @transform_12, window_bounds = array<i64: 1, 128>}, {transform_indices = @transform_13, window_bounds = array<i64: 8, 128>}]} {
    %c0 = arith.constant 0 : index
    %c0_0 = arith.constant 0 : index
    %c0_1 = arith.constant 0 : index
    %0 = vector.load %arg1[%c0, %c0_0, %c0_1] : memref<28x8x28xf32, #tpu.memory_space<vmem>>, vector<28x8x28xf32>
    %1 = vector.extract_strided_slice %0 {offsets = [0, 0, 0], sizes = [24, 8, 28], strides = [1, 1, 1]} : vector<28x8x28xf32> to vector<24x8x28xf32>
    %2 = vector.shape_cast %1 : vector<24x8x28xf32> to vector<192x28xf32>
    %c0_2 = arith.constant 0 : index
    %c0_3 = arith.constant 0 : index
    %c0_4 = arith.constant 0 : index
    %3 = vector.load %arg2[%c0_2, %c0_3, %c0_4] : memref<5x28x144xf32, #tpu.memory_space<vmem>>, vector<1x28x144xf32>
    %4 = vector.shape_cast %3 : vector<1x28x144xf32> to vector<28x144xf32>
    %cst = arith.constant dense<0.000000e+00> : vector<192x144xf32>
    %5 = tpu.matmul %2, %4, %cst {dimension_numbers = #tpu.dot_dimension_numbers<[1], [0], [0], [1], [0, 0, 1, 1], [], []>} : vector<192x28xf32>, vector<28x144xf32>, vector<192x144xf32> -> vector<192x144xf32>
    %6 = vector.extract_strided_slice %0 {offsets = [1, 0, 0], sizes = [24, 8, 28], strides = [1, 1, 1]} : vector<28x8x28xf32> to vector<24x8x28xf32>
    %7 = vector.shape_cast %6 : vector<24x8x28xf32> to vector<192x28xf32>
    %c1 = arith.constant 1 : index
    %c0_5 = arith.constant 0 : index
    %c0_6 = arith.constant 0 : index
    %8 = vector.load %arg2[%c1, %c0_5, %c0_6] : memref<5x28x144xf32, #tpu.memory_space<vmem>>, vector<1x28x144xf32>
    %9 = vector.shape_cast %8 : vector<1x28x144xf32> to vector<28x144xf32>
    %cst_7 = arith.constant dense<0.000000e+00> : vector<192x144xf32>
    %10 = tpu.matmul %7, %9, %cst_7 {dimension_numbers = #tpu.dot_dimension_numbers<[1], [0], [0], [1], [0, 0, 1, 1], [], []>} : vector<192x28xf32>, vector<28x144xf32>, vector<192x144xf32> -> vector<192x144xf32>
    %11 = arith.addf %5, %10 : vector<192x144xf32>
    %12 = vector.extract_strided_slice %0 {offsets = [2, 0, 0], sizes = [24, 8, 28], strides = [1, 1, 1]} : vector<28x8x28xf32> to vector<24x8x28xf32>
    %13 = vector.shape_cast %12 : vector<24x8x28xf32> to vector<192x28xf32>
    %c2 = arith.constant 2 : index
    %c0_8 = arith.constant 0 : index
    %c0_9 = arith.constant 0 : index
    %14 = vector.load %arg2[%c2, %c0_8, %c0_9] : memref<5x28x144xf32, #tpu.memory_space<vmem>>, vector<1x28x144xf32>
    %15 = vector.shape_cast %14 : vector<1x28x144xf32> to vector<28x144xf32>
    %cst_10 = arith.constant dense<0.000000e+00> : vector<192x144xf32>
    %16 = tpu.matmul %13, %15, %cst_10 {dimension_numbers = #tpu.dot_dimension_numbers<[1], [0], [0], [1], [0, 0, 1, 1], [], []>} : vector<192x28xf32>, vector<28x144xf32>, vector<192x144xf32> -> vector<192x144xf32>
    %17 = arith.addf %11, %16 : vector<192x144xf32>
    %18 = vector.extract_strided_slice %0 {offsets = [3, 0, 0], sizes = [24, 8, 28], strides = [1, 1, 1]} : vector<28x8x28xf32> to vector<24x8x28xf32>
    %19 = vector.shape_cast %18 : vector<24x8x28xf32> to vector<192x28xf32>
    %c3 = arith.constant 3 : index
    %c0_11 = arith.constant 0 : index
    %c0_12 = arith.constant 0 : index
    %20 = vector.load %arg2[%c3, %c0_11, %c0_12] : memref<5x28x144xf32, #tpu.memory_space<vmem>>, vector<1x28x144xf32>
    %21 = vector.shape_cast %20 : vector<1x28x144xf32> to vector<28x144xf32>
    %cst_13 = arith.constant dense<0.000000e+00> : vector<192x144xf32>
    %22 = tpu.matmul %19, %21, %cst_13 {dimension_numbers = #tpu.dot_dimension_numbers<[1], [0], [0], [1], [0, 0, 1, 1], [], []>} : vector<192x28xf32>, vector<28x144xf32>, vector<192x144xf32> -> vector<192x144xf32>
    %23 = arith.addf %17, %22 : vector<192x144xf32>
    %24 = vector.extract_strided_slice %0 {offsets = [4, 0, 0], sizes = [24, 8, 28], strides = [1, 1, 1]} : vector<28x8x28xf32> to vector<24x8x28xf32>
    %25 = vector.shape_cast %24 : vector<24x8x28xf32> to vector<192x28xf32>
    %c4 = arith.constant 4 : index
    %c0_14 = arith.constant 0 : index
    %c0_15 = arith.constant 0 : index
    %26 = vector.load %arg2[%c4, %c0_14, %c0_15] : memref<5x28x144xf32, #tpu.memory_space<vmem>>, vector<1x28x144xf32>
    %27 = vector.shape_cast %26 : vector<1x28x144xf32> to vector<28x144xf32>
    %cst_16 = arith.constant dense<0.000000e+00> : vector<192x144xf32>
    %28 = tpu.matmul %25, %27, %cst_16 {dimension_numbers = #tpu.dot_dimension_numbers<[1], [0], [0], [1], [0, 0, 1, 1], [], []>} : vector<192x28xf32>, vector<28x144xf32>, vector<192x144xf32> -> vector<192x144xf32>
    %29 = arith.addf %23, %28 : vector<192x144xf32>
    %c0_17 = arith.constant 0 : index
    %c0_18 = arith.constant 0 : index
    %30 = vector.load %arg3[%c0_17, %c0_18] : memref<1x144xf32, #tpu.memory_space<vmem>>, vector<1x144xf32>
    %31 = vector.broadcast %30 : vector<1x144xf32> to vector<192x144xf32>
    %32 = arith.addf %29, %31 : vector<192x144xf32>
    %cst_19 = arith.constant 0.000000e+00 : f32
    %33 = vector.broadcast %cst_19 : f32 to vector<192x144xf32>
    %34 = arith.maximumf %32, %33 : vector<192x144xf32>
    %35 = vector.extract_strided_slice %34 {offsets = [0, 0], sizes = [8, 144], strides = [1, 1]} : vector<192x144xf32> to vector<8x144xf32>
    %36 = vector.extract_strided_slice %34 {offsets = [8, 0], sizes = [8, 144], strides = [1, 1]} : vector<192x144xf32> to vector<8x144xf32>
    %37 = arith.maximumf %35, %36 : vector<8x144xf32>
    %c0_20 = arith.constant 0 : index
    %c0_21 = arith.constant 0 : index
    %c0_22 = arith.constant 0 : index
    %38 = vector.load %arg4[%c0_20, %c0_21, %c0_22] : memref<2x144x128xf32, #tpu.memory_space<vmem>>, vector<1x144x128xf32>
    %39 = vector.shape_cast %38 : vector<1x144x128xf32> to vector<144x128xf32>
    %cst_23 = arith.constant dense<0.000000e+00> : vector<8x128xf32>
    %40 = tpu.matmul %37, %39, %cst_23 {dimension_numbers = #tpu.dot_dimension_numbers<[1], [0], [0], [1], [0, 0, 1, 1], [], []>} : vector<8x144xf32>, vector<144x128xf32>, vector<8x128xf32> -> vector<8x128xf32>
    %c1_24 = arith.constant 1 : index
    %c0_25 = arith.constant 0 : index
    %c0_26 = arith.constant 0 : index
    %41 = vector.load %arg4[%c1_24, %c0_25, %c0_26] : memref<2x144x128xf32, #tpu.memory_space<vmem>>, vector<1x144x128xf32>
    %42 = vector.shape_cast %41 : vector<1x144x128xf32> to vector<144x128xf32>
    %cst_27 = arith.constant dense<0.000000e+00> : vector<8x128xf32>
    %43 = tpu.matmul %37, %42, %cst_27 {dimension_numbers = #tpu.dot_dimension_numbers<[1], [0], [0], [1], [0, 0, 1, 1], [], []>} : vector<8x144xf32>, vector<144x128xf32>, vector<8x128xf32> -> vector<8x128xf32>
    %44 = arith.maximumf %40, %43 : vector<8x128xf32>
    %45 = vector.extract_strided_slice %34 {offsets = [16, 0], sizes = [8, 144], strides = [1, 1]} : vector<192x144xf32> to vector<8x144xf32>
    %46 = vector.extract_strided_slice %34 {offsets = [24, 0], sizes = [8, 144], strides = [1, 1]} : vector<192x144xf32> to vector<8x144xf32>
    %47 = arith.maximumf %45, %46 : vector<8x144xf32>
    %c0_28 = arith.constant 0 : index
    %c0_29 = arith.constant 0 : index
    %c0_30 = arith.constant 0 : index
    %48 = vector.load %arg4[%c0_28, %c0_29, %c0_30] : memref<2x144x128xf32, #tpu.memory_space<vmem>>, vector<1x144x128xf32>
    %49 = vector.shape_cast %48 : vector<1x144x128xf32> to vector<144x128xf32>
    %cst_31 = arith.constant dense<0.000000e+00> : vector<8x128xf32>
    %50 = tpu.matmul %47, %49, %cst_31 {dimension_numbers = #tpu.dot_dimension_numbers<[1], [0], [0], [1], [0, 0, 1, 1], [], []>} : vector<8x144xf32>, vector<144x128xf32>, vector<8x128xf32> -> vector<8x128xf32>
    %c1_32 = arith.constant 1 : index
    %c0_33 = arith.constant 0 : index
    %c0_34 = arith.constant 0 : index
    %51 = vector.load %arg4[%c1_32, %c0_33, %c0_34] : memref<2x144x128xf32, #tpu.memory_space<vmem>>, vector<1x144x128xf32>
    %52 = vector.shape_cast %51 : vector<1x144x128xf32> to vector<144x128xf32>
    %cst_35 = arith.constant dense<0.000000e+00> : vector<8x128xf32>
    %53 = tpu.matmul %47, %52, %cst_35 {dimension_numbers = #tpu.dot_dimension_numbers<[1], [0], [0], [1], [0, 0, 1, 1], [], []>} : vector<8x144xf32>, vector<144x128xf32>, vector<8x128xf32> -> vector<8x128xf32>
    %54 = arith.maximumf %50, %53 : vector<8x128xf32>
    %55 = vector.extract_strided_slice %34 {offsets = [32, 0], sizes = [8, 144], strides = [1, 1]} : vector<192x144xf32> to vector<8x144xf32>
    %56 = vector.extract_strided_slice %34 {offsets = [40, 0], sizes = [8, 144], strides = [1, 1]} : vector<192x144xf32> to vector<8x144xf32>
    %57 = arith.maximumf %55, %56 : vector<8x144xf32>
    %c0_36 = arith.constant 0 : index
    %c0_37 = arith.constant 0 : index
    %c0_38 = arith.constant 0 : index
    %58 = vector.load %arg4[%c0_36, %c0_37, %c0_38] : memref<2x144x128xf32, #tpu.memory_space<vmem>>, vector<1x144x128xf32>
    %59 = vector.shape_cast %58 : vector<1x144x128xf32> to vector<144x128xf32>
    %cst_39 = arith.constant dense<0.000000e+00> : vector<8x128xf32>
    %60 = tpu.matmul %57, %59, %cst_39 {dimension_numbers = #tpu.dot_dimension_numbers<[1], [0], [0], [1], [0, 0, 1, 1], [], []>} : vector<8x144xf32>, vector<144x128xf32>, vector<8x128xf32> -> vector<8x128xf32>
    %c1_40 = arith.constant 1 : index
    %c0_41 = arith.constant 0 : index
    %c0_42 = arith.constant 0 : index
    %61 = vector.load %arg4[%c1_40, %c0_41, %c0_42] : memref<2x144x128xf32, #tpu.memory_space<vmem>>, vector<1x144x128xf32>
    %62 = vector.shape_cast %61 : vector<1x144x128xf32> to vector<144x128xf32>
    %cst_43 = arith.constant dense<0.000000e+00> : vector<8x128xf32>
    %63 = tpu.matmul %57, %62, %cst_43 {dimension_numbers = #tpu.dot_dimension_numbers<[1], [0], [0], [1], [0, 0, 1, 1], [], []>} : vector<8x144xf32>, vector<144x128xf32>, vector<8x128xf32> -> vector<8x128xf32>
    %64 = arith.maximumf %60, %63 : vector<8x128xf32>
    %65 = vector.extract_strided_slice %34 {offsets = [48, 0], sizes = [8, 144], strides = [1, 1]} : vector<192x144xf32> to vector<8x144xf32>
    %66 = vector.extract_strided_slice %34 {offsets = [56, 0], sizes = [8, 144], strides = [1, 1]} : vector<192x144xf32> to vector<8x144xf32>
    %67 = arith.maximumf %65, %66 : vector<8x144xf32>
    %c0_44 = arith.constant 0 : index
    %c0_45 = arith.constant 0 : index
    %c0_46 = arith.constant 0 : index
    %68 = vector.load %arg4[%c0_44, %c0_45, %c0_46] : memref<2x144x128xf32, #tpu.memory_space<vmem>>, vector<1x144x128xf32>
    %69 = vector.shape_cast %68 : vector<1x144x128xf32> to vector<144x128xf32>
    %cst_47 = arith.constant dense<0.000000e+00> : vector<8x128xf32>
    %70 = tpu.matmul %67, %69, %cst_47 {dimension_numbers = #tpu.dot_dimension_numbers<[1], [0], [0], [1], [0, 0, 1, 1], [], []>} : vector<8x144xf32>, vector<144x128xf32>, vector<8x128xf32> -> vector<8x128xf32>
    %c1_48 = arith.constant 1 : index
    %c0_49 = arith.constant 0 : index
    %c0_50 = arith.constant 0 : index
    %71 = vector.load %arg4[%c1_48, %c0_49, %c0_50] : memref<2x144x128xf32, #tpu.memory_space<vmem>>, vector<1x144x128xf32>
    %72 = vector.shape_cast %71 : vector<1x144x128xf32> to vector<144x128xf32>
    %cst_51 = arith.constant dense<0.000000e+00> : vector<8x128xf32>
    %73 = tpu.matmul %67, %72, %cst_51 {dimension_numbers = #tpu.dot_dimension_numbers<[1], [0], [0], [1], [0, 0, 1, 1], [], []>} : vector<8x144xf32>, vector<144x128xf32>, vector<8x128xf32> -> vector<8x128xf32>
    %74 = arith.maximumf %70, %73 : vector<8x128xf32>
    %75 = vector.extract_strided_slice %34 {offsets = [64, 0], sizes = [8, 144], strides = [1, 1]} : vector<192x144xf32> to vector<8x144xf32>
    %76 = vector.extract_strided_slice %34 {offsets = [72, 0], sizes = [8, 144], strides = [1, 1]} : vector<192x144xf32> to vector<8x144xf32>
    %77 = arith.maximumf %75, %76 : vector<8x144xf32>
    %c0_52 = arith.constant 0 : index
    %c0_53 = arith.constant 0 : index
    %c0_54 = arith.constant 0 : index
    %78 = vector.load %arg4[%c0_52, %c0_53, %c0_54] : memref<2x144x128xf32, #tpu.memory_space<vmem>>, vector<1x144x128xf32>
    %79 = vector.shape_cast %78 : vector<1x144x128xf32> to vector<144x128xf32>
    %cst_55 = arith.constant dense<0.000000e+00> : vector<8x128xf32>
    %80 = tpu.matmul %77, %79, %cst_55 {dimension_numbers = #tpu.dot_dimension_numbers<[1], [0], [0], [1], [0, 0, 1, 1], [], []>} : vector<8x144xf32>, vector<144x128xf32>, vector<8x128xf32> -> vector<8x128xf32>
    %c1_56 = arith.constant 1 : index
    %c0_57 = arith.constant 0 : index
    %c0_58 = arith.constant 0 : index
    %81 = vector.load %arg4[%c1_56, %c0_57, %c0_58] : memref<2x144x128xf32, #tpu.memory_space<vmem>>, vector<1x144x128xf32>
    %82 = vector.shape_cast %81 : vector<1x144x128xf32> to vector<144x128xf32>
    %cst_59 = arith.constant dense<0.000000e+00> : vector<8x128xf32>
    %83 = tpu.matmul %77, %82, %cst_59 {dimension_numbers = #tpu.dot_dimension_numbers<[1], [0], [0], [1], [0, 0, 1, 1], [], []>} : vector<8x144xf32>, vector<144x128xf32>, vector<8x128xf32> -> vector<8x128xf32>
    %84 = arith.maximumf %80, %83 : vector<8x128xf32>
    %85 = vector.extract_strided_slice %34 {offsets = [80, 0], sizes = [8, 144], strides = [1, 1]} : vector<192x144xf32> to vector<8x144xf32>
    %86 = vector.extract_strided_slice %34 {offsets = [88, 0], sizes = [8, 144], strides = [1, 1]} : vector<192x144xf32> to vector<8x144xf32>
    %87 = arith.maximumf %85, %86 : vector<8x144xf32>
    %c0_60 = arith.constant 0 : index
    %c0_61 = arith.constant 0 : index
    %c0_62 = arith.constant 0 : index
    %88 = vector.load %arg4[%c0_60, %c0_61, %c0_62] : memref<2x144x128xf32, #tpu.memory_space<vmem>>, vector<1x144x128xf32>
    %89 = vector.shape_cast %88 : vector<1x144x128xf32> to vector<144x128xf32>
    %cst_63 = arith.constant dense<0.000000e+00> : vector<8x128xf32>
    %90 = tpu.matmul %87, %89, %cst_63 {dimension_numbers = #tpu.dot_dimension_numbers<[1], [0], [0], [1], [0, 0, 1, 1], [], []>} : vector<8x144xf32>, vector<144x128xf32>, vector<8x128xf32> -> vector<8x128xf32>
    %c1_64 = arith.constant 1 : index
    %c0_65 = arith.constant 0 : index
    %c0_66 = arith.constant 0 : index
    %91 = vector.load %arg4[%c1_64, %c0_65, %c0_66] : memref<2x144x128xf32, #tpu.memory_space<vmem>>, vector<1x144x128xf32>
    %92 = vector.shape_cast %91 : vector<1x144x128xf32> to vector<144x128xf32>
    %cst_67 = arith.constant dense<0.000000e+00> : vector<8x128xf32>
    %93 = tpu.matmul %87, %92, %cst_67 {dimension_numbers = #tpu.dot_dimension_numbers<[1], [0], [0], [1], [0, 0, 1, 1], [], []>} : vector<8x144xf32>, vector<144x128xf32>, vector<8x128xf32> -> vector<8x128xf32>
    %94 = arith.maximumf %90, %93 : vector<8x128xf32>
    %95 = vector.extract_strided_slice %34 {offsets = [96, 0], sizes = [8, 144], strides = [1, 1]} : vector<192x144xf32> to vector<8x144xf32>
    %96 = vector.extract_strided_slice %34 {offsets = [104, 0], sizes = [8, 144], strides = [1, 1]} : vector<192x144xf32> to vector<8x144xf32>
    %97 = arith.maximumf %95, %96 : vector<8x144xf32>
    %c0_68 = arith.constant 0 : index
    %c0_69 = arith.constant 0 : index
    %c0_70 = arith.constant 0 : index
    %98 = vector.load %arg4[%c0_68, %c0_69, %c0_70] : memref<2x144x128xf32, #tpu.memory_space<vmem>>, vector<1x144x128xf32>
    %99 = vector.shape_cast %98 : vector<1x144x128xf32> to vector<144x128xf32>
    %cst_71 = arith.constant dense<0.000000e+00> : vector<8x128xf32>
    %100 = tpu.matmul %97, %99, %cst_71 {dimension_numbers = #tpu.dot_dimension_numbers<[1], [0], [0], [1], [0, 0, 1, 1], [], []>} : vector<8x144xf32>, vector<144x128xf32>, vector<8x128xf32> -> vector<8x128xf32>
    %c1_72 = arith.constant 1 : index
    %c0_73 = arith.constant 0 : index
    %c0_74 = arith.constant 0 : index
    %101 = vector.load %arg4[%c1_72, %c0_73, %c0_74] : memref<2x144x128xf32, #tpu.memory_space<vmem>>, vector<1x144x128xf32>
    %102 = vector.shape_cast %101 : vector<1x144x128xf32> to vector<144x128xf32>
    %cst_75 = arith.constant dense<0.000000e+00> : vector<8x128xf32>
    %103 = tpu.matmul %97, %102, %cst_75 {dimension_numbers = #tpu.dot_dimension_numbers<[1], [0], [0], [1], [0, 0, 1, 1], [], []>} : vector<8x144xf32>, vector<144x128xf32>, vector<8x128xf32> -> vector<8x128xf32>
    %104 = arith.maximumf %100, %103 : vector<8x128xf32>
    %105 = vector.extract_strided_slice %34 {offsets = [112, 0], sizes = [8, 144], strides = [1, 1]} : vector<192x144xf32> to vector<8x144xf32>
    %106 = vector.extract_strided_slice %34 {offsets = [120, 0], sizes = [8, 144], strides = [1, 1]} : vector<192x144xf32> to vector<8x144xf32>
    %107 = arith.maximumf %105, %106 : vector<8x144xf32>
    %c0_76 = arith.constant 0 : index
    %c0_77 = arith.constant 0 : index
    %c0_78 = arith.constant 0 : index
    %108 = vector.load %arg4[%c0_76, %c0_77, %c0_78] : memref<2x144x128xf32, #tpu.memory_space<vmem>>, vector<1x144x128xf32>
    %109 = vector.shape_cast %108 : vector<1x144x128xf32> to vector<144x128xf32>
    %cst_79 = arith.constant dense<0.000000e+00> : vector<8x128xf32>
    %110 = tpu.matmul %107, %109, %cst_79 {dimension_numbers = #tpu.dot_dimension_numbers<[1], [0], [0], [1], [0, 0, 1, 1], [], []>} : vector<8x144xf32>, vector<144x128xf32>, vector<8x128xf32> -> vector<8x128xf32>
    %c1_80 = arith.constant 1 : index
    %c0_81 = arith.constant 0 : index
    %c0_82 = arith.constant 0 : index
    %111 = vector.load %arg4[%c1_80, %c0_81, %c0_82] : memref<2x144x128xf32, #tpu.memory_space<vmem>>, vector<1x144x128xf32>
    %112 = vector.shape_cast %111 : vector<1x144x128xf32> to vector<144x128xf32>
    %cst_83 = arith.constant dense<0.000000e+00> : vector<8x128xf32>
    %113 = tpu.matmul %107, %112, %cst_83 {dimension_numbers = #tpu.dot_dimension_numbers<[1], [0], [0], [1], [0, 0, 1, 1], [], []>} : vector<8x144xf32>, vector<144x128xf32>, vector<8x128xf32> -> vector<8x128xf32>
    %114 = arith.maximumf %110, %113 : vector<8x128xf32>
    %115 = vector.extract_strided_slice %34 {offsets = [128, 0], sizes = [8, 144], strides = [1, 1]} : vector<192x144xf32> to vector<8x144xf32>
    %116 = vector.extract_strided_slice %34 {offsets = [136, 0], sizes = [8, 144], strides = [1, 1]} : vector<192x144xf32> to vector<8x144xf32>
    %117 = arith.maximumf %115, %116 : vector<8x144xf32>
    %c0_84 = arith.constant 0 : index
    %c0_85 = arith.constant 0 : index
    %c0_86 = arith.constant 0 : index
    %118 = vector.load %arg4[%c0_84, %c0_85, %c0_86] : memref<2x144x128xf32, #tpu.memory_space<vmem>>, vector<1x144x128xf32>
    %119 = vector.shape_cast %118 : vector<1x144x128xf32> to vector<144x128xf32>
    %cst_87 = arith.constant dense<0.000000e+00> : vector<8x128xf32>
    %120 = tpu.matmul %117, %119, %cst_87 {dimension_numbers = #tpu.dot_dimension_numbers<[1], [0], [0], [1], [0, 0, 1, 1], [], []>} : vector<8x144xf32>, vector<144x128xf32>, vector<8x128xf32> -> vector<8x128xf32>
    %c1_88 = arith.constant 1 : index
    %c0_89 = arith.constant 0 : index
    %c0_90 = arith.constant 0 : index
    %121 = vector.load %arg4[%c1_88, %c0_89, %c0_90] : memref<2x144x128xf32, #tpu.memory_space<vmem>>, vector<1x144x128xf32>
    %122 = vector.shape_cast %121 : vector<1x144x128xf32> to vector<144x128xf32>
    %cst_91 = arith.constant dense<0.000000e+00> : vector<8x128xf32>
    %123 = tpu.matmul %117, %122, %cst_91 {dimension_numbers = #tpu.dot_dimension_numbers<[1], [0], [0], [1], [0, 0, 1, 1], [], []>} : vector<8x144xf32>, vector<144x128xf32>, vector<8x128xf32> -> vector<8x128xf32>
    %124 = arith.maximumf %120, %123 : vector<8x128xf32>
    %125 = vector.extract_strided_slice %34 {offsets = [144, 0], sizes = [8, 144], strides = [1, 1]} : vector<192x144xf32> to vector<8x144xf32>
    %126 = vector.extract_strided_slice %34 {offsets = [152, 0], sizes = [8, 144], strides = [1, 1]} : vector<192x144xf32> to vector<8x144xf32>
    %127 = arith.maximumf %125, %126 : vector<8x144xf32>
    %c0_92 = arith.constant 0 : index
    %c0_93 = arith.constant 0 : index
    %c0_94 = arith.constant 0 : index
    %128 = vector.load %arg4[%c0_92, %c0_93, %c0_94] : memref<2x144x128xf32, #tpu.memory_space<vmem>>, vector<1x144x128xf32>
    %129 = vector.shape_cast %128 : vector<1x144x128xf32> to vector<144x128xf32>
    %cst_95 = arith.constant dense<0.000000e+00> : vector<8x128xf32>
    %130 = tpu.matmul %127, %129, %cst_95 {dimension_numbers = #tpu.dot_dimension_numbers<[1], [0], [0], [1], [0, 0, 1, 1], [], []>} : vector<8x144xf32>, vector<144x128xf32>, vector<8x128xf32> -> vector<8x128xf32>
    %c1_96 = arith.constant 1 : index
    %c0_97 = arith.constant 0 : index
    %c0_98 = arith.constant 0 : index
    %131 = vector.load %arg4[%c1_96, %c0_97, %c0_98] : memref<2x144x128xf32, #tpu.memory_space<vmem>>, vector<1x144x128xf32>
    %132 = vector.shape_cast %131 : vector<1x144x128xf32> to vector<144x128xf32>
    %cst_99 = arith.constant dense<0.000000e+00> : vector<8x128xf32>
    %133 = tpu.matmul %127, %132, %cst_99 {dimension_numbers = #tpu.dot_dimension_numbers<[1], [0], [0], [1], [0, 0, 1, 1], [], []>} : vector<8x144xf32>, vector<144x128xf32>, vector<8x128xf32> -> vector<8x128xf32>
    %134 = arith.maximumf %130, %133 : vector<8x128xf32>
    %135 = vector.extract_strided_slice %34 {offsets = [160, 0], sizes = [8, 144], strides = [1, 1]} : vector<192x144xf32> to vector<8x144xf32>
    %136 = vector.extract_strided_slice %34 {offsets = [168, 0], sizes = [8, 144], strides = [1, 1]} : vector<192x144xf32> to vector<8x144xf32>
    %137 = arith.maximumf %135, %136 : vector<8x144xf32>
    %c0_100 = arith.constant 0 : index
    %c0_101 = arith.constant 0 : index
    %c0_102 = arith.constant 0 : index
    %138 = vector.load %arg4[%c0_100, %c0_101, %c0_102] : memref<2x144x128xf32, #tpu.memory_space<vmem>>, vector<1x144x128xf32>
    %139 = vector.shape_cast %138 : vector<1x144x128xf32> to vector<144x128xf32>
    %cst_103 = arith.constant dense<0.000000e+00> : vector<8x128xf32>
    %140 = tpu.matmul %137, %139, %cst_103 {dimension_numbers = #tpu.dot_dimension_numbers<[1], [0], [0], [1], [0, 0, 1, 1], [], []>} : vector<8x144xf32>, vector<144x128xf32>, vector<8x128xf32> -> vector<8x128xf32>
    %c1_104 = arith.constant 1 : index
    %c0_105 = arith.constant 0 : index
    %c0_106 = arith.constant 0 : index
    %141 = vector.load %arg4[%c1_104, %c0_105, %c0_106] : memref<2x144x128xf32, #tpu.memory_space<vmem>>, vector<1x144x128xf32>
    %142 = vector.shape_cast %141 : vector<1x144x128xf32> to vector<144x128xf32>
    %cst_107 = arith.constant dense<0.000000e+00> : vector<8x128xf32>
    %143 = tpu.matmul %137, %142, %cst_107 {dimension_numbers = #tpu.dot_dimension_numbers<[1], [0], [0], [1], [0, 0, 1, 1], [], []>} : vector<8x144xf32>, vector<144x128xf32>, vector<8x128xf32> -> vector<8x128xf32>
    %144 = arith.maximumf %140, %143 : vector<8x128xf32>
    %145 = vector.extract_strided_slice %34 {offsets = [176, 0], sizes = [8, 144], strides = [1, 1]} : vector<192x144xf32> to vector<8x144xf32>
    %146 = vector.extract_strided_slice %34 {offsets = [184, 0], sizes = [8, 144], strides = [1, 1]} : vector<192x144xf32> to vector<8x144xf32>
    %147 = arith.maximumf %145, %146 : vector<8x144xf32>
    %c0_108 = arith.constant 0 : index
    %c0_109 = arith.constant 0 : index
    %c0_110 = arith.constant 0 : index
    %148 = vector.load %arg4[%c0_108, %c0_109, %c0_110] : memref<2x144x128xf32, #tpu.memory_space<vmem>>, vector<1x144x128xf32>
    %149 = vector.shape_cast %148 : vector<1x144x128xf32> to vector<144x128xf32>
    %cst_111 = arith.constant dense<0.000000e+00> : vector<8x128xf32>
    %150 = tpu.matmul %147, %149, %cst_111 {dimension_numbers = #tpu.dot_dimension_numbers<[1], [0], [0], [1], [0, 0, 1, 1], [], []>} : vector<8x144xf32>, vector<144x128xf32>, vector<8x128xf32> -> vector<8x128xf32>
    %c1_112 = arith.constant 1 : index
    %c0_113 = arith.constant 0 : index
    %c0_114 = arith.constant 0 : index
    %151 = vector.load %arg4[%c1_112, %c0_113, %c0_114] : memref<2x144x128xf32, #tpu.memory_space<vmem>>, vector<1x144x128xf32>
    %152 = vector.shape_cast %151 : vector<1x144x128xf32> to vector<144x128xf32>
    %cst_115 = arith.constant dense<0.000000e+00> : vector<8x128xf32>
    %153 = tpu.matmul %147, %152, %cst_115 {dimension_numbers = #tpu.dot_dimension_numbers<[1], [0], [0], [1], [0, 0, 1, 1], [], []>} : vector<8x144xf32>, vector<144x128xf32>, vector<8x128xf32> -> vector<8x128xf32>
    %154 = arith.maximumf %150, %153 : vector<8x128xf32>
    %155 = tpu.concatenate %44, %54, %64, %74, %84, %94, %104, %114, %124, %134, %144, %154 in 0 : vector<8x128xf32>, vector<8x128xf32>, vector<8x128xf32>, vector<8x128xf32>, vector<8x128xf32>, vector<8x128xf32>, vector<8x128xf32>, vector<8x128xf32>, vector<8x128xf32>, vector<8x128xf32>, vector<8x128xf32>, vector<8x128xf32> -> vector<96x128xf32>
    %156 = vector.extract_strided_slice %155 {offsets = [0, 0], sizes = [64, 128], strides = [1, 1]} : vector<96x128xf32> to vector<64x128xf32>
    %c0_116 = arith.constant 0 : index
    %c0_117 = arith.constant 0 : index
    %c0_118 = arith.constant 0 : index
    %157 = vector.load %arg5[%c0_116, %c0_117, %c0_118] : memref<5x128x128xf32, #tpu.memory_space<vmem>>, vector<1x128x128xf32>
    %158 = vector.shape_cast %157 : vector<1x128x128xf32> to vector<128x128xf32>
    %cst_119 = arith.constant dense<0.000000e+00> : vector<64x128xf32>
    %159 = tpu.matmul %156, %158, %cst_119 {dimension_numbers = #tpu.dot_dimension_numbers<[1], [0], [0], [1], [0, 0, 1, 1], [], []>} : vector<64x128xf32>, vector<128x128xf32>, vector<64x128xf32> -> vector<64x128xf32>
    %160 = vector.extract_strided_slice %155 {offsets = [8, 0], sizes = [64, 128], strides = [1, 1]} : vector<96x128xf32> to vector<64x128xf32>
    %c1_120 = arith.constant 1 : index
    %c0_121 = arith.constant 0 : index
    %c0_122 = arith.constant 0 : index
    %161 = vector.load %arg5[%c1_120, %c0_121, %c0_122] : memref<5x128x128xf32, #tpu.memory_space<vmem>>, vector<1x128x128xf32>
    %162 = vector.shape_cast %161 : vector<1x128x128xf32> to vector<128x128xf32>
    %cst_123 = arith.constant dense<0.000000e+00> : vector<64x128xf32>
    %163 = tpu.matmul %160, %162, %cst_123 {dimension_numbers = #tpu.dot_dimension_numbers<[1], [0], [0], [1], [0, 0, 1, 1], [], []>} : vector<64x128xf32>, vector<128x128xf32>, vector<64x128xf32> -> vector<64x128xf32>
    %164 = arith.addf %159, %163 : vector<64x128xf32>
    %165 = vector.extract_strided_slice %155 {offsets = [16, 0], sizes = [64, 128], strides = [1, 1]} : vector<96x128xf32> to vector<64x128xf32>
    %c2_124 = arith.constant 2 : index
    %c0_125 = arith.constant 0 : index
    %c0_126 = arith.constant 0 : index
    %166 = vector.load %arg5[%c2_124, %c0_125, %c0_126] : memref<5x128x128xf32, #tpu.memory_space<vmem>>, vector<1x128x128xf32>
    %167 = vector.shape_cast %166 : vector<1x128x128xf32> to vector<128x128xf32>
    %cst_127 = arith.constant dense<0.000000e+00> : vector<64x128xf32>
    %168 = tpu.matmul %165, %167, %cst_127 {dimension_numbers = #tpu.dot_dimension_numbers<[1], [0], [0], [1], [0, 0, 1, 1], [], []>} : vector<64x128xf32>, vector<128x128xf32>, vector<64x128xf32> -> vector<64x128xf32>
    %169 = arith.addf %164, %168 : vector<64x128xf32>
    %170 = vector.extract_strided_slice %155 {offsets = [24, 0], sizes = [64, 128], strides = [1, 1]} : vector<96x128xf32> to vector<64x128xf32>
    %c3_128 = arith.constant 3 : index
    %c0_129 = arith.constant 0 : index
    %c0_130 = arith.constant 0 : index
    %171 = vector.load %arg5[%c3_128, %c0_129, %c0_130] : memref<5x128x128xf32, #tpu.memory_space<vmem>>, vector<1x128x128xf32>
    %172 = vector.shape_cast %171 : vector<1x128x128xf32> to vector<128x128xf32>
    %cst_131 = arith.constant dense<0.000000e+00> : vector<64x128xf32>
    %173 = tpu.matmul %170, %172, %cst_131 {dimension_numbers = #tpu.dot_dimension_numbers<[1], [0], [0], [1], [0, 0, 1, 1], [], []>} : vector<64x128xf32>, vector<128x128xf32>, vector<64x128xf32> -> vector<64x128xf32>
    %174 = arith.addf %169, %173 : vector<64x128xf32>
    %175 = vector.extract_strided_slice %155 {offsets = [32, 0], sizes = [64, 128], strides = [1, 1]} : vector<96x128xf32> to vector<64x128xf32>
    %c4_132 = arith.constant 4 : index
    %c0_133 = arith.constant 0 : index
    %c0_134 = arith.constant 0 : index
    %176 = vector.load %arg5[%c4_132, %c0_133, %c0_134] : memref<5x128x128xf32, #tpu.memory_space<vmem>>, vector<1x128x128xf32>
    %177 = vector.shape_cast %176 : vector<1x128x128xf32> to vector<128x128xf32>
    %cst_135 = arith.constant dense<0.000000e+00> : vector<64x128xf32>
    %178 = tpu.matmul %175, %177, %cst_135 {dimension_numbers = #tpu.dot_dimension_numbers<[1], [0], [0], [1], [0, 0, 1, 1], [], []>} : vector<64x128xf32>, vector<128x128xf32>, vector<64x128xf32> -> vector<64x128xf32>
    %179 = arith.addf %174, %178 : vector<64x128xf32>
    %c0_136 = arith.constant 0 : index
    %c0_137 = arith.constant 0 : index
    %180 = vector.load %arg6[%c0_136, %c0_137] : memref<1x128xf32, #tpu.memory_space<vmem>>, vector<1x128xf32>
    %181 = vector.broadcast %180 : vector<1x128xf32> to vector<64x128xf32>
    %182 = arith.addf %179, %181 : vector<64x128xf32>
    %cst_138 = arith.constant 0.000000e+00 : f32
    %183 = vector.broadcast %cst_138 : f32 to vector<64x128xf32>
    %184 = arith.maximumf %182, %183 : vector<64x128xf32>
    %185 = vector.extract_strided_slice %184 {offsets = [0, 0], sizes = [8, 128], strides = [1, 1]} : vector<64x128xf32> to vector<8x128xf32>
    %186 = vector.extract_strided_slice %184 {offsets = [8, 0], sizes = [8, 128], strides = [1, 1]} : vector<64x128xf32> to vector<8x128xf32>
    %187 = arith.maximumf %185, %186 : vector<8x128xf32>
    %c0_139 = arith.constant 0 : index
    %c0_140 = arith.constant 0 : index
    %c0_141 = arith.constant 0 : index
    %188 = vector.load %arg7[%c0_139, %c0_140, %c0_141] : memref<2x128x64xf32, #tpu.memory_space<vmem>>, vector<1x128x64xf32>
    %189 = vector.shape_cast %188 : vector<1x128x64xf32> to vector<128x64xf32>
    %cst_142 = arith.constant dense<0.000000e+00> : vector<8x64xf32>
    %190 = tpu.matmul %187, %189, %cst_142 {dimension_numbers = #tpu.dot_dimension_numbers<[1], [0], [0], [1], [0, 0, 1, 1], [], []>} : vector<8x128xf32>, vector<128x64xf32>, vector<8x64xf32> -> vector<8x64xf32>
    %c1_143 = arith.constant 1 : index
    %c0_144 = arith.constant 0 : index
    %c0_145 = arith.constant 0 : index
    %191 = vector.load %arg7[%c1_143, %c0_144, %c0_145] : memref<2x128x64xf32, #tpu.memory_space<vmem>>, vector<1x128x64xf32>
    %192 = vector.shape_cast %191 : vector<1x128x64xf32> to vector<128x64xf32>
    %cst_146 = arith.constant dense<0.000000e+00> : vector<8x64xf32>
    %193 = tpu.matmul %187, %192, %cst_146 {dimension_numbers = #tpu.dot_dimension_numbers<[1], [0], [0], [1], [0, 0, 1, 1], [], []>} : vector<8x128xf32>, vector<128x64xf32>, vector<8x64xf32> -> vector<8x64xf32>
    %194 = arith.maximumf %190, %193 : vector<8x64xf32>
    %195 = vector.extract_strided_slice %184 {offsets = [16, 0], sizes = [8, 128], strides = [1, 1]} : vector<64x128xf32> to vector<8x128xf32>
    %196 = vector.extract_strided_slice %184 {offsets = [24, 0], sizes = [8, 128], strides = [1, 1]} : vector<64x128xf32> to vector<8x128xf32>
    %197 = arith.maximumf %195, %196 : vector<8x128xf32>
    %c0_147 = arith.constant 0 : index
    %c0_148 = arith.constant 0 : index
    %c0_149 = arith.constant 0 : index
    %198 = vector.load %arg7[%c0_147, %c0_148, %c0_149] : memref<2x128x64xf32, #tpu.memory_space<vmem>>, vector<1x128x64xf32>
    %199 = vector.shape_cast %198 : vector<1x128x64xf32> to vector<128x64xf32>
    %cst_150 = arith.constant dense<0.000000e+00> : vector<8x64xf32>
    %200 = tpu.matmul %197, %199, %cst_150 {dimension_numbers = #tpu.dot_dimension_numbers<[1], [0], [0], [1], [0, 0, 1, 1], [], []>} : vector<8x128xf32>, vector<128x64xf32>, vector<8x64xf32> -> vector<8x64xf32>
    %c1_151 = arith.constant 1 : index
    %c0_152 = arith.constant 0 : index
    %c0_153 = arith.constant 0 : index
    %201 = vector.load %arg7[%c1_151, %c0_152, %c0_153] : memref<2x128x64xf32, #tpu.memory_space<vmem>>, vector<1x128x64xf32>
    %202 = vector.shape_cast %201 : vector<1x128x64xf32> to vector<128x64xf32>
    %cst_154 = arith.constant dense<0.000000e+00> : vector<8x64xf32>
    %203 = tpu.matmul %197, %202, %cst_154 {dimension_numbers = #tpu.dot_dimension_numbers<[1], [0], [0], [1], [0, 0, 1, 1], [], []>} : vector<8x128xf32>, vector<128x64xf32>, vector<8x64xf32> -> vector<8x64xf32>
    %204 = arith.maximumf %200, %203 : vector<8x64xf32>
    %205 = vector.extract_strided_slice %184 {offsets = [32, 0], sizes = [8, 128], strides = [1, 1]} : vector<64x128xf32> to vector<8x128xf32>
    %206 = vector.extract_strided_slice %184 {offsets = [40, 0], sizes = [8, 128], strides = [1, 1]} : vector<64x128xf32> to vector<8x128xf32>
    %207 = arith.maximumf %205, %206 : vector<8x128xf32>
    %c0_155 = arith.constant 0 : index
    %c0_156 = arith.constant 0 : index
    %c0_157 = arith.constant 0 : index
    %208 = vector.load %arg7[%c0_155, %c0_156, %c0_157] : memref<2x128x64xf32, #tpu.memory_space<vmem>>, vector<1x128x64xf32>
    %209 = vector.shape_cast %208 : vector<1x128x64xf32> to vector<128x64xf32>
    %cst_158 = arith.constant dense<0.000000e+00> : vector<8x64xf32>
    %210 = tpu.matmul %207, %209, %cst_158 {dimension_numbers = #tpu.dot_dimension_numbers<[1], [0], [0], [1], [0, 0, 1, 1], [], []>} : vector<8x128xf32>, vector<128x64xf32>, vector<8x64xf32> -> vector<8x64xf32>
    %c1_159 = arith.constant 1 : index
    %c0_160 = arith.constant 0 : index
    %c0_161 = arith.constant 0 : index
    %211 = vector.load %arg7[%c1_159, %c0_160, %c0_161] : memref<2x128x64xf32, #tpu.memory_space<vmem>>, vector<1x128x64xf32>
    %212 = vector.shape_cast %211 : vector<1x128x64xf32> to vector<128x64xf32>
    %cst_162 = arith.constant dense<0.000000e+00> : vector<8x64xf32>
    %213 = tpu.matmul %207, %212, %cst_162 {dimension_numbers = #tpu.dot_dimension_numbers<[1], [0], [0], [1], [0, 0, 1, 1], [], []>} : vector<8x128xf32>, vector<128x64xf32>, vector<8x64xf32> -> vector<8x64xf32>
    %214 = arith.maximumf %210, %213 : vector<8x64xf32>
    %215 = vector.extract_strided_slice %184 {offsets = [48, 0], sizes = [8, 128], strides = [1, 1]} : vector<64x128xf32> to vector<8x128xf32>
    %216 = vector.extract_strided_slice %184 {offsets = [56, 0], sizes = [8, 128], strides = [1, 1]} : vector<64x128xf32> to vector<8x128xf32>
    %217 = arith.maximumf %215, %216 : vector<8x128xf32>
    %c0_163 = arith.constant 0 : index
    %c0_164 = arith.constant 0 : index
    %c0_165 = arith.constant 0 : index
    %218 = vector.load %arg7[%c0_163, %c0_164, %c0_165] : memref<2x128x64xf32, #tpu.memory_space<vmem>>, vector<1x128x64xf32>
    %219 = vector.shape_cast %218 : vector<1x128x64xf32> to vector<128x64xf32>
    %cst_166 = arith.constant dense<0.000000e+00> : vector<8x64xf32>
    %220 = tpu.matmul %217, %219, %cst_166 {dimension_numbers = #tpu.dot_dimension_numbers<[1], [0], [0], [1], [0, 0, 1, 1], [], []>} : vector<8x128xf32>, vector<128x64xf32>, vector<8x64xf32> -> vector<8x64xf32>
    %c1_167 = arith.constant 1 : index
    %c0_168 = arith.constant 0 : index
    %c0_169 = arith.constant 0 : index
    %221 = vector.load %arg7[%c1_167, %c0_168, %c0_169] : memref<2x128x64xf32, #tpu.memory_space<vmem>>, vector<1x128x64xf32>
    %222 = vector.shape_cast %221 : vector<1x128x64xf32> to vector<128x64xf32>
    %cst_170 = arith.constant dense<0.000000e+00> : vector<8x64xf32>
    %223 = tpu.matmul %217, %222, %cst_170 {dimension_numbers = #tpu.dot_dimension_numbers<[1], [0], [0], [1], [0, 0, 1, 1], [], []>} : vector<8x128xf32>, vector<128x64xf32>, vector<8x64xf32> -> vector<8x64xf32>
    %224 = arith.maximumf %220, %223 : vector<8x64xf32>
    %225 = tpu.concatenate %194, %204, %214, %224 in 1 : vector<8x64xf32>, vector<8x64xf32>, vector<8x64xf32>, vector<8x64xf32> -> vector<8x256xf32>
    %c0_171 = arith.constant 0 : index
    %c0_172 = arith.constant 0 : index
    %226 = vector.load %arg8[%c0_171, %c0_172] : memref<256x128xf32, #tpu.memory_space<vmem>>, vector<256x128xf32>
    %cst_173 = arith.constant dense<0.000000e+00> : vector<8x128xf32>
    %227 = tpu.matmul %225, %226, %cst_173 {dimension_numbers = #tpu.dot_dimension_numbers<[1], [0], [0], [1], [0, 0, 1, 1], [], []>} : vector<8x256xf32>, vector<256x128xf32>, vector<8x128xf32> -> vector<8x128xf32>
    %c0_174 = arith.constant 0 : index
    %c0_175 = arith.constant 0 : index
    %228 = vector.load %arg9[%c0_174, %c0_175] : memref<1x128xf32, #tpu.memory_space<vmem>>, vector<1x128xf32>
    %229 = vector.broadcast %228 : vector<1x128xf32> to vector<8x128xf32>
    %230 = arith.addf %227, %229 : vector<8x128xf32>
    %cst_176 = arith.constant 0.000000e+00 : f32
    %231 = vector.broadcast %cst_176 : f32 to vector<8x128xf32>
    %232 = arith.maximumf %230, %231 : vector<8x128xf32>
    %c0_177 = arith.constant 0 : index
    %c0_178 = arith.constant 0 : index
    %233 = vector.load %arg10[%c0_177, %c0_178] : memref<128x128xf32, #tpu.memory_space<vmem>>, vector<128x128xf32>
    %cst_179 = arith.constant dense<0.000000e+00> : vector<8x128xf32>
    %234 = tpu.matmul %232, %233, %cst_179 {dimension_numbers = #tpu.dot_dimension_numbers<[1], [0], [0], [1], [0, 0, 1, 1], [], []>} : vector<8x128xf32>, vector<128x128xf32>, vector<8x128xf32> -> vector<8x128xf32>
    %c0_180 = arith.constant 0 : index
    %c0_181 = arith.constant 0 : index
    %235 = vector.load %arg11[%c0_180, %c0_181] : memref<1x128xf32, #tpu.memory_space<vmem>>, vector<1x128xf32>
    %236 = vector.broadcast %235 : vector<1x128xf32> to vector<8x128xf32>
    %237 = arith.addf %234, %236 : vector<8x128xf32>
    %cst_182 = arith.constant 0.000000e+00 : f32
    %238 = vector.broadcast %cst_182 : f32 to vector<8x128xf32>
    %239 = arith.maximumf %237, %238 : vector<8x128xf32>
    %c0_183 = arith.constant 0 : index
    %c0_184 = arith.constant 0 : index
    %240 = vector.load %arg12[%c0_183, %c0_184] : memref<128x128xf32, #tpu.memory_space<vmem>>, vector<128x128xf32>
    %cst_185 = arith.constant dense<0.000000e+00> : vector<8x128xf32>
    %241 = tpu.matmul %239, %240, %cst_185 {dimension_numbers = #tpu.dot_dimension_numbers<[1], [0], [0], [1], [0, 0, 1, 1], [], []>} : vector<8x128xf32>, vector<128x128xf32>, vector<8x128xf32> -> vector<8x128xf32>
    %c0_186 = arith.constant 0 : index
    %c0_187 = arith.constant 0 : index
    %242 = vector.load %arg13[%c0_186, %c0_187] : memref<1x128xf32, #tpu.memory_space<vmem>>, vector<1x128xf32>
    %243 = vector.broadcast %242 : vector<1x128xf32> to vector<8x128xf32>
    %244 = arith.addf %241, %243 : vector<8x128xf32>
    %c0_188 = arith.constant 0 : index
    %c0_189 = arith.constant 0 : index
    %245 = vector.load %arg14[%c0_188, %c0_189] : memref<8x128xf32, #tpu.memory_space<vmem>>, vector<8x128xf32>
    tpu.vector_store %arg14[%c0_188, %c0_189], %244 {strides = array<i32>} : memref<8x128xf32, #tpu.memory_space<vmem>>, vector<8x128xf32>,
    return
  }
  func.func @transform_0(%arg0: i32) -> (i32, i32, i32) {
    %c0_i32 = arith.constant 0 : i32
    %c0_i32_0 = arith.constant 0 : i32
    %c0_i32_1 = arith.constant 0 : i32
    return %c0_i32, %arg0, %c0_i32_0 : i32, i32, i32
  }
  func.func @transform_1(%arg0: i32) -> (i32, i32, i32) {
    %c0_i32 = arith.constant 0 : i32
    %c0_i32_0 = arith.constant 0 : i32
    %c0_i32_1 = arith.constant 0 : i32
    %c0_i32_2 = arith.constant 0 : i32
    return %c0_i32, %c0_i32_0, %c0_i32_1 : i32, i32, i32
  }
  func.func @transform_2(%arg0: i32) -> (i32, i32) {
    %c0_i32 = arith.constant 0 : i32
    %c0_i32_0 = arith.constant 0 : i32
    %c0_i32_1 = arith.constant 0 : i32
    return %c0_i32, %c0_i32_0 : i32, i32
  }
  func.func @transform_3(%arg0: i32) -> (i32, i32, i32) {
    %c0_i32 = arith.constant 0 : i32
    %c0_i32_0 = arith.constant 0 : i32
    %c0_i32_1 = arith.constant 0 : i32
    %c0_i32_2 = arith.constant 0 : i32
    return %c0_i32, %c0_i32_0, %c0_i32_1 : i32, i32, i32
  }
  func.func @transform_4(%arg0: i32) -> (i32, i32, i32) {
    %c0_i32 = arith.constant 0 : i32
    %c0_i32_0 = arith.constant 0 : i32
    %c0_i32_1 = arith.constant 0 : i32
    %c0_i32_2 = arith.constant 0 : i32
    return %c0_i32, %c0_i32_0, %c0_i32_1 : i32, i32, i32
  }
  func.func @transform_5(%arg0: i32) -> (i32, i32) {
    %c0_i32 = arith.constant 0 : i32
    %c0_i32_0 = arith.constant 0 : i32
    %c0_i32_1 = arith.constant 0 : i32
    return %c0_i32, %c0_i32_0 : i32, i32
  }
  func.func @transform_6(%arg0: i32) -> (i32, i32, i32) {
    %c0_i32 = arith.constant 0 : i32
    %c0_i32_0 = arith.constant 0 : i32
    %c0_i32_1 = arith.constant 0 : i32
    %c0_i32_2 = arith.constant 0 : i32
    return %c0_i32, %c0_i32_0, %c0_i32_1 : i32, i32, i32
  }
  func.func @transform_7(%arg0: i32) -> (i32, i32) {
    %c0_i32 = arith.constant 0 : i32
    %c0_i32_0 = arith.constant 0 : i32
    %c0_i32_1 = arith.constant 0 : i32
    return %c0_i32, %c0_i32_0 : i32, i32
  }
  func.func @transform_8(%arg0: i32) -> (i32, i32) {
    %c0_i32 = arith.constant 0 : i32
    %c0_i32_0 = arith.constant 0 : i32
    %c0_i32_1 = arith.constant 0 : i32
    return %c0_i32, %c0_i32_0 : i32, i32
  }
  func.func @transform_9(%arg0: i32) -> (i32, i32) {
    %c0_i32 = arith.constant 0 : i32
    %c0_i32_0 = arith.constant 0 : i32
    %c0_i32_1 = arith.constant 0 : i32
    return %c0_i32, %c0_i32_0 : i32, i32
  }
  func.func @transform_10(%arg0: i32) -> (i32, i32) {
    %c0_i32 = arith.constant 0 : i32
    %c0_i32_0 = arith.constant 0 : i32
    %c0_i32_1 = arith.constant 0 : i32
    return %c0_i32, %c0_i32_0 : i32, i32
  }
  func.func @transform_11(%arg0: i32) -> (i32, i32) {
    %c0_i32 = arith.constant 0 : i32
    %c0_i32_0 = arith.constant 0 : i32
    %c0_i32_1 = arith.constant 0 : i32
    return %c0_i32, %c0_i32_0 : i32, i32
  }
  func.func @transform_12(%arg0: i32) -> (i32, i32) {
    %c0_i32 = arith.constant 0 : i32
    %c0_i32_0 = arith.constant 0 : i32
    %c0_i32_1 = arith.constant 0 : i32
    return %c0_i32, %c0_i32_0 : i32, i32
  }
  func.func @transform_13(%arg0: i32) -> (i32, i32) {
    %c0_i32 = arith.constant 0 : i32
    %c0_i32_0 = arith.constant 0 : i32
    return %arg0, %c0_i32 : i32, i32
  }
}

</mosaic_0001>

<bundles_post_ra>
// kernel: lenet_forward.1
= control target key start
LH: loop header
LB: loop body
LE: loop exit
PB: predicated region body
PF: predicated region fallthrough
CT: control target
= control target key end

     0   :  { %vm162_vm0 = vcmask 1043456   ;;  %v7436_v3 = vmov 0.0   ;;  %vm7437_vm1 = vmmov 1   ;;  %vm89_vm3 = vcmask 228352   ;;  %s7440_s19 = smov 64   ;;  %s9739_s1 = inlined_call_operand.vmem [shape: f32[5,28,144], index: 1, kind: input, shape index: {}]   ;;  %s9740_s0 = inlined_call_operand.vmem [shape: f32[28,8,28], index: 0, kind: input, shape index: {}]   ;;  %s9741_s3 = inlined_call_operand.vmem [shape: f32[2,144,128], index: 3, kind: input, shape index: {}]   ;;  %s9742_s2 = inlined_call_operand.vmem [shape: f32[1,144], index: 2, kind: input, shape index: {}]   ;;  %s9743_s4 = inlined_call_operand.vmem [shape: f32[5,128,128], index: 4, kind: input, shape index: {}]   ;;  %s9744_s6 = inlined_call_operand.vmem [shape: f32[2,128,64], index: 6, kind: input, shape index: {}]   ;;  %s9745_s5 = inlined_call_operand.vmem [shape: f32[1,128], index: 5, kind: input, shape index: {}]   ;;  %s9746_s7 = inlined_call_operand.vmem [shape: f32[256,128], index: 7, kind: input, shape index: {}]   ;;  %s9747_s9 = inlined_call_operand.vmem [shape: f32[128,128], index: 9, kind: input, shape index: {}]   ;;  %s9748_s11 = inlined_call_operand.vmem [shape: f32[128,128], index: 11, kind: input, shape index: {}]   ;;  %s9749_s8 = inlined_call_operand.vmem [shape: f32[1,128], index: 8, kind: input, shape index: {}]   ;;  %s9750_s10 = inlined_call_operand.vmem [shape: f32[1,128], index: 10, kind: input, shape index: {}]   ;;  %s9751_s12 = inlined_call_operand.vmem [shape: f32[1,128], index: 12, kind: input, shape index: {}]   ;;  %s9752_s13 = inlined_call_operand.vmem [shape: f32[8,128], index: 13, kind: output, shape index: {}]  }
   0x1   :  { %v4890_v0 = vld [vmem:[%s9739_s1 + $0x48] sm:$0xff]  ;;  %v4892_v1 = vld [vmem:[%s9739_s1 + $0x58] sm:$0xff]  ;;  %v4889_v2 = vld [vmem:[%s9739_s1 + $0x40] sm:$0xff]  ;;  %233 = vmatprep.mubr.f32.mxu0 %v7436_v3  ;;  %v7438_v10 = vmov 0.0|0.0   ;;  %vm1549_vm4 = vcmask 130048   ;;  %vm7439_vm5 = vmmov 0  }
   0x2   :  { %v6072_v4 = vpack.c.bf16 %v4892_v1, %v4890_v0  ;;  %v4891_v5 = vld [vmem:[%s9739_s1 + $0x50] sm:$0xff]  ;;  %v4894_v6 = vld [vmem:[%s9739_s1 + $0x68] sm:$0xff]  ;;  %v4896_v7 = vld [vmem:[%s9739_s1 + $0x78] sm:$0xf]  ;;  %6122 = vmatprep.subr.bf16.mxu1 %v7438_v10  ;;  %vm4584_vm6 = vcmask 523264  }
   0x3   :  { %v6074_v8 = vpack.c.bf16 %v4891_v5, %v4889_v2  ;;  %v6076_v9 = vpack.c.bf16 %v4896_v7, %v4894_v6  ;;  %vm7530_vm2 = vmpackc.low %vm162_vm0, %vm7437_vm1  ;;  %v4893_v11 = vld [vmem:[%s9739_s1 + $0x60] sm:$0xff]  ;;  %v4895_v12 = vld [vmem:[%s9739_s1 + $0x70] sm:$0xf] }
   0x4   :  { %6073 = vmatprep.subr.bf16.mxu0 %v6072_v4  ;;  %v73_v13 = vld [vmem:[%s9739_s1 + $0x8] sm:$0xff]  ;;  %v75_v14 = vld [vmem:[%s9739_s1 + $0x18] sm:$0xff]  ;;  %v6079_v15 = vpack.c.bf16 %v4895_v12, %v4893_v11  ;;  %v72_v17 = vld [vmem:[%s9739_s1] sm:$0xff] }
   0x5   :  { %6075 = vmatpush1.bf16.msra.mxu0 %v6074_v8  ;;  %v6082_v16 = vpack.c.bf16 %v75_v14, %v73_v13  ;;  %v74_v18 = vld [vmem:[%s9739_s1 + $0x10] sm:$0xff]  ;;  %v7559_v19 = vld [vmem:[%s9740_s0 + $0x8] sm:$0xff]  ;;  %v79_v22 = vld [vmem:[%s9739_s1 + $0x38] sm:$0xf] }
   0x6   :  { %6078 = vmatprep.subr.msk.bf16.mxu0 %vm7530_vm2, %v6076_v9  ;;  %v6084_v20 = vpack.c.bf16 %v74_v18, %v72_v17  ;;  %v77_v21 = vld [vmem:[%s9739_s1 + $0x28] sm:$0xff]  ;;  %v76_v23 = vld [vmem:[%s9739_s1 + $0x20] sm:$0xff]  ;;  %v78_v24 = vld [vmem:[%s9739_s1 + $0x30] sm:$0xf] }
   0x7   :  { %v6086_v25 = vpack.c.bf16 %v79_v22, %v77_v21  ;;  %v7579_v26 = vld [vmem:[%s9740_s0 + $0x10] sm:$0xff]  ;;  %v6089_v27 = vpack.c.bf16 %v78_v24, %v76_v23  ;;  %v4950_v28 = vld [vmem:[%s9739_s1 + $0x88] sm:$0xff]  ;;  %v4952_v29 = vld [vmem:[%s9739_s1 + $0x98] sm:$0xff] }
   0x8   :  { %v6092_v30 = vpack.c.bf16 %v4952_v29, %v4950_v28  ;;  %v7595_v31 = vld [vmem:[%s9740_s0 + $0x18] sm:$0xff]  ;;  %v7605_v32 = vld [vmem:[%s9740_s0 + $0x20] sm:$0xff]  ;;  %v7613_v33 = vld [vmem:[%s9740_s0 + $0x28] sm:$0xff] }
   0x9   :  { %6081 = vmatpush1.bf16.msk.msra.mxu0 %vm7530_vm2, %v6079_v15  ;;  %v7621_v34 = vld [vmem:[%s9740_s0 + $0x30] sm:$0xff]  ;;  %v7629_v35 = vld [vmem:[%s9740_s0 + $0x38] sm:$0xff]  ;;  %v7637_v36 = vld [vmem:[%s9740_s0 + $0x40] sm:$0xff] }
   0xa   :  { %6083 = vmatprep.subr.bf16.mxu0 %v6082_v16  ;;  %v7645_v37 = vld [vmem:[%s9740_s0 + $0x48] sm:$0xff]  ;;  %v7653_v38 = vld [vmem:[%s9740_s0 + $0x50] sm:$0xff]  ;;  %v7661_v39 = vld [vmem:[%s9740_s0 + $0x58] sm:$0xff] }
   0xb   :  { %v7669_v40 = vld [vmem:[%s9740_s0 + $0x60] sm:$0xff]  ;;  %v7677_v41 = vld [vmem:[%s9740_s0 + $0x68] sm:$0xff]  ;;  %v7685_v42 = vld [vmem:[%s9740_s0 + $0x70] sm:$0xff] }
   0xc   :  { %4899 = vmatmul.mubr.msk.f32.vlgmr.msra.gmra.mrb[0].mxu0 %vm89_vm3, %v7559_v19  ;;  %v7693_v43 = vld [vmem:[%s9740_s0 + $0x78] sm:$0xff]  ;;  %v7701_v44 = vld [vmem:[%s9740_s0 + $0x80] sm:$0xff]  ;;  %v7709_v45 = vld [vmem:[%s9740_s0 + $0x88] sm:$0xff] }
   0xd   :  { %6085 = vmatpush1.bf16.msra.mxu0 %v6084_v20  ;;  %239 = vmatprep.mubr.f32.mxu0 %v7436_v3  ;;  %v7717_v46 = vld [vmem:[%s9740_s0 + $0x90] sm:$0xff]  ;;  %v7725_v47 = vld [vmem:[%s9740_s0 + $0x98] sm:$0xff]  ;;  %v7733_v48 = vld [vmem:[%s9740_s0 + $0xa0] sm:$0xff] }
   0xe   :  { %6088 = vmatprep.subr.msk.bf16.mxu0 %vm7530_vm2, %v6086_v25  ;;  %v7741_v49 = vld [vmem:[%s9740_s0 + $0xa8] sm:$0xff]  ;;  %v7749_v50 = vld [vmem:[%s9740_s0 + $0xb0] sm:$0xff]  ;;  %v7757_v51 = vld [vmem:[%s9740_s0 + $0xb8] sm:$0xff] }
   0xf   :  { %v7765_v52 = vld [vmem:[%s9740_s0 + $0xc0] sm:$0xff]  ;;  %v4951_v54 = vld [vmem:[%s9739_s1 + $0x90] sm:$0xff]  ;;  %v4954_v55 = vld [vmem:[%s9739_s1 + $0xa8] sm:$0xff] }
  0x10   :  { %4900 = vmatmul.mubr.msk.f32.gmra.mrb[2].mxu0 %vm89_vm3, %v7579_v26  ;;  %v4949_v53 = vld [vmem:[%s9739_s1 + $0x80] sm:$0xff]  ;;  %v4956_v56 = vld [vmem:[%s9739_s1 + $0xb8] sm:$0xf]  ;;  %v4955_v61 = vld [vmem:[%s9739_s1 + $0xb0] sm:$0xf] }
  0x11   :  { %245 = vmatprep.mubr.f32.mxu0 %v7436_v3  ;;  %6091 = vmatpush1.bf16.msk.msra.mxu0 %vm7530_vm2, %v6089_v27  ;;  %v44_v57 = vld [vmem:[%s9740_s0] sm:$0xff]  ;;  %v6094_v58 = vpack.c.bf16 %v4951_v54, %v4949_v53  ;;  %v6096_v59 = vpack.c.bf16 %v4956_v56, %v4954_v55  ;;  %v4984_v62 = vld [vmem:[%s9739_s1 + $0xc8] sm:$0xff]  ;;  %v4986_v63 = vld [vmem:[%s9739_s1 + $0xd8] sm:$0xff] }
  0x12   :  { %6093 = vmatprep.subr.bf16.mxu0 %v6092_v30  ;;  %v4953_v60 = vld [vmem:[%s9739_s1 + $0xa0] sm:$0xff]  ;;  %v6102_v1 = vpack.c.bf16 %v4986_v63, %v4984_v62  ;;  %v4985_v4 = vld [vmem:[%s9739_s1 + $0xd0] sm:$0xff]  ;;  %v4988_v5 = vld [vmem:[%s9739_s1 + $0xe8] sm:$0xff] }
  0x13   :  { %v6099_v0 = vpack.c.bf16 %v4955_v61, %v4953_v60  ;;  %v4983_v2 = vld [vmem:[%s9739_s1 + $0xc0] sm:$0xff]  ;;  %v4990_v6 = vld [vmem:[%s9739_s1 + $0xf8] sm:$0xf]  ;;  %v4989_v11 = vld [vmem:[%s9739_s1 + $0xf0] sm:$0xf] }
  0x14   :  { %4901 = vmatmul.mubr.msk.f32.gmra.mrb[4].mxu0 %vm89_vm3, %v7595_v31  ;;  %v6104_v7 = vpack.c.bf16 %v4985_v4, %v4983_v2  ;;  %v6106_v8 = vpack.c.bf16 %v4990_v6, %v4988_v5  ;;  %v4987_v9 = vld [vmem:[%s9739_s1 + $0xe0] sm:$0xff]  ;;  %v5018_v12 = vld [vmem:[%s9739_s1 + $0x108] sm:$0xff]  ;;  %v5020_v13 = vld [vmem:[%s9739_s1 + $0x118] sm:$0xff] }
  0x15   :  { %251 = vmatprep.mubr.f32.mxu0 %v7436_v3  ;;  %v6109_v14 = vpack.c.bf16 %v4989_v11, %v4987_v9  ;;  %v6112_v15 = vpack.c.bf16 %v5020_v13, %v5018_v12  ;;  %v7972_v16 = vld [vmem:[%s9740_s0 + $0xc8] sm:$0xff]  ;;  %v5017_v17 = vld [vmem:[%s9739_s1 + $0x100] sm:$0xff]  ;;  %v5019_v18 = vld [vmem:[%s9739_s1 + $0x110] sm:$0xff] }
  0x16   :  { %v5024_v20 = vld [vmem:[%s9739_s1 + $0x138] sm:$0xf]  ;;  %v6114_v21 = vpack.c.bf16 %v5019_v18, %v5017_v17  ;;  %v5021_v23 = vld [vmem:[%s9739_s1 + $0x120] sm:$0xff]  ;;  %v5023_v24 = vld [vmem:[%s9739_s1 + $0x130] sm:$0xf] }
  0x17   :  { %v6119_v25 = vpack.c.bf16 %v5023_v24, %v5021_v23  ;;  %v1532_v27 = vld [vmem:[%s9741_s3 + $0x8] sm:$0xff]  ;;  %v1533_v28 = vld [vmem:[%s9741_s3 + $0x10] sm:$0xff]  ;;  %v1534_v30 = vld [vmem:[%s9741_s3 + $0x18] sm:$0xff] }
  0x18   :  { %4902 = vmatmul.mubr.msk.f32.gmra.mrb[6].mxu0 %vm89_vm3, %v7605_v32  ;;  %v1535_v53 = vld [vmem:[%s9741_s3 + $0x20] sm:$0xff]  ;;  %v1536_v54 = vld [vmem:[%s9741_s3 + $0x28] sm:$0xff]  ;;  %v1537_v56 = vld [vmem:[%s9741_s3 + $0x30] sm:$0xff] }
  0x19   :  { %257 = vmatprep.mubr.f32.mxu0 %v7436_v3  ;;  %v8079_v55 = vpack.c.bf16 %v1536_v54, %v1535_v53  ;;  %v1540_v60 = vld [vmem:[%s9741_s3 + $0x48] sm:$0xff]  ;;  %v1541_v62 = vld [vmem:[%s9741_s3 + $0x50] sm:$0xff]  ;;  %v1542_v63 = vld [vmem:[%s9741_s3 + $0x58] sm:$0xff] }
  0x1a   :  { %v5060_v4 = vld [vmem:[%s9741_s3 + $0xd0] sm:$0xff]  ;;  %v5061_v5 = vld [vmem:[%s9741_s3 + $0xd8] sm:$0xff]  ;;  %v1421_v23 = vld [vmem:[%s9742_s2] sm:$0x3] }
  0x1b   :  { %v8283_v6 = vpack.c.bf16 %v5061_v5, %v5060_v4  ;;  %v5064_v11 = vld [vmem:[%s9741_s3 + $0xf0] sm:$0xff]  ;;  %v5065_v12 = vld [vmem:[%s9741_s3 + $0xf8] sm:$0xff] }
  0x1c   :  { %4903 = vmatmul.mubr.msk.f32.gmra.mrb[8].mxu0 %vm89_vm3, %v7613_v33  ;;  %v8303_v13 = vpack.c.bf16 %v5065_v12, %v5064_v11  ;;  %v5068_v17 = vld [vmem:[%s9741_s3 + $0x110] sm:$0xff]  ;;  %v5069_v18 = vld [vmem:[%s9741_s3 + $0x118] sm:$0xff] }
  0x1d   :  { %263 = vmatprep.mubr.f32.mxu0 %v7436_v3 }
  0x20   :  { %4904 = vmatmul.mubr.msk.f32.gmra.mrb[10].mxu0 %vm89_vm3, %v7621_v34 }
  0x21   :  { %269 = vmatprep.mubr.f32.mxu0 %v7436_v3 }
  0x24   :  { %4905 = vmatmul.mubr.msk.f32.gmra.mrb[12].mxu0 %vm89_vm3, %v7629_v35 }
  0x25   :  { %275 = vmatprep.mubr.f32.mxu0 %v7436_v3 }
  0x28   :  { %4906 = vmatmul.mubr.msk.f32.gmra.mrb[14].mxu0 %vm89_vm3, %v7637_v36 }
  0x29   :  { %281 = vmatprep.mubr.f32.mxu0 %v7436_v3 }
  0x2c   :  { %4907 = vmatmul.mubr.msk.f32.gmra.mrb[16].mxu0 %vm89_vm3, %v7645_v37 }
  0x2d   :  { %287 = vmatprep.mubr.f32.mxu0 %v7436_v3 }
  0x30   :  { %4908 = vmatmul.mubr.msk.f32.gmra.mrb[18].mxu0 %vm89_vm3, %v7653_v38 }
  0x31   :  { %293 = vmatprep.mubr.f32.mxu0 %v7436_v3 }
  0x34   :  { %4909 = vmatmul.mubr.msk.f32.gmra.mrb[20].mxu0 %vm89_vm3, %v7661_v39 }
  0x35   :  { %299 = vmatprep.mubr.f32.mxu0 %v7436_v3 }
  0x38   :  { %4910 = vmatmul.mubr.msk.f32.gmra.mrb[22].mxu0 %vm89_vm3, %v7669_v40 }
  0x39   :  { %305 = vmatprep.mubr.f32.mxu0 %v7436_v3 }
  0x3c   :  { %4911 = vmatmul.mubr.msk.f32.gmra.mrb[24].mxu0 %vm89_vm3, %v7677_v41 }
  0x3d   :  { %311 = vmatprep.mubr.f32.mxu0 %v7436_v3 }
  0x40   :  { %4912 = vmatmul.mubr.msk.f32.gmra.mrb[26].mxu0 %vm89_vm3, %v7685_v42 }
  0x41   :  { %317 = vmatprep.mubr.f32.mxu0 %v7436_v3 }
  0x44   :  { %4913 = vmatmul.mubr.msk.f32.gmra.mrb[28].mxu0 %vm89_vm3, %v7693_v43 }
  0x45   :  { %323 = vmatprep.mubr.f32.mxu0 %v7436_v3 }
  0x48   :  { %4914 = vmatmul.mubr.msk.f32.gmra.mrb[30].mxu0 %vm89_vm3, %v7701_v44 }
  0x49   :  { %329 = vmatprep.mubr.f32.mxu0 %v7436_v3 }
  0x4c   :  { %4915 = vmatmul.mubr.msk.f32.gmra.mrb[32].mxu0 %vm89_vm3, %v7709_v45 }
  0x4d   :  { %335 = vmatprep.mubr.f32.mxu0 %v7436_v3 }
  0x50   :  { %4916 = vmatmul.mubr.msk.f32.gmra.mrb[34].mxu0 %vm89_vm3, %v7717_v46 }
  0x51   :  { %341 = vmatprep.mubr.f32.mxu0 %v7436_v3 }
  0x54   :  { %4917 = vmatmul.mubr.msk.f32.gmra.mrb[36].mxu0 %vm89_vm3, %v7725_v47 }
  0x55   :  { %347 = vmatprep.mubr.f32.mxu0 %v7436_v3 }
  0x58   :  { %4918 = vmatmul.mubr.msk.f32.gmra.mrb[38].mxu0 %vm89_vm3, %v7733_v48 }
  0x59   :  { %353 = vmatprep.mubr.f32.mxu0 %v7436_v3 }
  0x5c   :  { %4919 = vmatmul.mubr.msk.f32.gmra.mrb[40].mxu0 %vm89_vm3, %v7741_v49 }
  0x5d   :  { %359 = vmatprep.mubr.f32.mxu0 %v7436_v3 }
  0x60   :  { %4920 = vmatmul.mubr.msk.f32.gmra.mrb[42].mxu0 %vm89_vm3, %v7749_v50 }
  0x61   :  { %365 = vmatprep.mubr.f32.mxu0 %v7436_v3 }
  0x64   :  { %4921 = vmatmul.mubr.msk.f32.gmra.mrb[44].mxu0 %vm89_vm3, %v7757_v51 }
  0x65   :  { %371 = vmatprep.mubr.f32.mxu0 %v7436_v3 }
  0x68   :  { %4922 = vmatmul.mubr.msk.f32.gmra.mrb[46].mxu0 %vm89_vm3, %v7765_v52 }
  0x69   :  { %451 = vmatprep.mubr.f32.mxu0 %v7436_v3 }
  0x6c   :  { %4925 = vmatmul.mubr.msk.f32.vlgmr.msra.gmra.mrb[0].mxu0 %vm89_vm3, %v44_v57  ;;  %v1538_v57 = vld [vmem:[%s9741_s3 + $0x38] sm:$0xff] }
  0x6d   :  { %6095 = vmatpush1.bf16.msra.mxu0 %v6094_v58  ;;  %457 = vmatprep.mubr.f32.mxu0 %v7436_v3  ;;  %v8092_v58 = vpack.c.bf16 %v1538_v57, %v1537_v56 }
  0x6e   :  { %6098 = vmatprep.subr.msk.bf16.mxu0 %vm7530_vm2, %v6096_v59  ;;  %v1539_v59 = vld [vmem:[%s9741_s3 + $0x40] sm:$0xff] }
  0x6f   :  { %v8105_v61 = vpack.c.bf16 %v1540_v60, %v1539_v59 }
  0x70   :  { %4926 = vmatmul.mubr.msk.f32.gmra.mrb[2].mxu0 %vm89_vm3, %v7559_v19  ;;  %v5022_v19 = vld [vmem:[%s9739_s1 + $0x128] sm:$0xff] }
  0x71   :  { %463 = vmatprep.mubr.f32.mxu0 %v7436_v3  ;;  %6101 = vmatpush1.bf16.msk.msra.mxu0 %vm7530_vm2, %v6099_v0  ;;  %v6116_v22 = vpack.c.bf16 %v5024_v20, %v5022_v19  ;;  %v8118_v0 = vpack.c.bf16 %v1542_v63, %v1541_v62  ;;  %v8323_v19 = vpack.c.bf16 %v5069_v18, %v5068_v17  ;;  %v1423_v20 = vlaneseq }
  0x72   :  { %6103 = vmatprep.subr.bf16.mxu0 %v6102_v1  ;;  %v70_v1 = vld [vmem:[%s9740_s0 + $0xd0] sm:$0xff] }
  0x74   :  { %4927 = vmatmul.mubr.msk.f32.gmra.mrb[4].mxu0 %vm89_vm3, %v7579_v26 }
  0x75   :  { %469 = vmatprep.mubr.f32.mxu0 %v7436_v3 }
  0x78   :  { %4928 = vmatmul.mubr.msk.f32.gmra.mrb[6].mxu0 %vm89_vm3, %v7595_v31 }
  0x79   :  { %475 = vmatprep.mubr.f32.mxu0 %v7436_v3 }
  0x7c   :  { %4929 = vmatmul.mubr.msk.f32.gmra.mrb[8].mxu0 %vm89_vm3, %v7605_v32 }
  0x7d   :  { %481 = vmatprep.mubr.f32.mxu0 %v7436_v3 }
  0x80   :  { %4930 = vmatmul.mubr.msk.f32.gmra.mrb[10].mxu0 %vm89_vm3, %v7613_v33 }
  0x81   :  { %487 = vmatprep.mubr.f32.mxu0 %v7436_v3 }
  0x84   :  { %4931 = vmatmul.mubr.msk.f32.gmra.mrb[12].mxu0 %vm89_vm3, %v7621_v34 }
  0x85   :  { %493 = vmatprep.mubr.f32.mxu0 %v7436_v3 }
  0x88   :  { %4932 = vmatmul.mubr.msk.f32.gmra.mrb[14].mxu0 %vm89_vm3, %v7629_v35 }
  0x89   :  { %499 = vmatprep.mubr.f32.mxu0 %v7436_v3 }
  0x8c   :  { %4933 = vmatmul.mubr.msk.f32.gmra.mrb[16].mxu0 %vm89_vm3, %v7637_v36 }
  0x8d   :  { %505 = vmatprep.mubr.f32.mxu0 %v7436_v3 }
  0x90   :  { %4934 = vmatmul.mubr.msk.f32.gmra.mrb[18].mxu0 %vm89_vm3, %v7645_v37 }
  0x91   :  { %511 = vmatprep.mubr.f32.mxu0 %v7436_v3 }
  0x94   :  { %4935 = vmatmul.mubr.msk.f32.gmra.mrb[20].mxu0 %vm89_vm3, %v7653_v38 }
  0x95   :  { %517 = vmatprep.mubr.f32.mxu0 %v7436_v3 }
  0x98   :  { %4936 = vmatmul.mubr.msk.f32.gmra.mrb[22].mxu0 %vm89_vm3, %v7661_v39 }
  0x99   :  { %523 = vmatprep.mubr.f32.mxu0 %v7436_v3 }
  0x9c   :  { %4937 = vmatmul.mubr.msk.f32.gmra.mrb[24].mxu0 %vm89_vm3, %v7669_v40 }
  0x9d   :  { %529 = vmatprep.mubr.f32.mxu0 %v7436_v3 }
  0xa0   :  { %4938 = vmatmul.mubr.msk.f32.gmra.mrb[26].mxu0 %vm89_vm3, %v7677_v41 }
  0xa1   :  { %535 = vmatprep.mubr.f32.mxu0 %v7436_v3 }
  0xa4   :  { %4939 = vmatmul.mubr.msk.f32.gmra.mrb[28].mxu0 %vm89_vm3, %v7685_v42 }
  0xa5   :  { %541 = vmatprep.mubr.f32.mxu0 %v7436_v3 }
  0xa8   :  { %4940 = vmatmul.mubr.msk.f32.gmra.mrb[30].mxu0 %vm89_vm3, %v7693_v43 }
  0xa9   :  { %547 = vmatprep.mubr.f32.mxu0 %v7436_v3 }
  0xac   :  { %4941 = vmatmul.mubr.msk.f32.gmra.mrb[32].mxu0 %vm89_vm3, %v7701_v44 }
  0xad   :  { %553 = vmatprep.mubr.f32.mxu0 %v7436_v3 }
  0xb0   :  { %4942 = vmatmul.mubr.msk.f32.gmra.mrb[34].mxu0 %vm89_vm3, %v7709_v45 }
  0xb1   :  { %559 = vmatprep.mubr.f32.mxu0 %v7436_v3 }
  0xb4   :  { %4943 = vmatmul.mubr.msk.f32.gmra.mrb[36].mxu0 %vm89_vm3, %v7717_v46 }
  0xb5   :  { %565 = vmatprep.mubr.f32.mxu0 %v7436_v3 }
  0xb8   :  { %4944 = vmatmul.mubr.msk.f32.gmra.mrb[38].mxu0 %vm89_vm3, %v7725_v47 }
  0xb9   :  { %571 = vmatprep.mubr.f32.mxu0 %v7436_v3 }
  0xbc   :  { %4945 = vmatmul.mubr.msk.f32.gmra.mrb[40].mxu0 %vm89_vm3, %v7733_v48 }
  0xbd   :  { %577 = vmatprep.mubr.f32.mxu0 %v7436_v3 }
  0xc0   :  { %4946 = vmatmul.mubr.msk.f32.gmra.mrb[42].mxu0 %vm89_vm3, %v7741_v49 }
  0xc1   :  { %583 = vmatprep.mubr.f32.mxu0 %v7436_v3 }
  0xc4   :  { %4947 = vmatmul.mubr.msk.f32.gmra.mrb[44].mxu0 %vm89_vm3, %v7749_v50 }
  0xc5   :  { %589 = vmatprep.mubr.f32.mxu0 %v7436_v3 }
  0xc8   :  { %4948 = vmatmul.mubr.msk.f32.gmra.mrb[46].mxu0 %vm89_vm3, %v7757_v51 }
  0xc9   :  { %678 = vmatprep.mubr.f32.mxu0 %v7436_v3 }
  0xcc   :  { %4959 = vmatmul.mubr.msk.f32.vlgmr.msra.gmra.mrb[0].mxu0 %vm89_vm3, %v7579_v26  ;;  %v1531_v26 = vld [vmem:[%s9741_s3] sm:$0xff] }
  0xcd   :  { %6105 = vmatpush1.bf16.msra.mxu0 %v6104_v7  ;;  %684 = vmatprep.mubr.f32.mxu0 %v7436_v3  ;;  %v8057_v29 = vpack.c.bf16 %v1532_v27, %v1531_v26  ;;  %v5062_v7 = vld [vmem:[%s9741_s3 + $0xe0] sm:$0xff] }
  0xce   :  { %6108 = vmatprep.subr.msk.bf16.mxu0 %vm7530_vm2, %v6106_v8  ;;  %v5063_v8 = vld [vmem:[%s9741_s3 + $0xe8] sm:$0xff] }
  0xcf   :  { %6124 = vmatpush1.bf16.msra.mxu1 %v8057_v29  ;;  %v8293_v9 = vpack.c.bf16 %v5063_v8, %v5062_v7 }
  0xd0   :  { %4960 = vmatmul.mubr.msk.f32.gmra.mrb[2].mxu0 %vm89_vm3, %v7595_v31  ;;  %6125 = vmatprep.subr.bf16.mxu1 %v7438_v10 }
  0xd1   :  { %690 = vmatprep.mubr.f32.mxu0 %v7436_v3  ;;  %6111 = vmatpush1.bf16.msk.msra.mxu0 %vm7530_vm2, %v6109_v14  ;;  %v5066_v14 = vld [vmem:[%s9741_s3 + $0x100] sm:$0xff] }
  0xd2   :  { %6113 = vmatprep.subr.bf16.mxu0 %v6112_v15  ;;  %v5067_v15 = vld [vmem:[%s9741_s3 + $0x108] sm:$0xff] }
  0xd4   :  { %4961 = vmatmul.mubr.msk.f32.gmra.mrb[4].mxu0 %vm89_vm3, %v7605_v32 }
  0xd5   :  { %696 = vmatprep.mubr.f32.mxu0 %v7436_v3 }
  0xd8   :  { %4962 = vmatmul.mubr.msk.f32.gmra.mrb[6].mxu0 %vm89_vm3, %v7613_v33 }
  0xd9   :  { %702 = vmatprep.mubr.f32.mxu0 %v7436_v3 }
  0xdc   :  { %4963 = vmatmul.mubr.msk.f32.gmra.mrb[8].mxu0 %vm89_vm3, %v7621_v34 }
  0xdd   :  { %708 = vmatprep.mubr.f32.mxu0 %v7436_v3 }
  0xe0   :  { %4964 = vmatmul.mubr.msk.f32.gmra.mrb[10].mxu0 %vm89_vm3, %v7629_v35 }
  0xe1   :  { %714 = vmatprep.mubr.f32.mxu0 %v7436_v3 }
  0xe4   :  { %4965 = vmatmul.mubr.msk.f32.gmra.mrb[12].mxu0 %vm89_vm3, %v7637_v36 }
  0xe5   :  { %720 = vmatprep.mubr.f32.mxu0 %v7436_v3 }
  0xe8   :  { %4966 = vmatmul.mubr.msk.f32.gmra.mrb[14].mxu0 %vm89_vm3, %v7645_v37 }
  0xe9   :  { %726 = vmatprep.mubr.f32.mxu0 %v7436_v3 }
  0xec   :  { %4967 = vmatmul.mubr.msk.f32.gmra.mrb[16].mxu0 %vm89_vm3, %v7653_v38 }
  0xed   :  { %732 = vmatprep.mubr.f32.mxu0 %v7436_v3 }
  0xf0   :  { %4968 = vmatmul.mubr.msk.f32.gmra.mrb[18].mxu0 %vm89_vm3, %v7661_v39 }
  0xf1   :  { %738 = vmatprep.mubr.f32.mxu0 %v7436_v3 }
  0xf4   :  { %4969 = vmatmul.mubr.msk.f32.gmra.mrb[20].mxu0 %vm89_vm3, %v7669_v40 }
  0xf5   :  { %744 = vmatprep.mubr.f32.mxu0 %v7436_v3 }
  0xf8   :  { %4970 = vmatmul.mubr.msk.f32.gmra.mrb[22].mxu0 %vm89_vm3, %v7677_v41 }
  0xf9   :  { %750 = vmatprep.mubr.f32.mxu0 %v7436_v3 }
  0xfc   :  { %4971 = vmatmul.mubr.msk.f32.gmra.mrb[24].mxu0 %vm89_vm3, %v7685_v42 }
  0xfd   :  { %756 = vmatprep.mubr.f32.mxu0 %v7436_v3 }
 0x100   :  { %4972 = vmatmul.mubr.msk.f32.gmra.mrb[26].mxu0 %vm89_vm3, %v7693_v43 }
 0x101   :  { %762 = vmatprep.mubr.f32.mxu0 %v7436_v3 }
 0x104   :  { %4973 = vmatmul.mubr.msk.f32.gmra.mrb[28].mxu0 %vm89_vm3, %v7701_v44 }
 0x105   :  { %768 = vmatprep.mubr.f32.mxu0 %v7436_v3 }
 0x108   :  { %4974 = vmatmul.mubr.msk.f32.gmra.mrb[30].mxu0 %vm89_vm3, %v7709_v45 }
 0x109   :  { %774 = vmatprep.mubr.f32.mxu0 %v7436_v3 }
 0x10c   :  { %4975 = vmatmul.mubr.msk.f32.gmra.mrb[32].mxu0 %vm89_vm3, %v7717_v46 }
 0x10d   :  { %780 = vmatprep.mubr.f32.mxu0 %v7436_v3 }
 0x110   :  { %4976 = vmatmul.mubr.msk.f32.gmra.mrb[34].mxu0 %vm89_vm3, %v7725_v47 }
 0x111   :  { %786 = vmatprep.mubr.f32.mxu0 %v7436_v3 }
 0x114   :  { %4977 = vmatmul.mubr.msk.f32.gmra.mrb[36].mxu0 %vm89_vm3, %v7733_v48 }
 0x115   :  { %792 = vmatprep.mubr.f32.mxu0 %v7436_v3 }
 0x118   :  { %4978 = vmatmul.mubr.msk.f32.gmra.mrb[38].mxu0 %vm89_vm3, %v7741_v49 }
 0x119   :  { %798 = vmatprep.mubr.f32.mxu0 %v7436_v3 }
 0x11c   :  { %4979 = vmatmul.mubr.msk.f32.gmra.mrb[40].mxu0 %vm89_vm3, %v7749_v50 }
 0x11d   :  { %804 = vmatprep.mubr.f32.mxu0 %v7436_v3 }
 0x120   :  { %4980 = vmatmul.mubr.msk.f32.gmra.mrb[42].mxu0 %vm89_vm3, %v7757_v51 }
 0x121   :  { %810 = vmatprep.mubr.f32.mxu0 %v7436_v3 }
 0x124   :  { %4981 = vmatmul.mubr.msk.f32.gmra.mrb[44].mxu0 %vm89_vm3, %v7765_v52 }
 0x125   :  { %816 = vmatprep.mubr.f32.mxu0 %v7436_v3 }
 0x128   :  { %4982 = vmatmul.mubr.msk.f32.gmra.mrb[46].mxu0 %vm89_vm3, %v7972_v16 }
 0x129   :  { %953 = vmatprep.mubr.f32.mxu0 %v7436_v3 }
 0x12c   :  { %4993 = vmatmul.mubr.msk.f32.vlgmr.msra.gmra.mrb[0].mxu0 %vm89_vm3, %v7595_v31  ;;  %v8066_v31 = vpack.c.bf16 %v1534_v30, %v1533_v28 }
 0x12d   :  { %6115 = vmatpush1.bf16.msra.mxu0 %v6114_v21  ;;  %959 = vmatprep.mubr.f32.mxu0 %v7436_v3  ;;  %v1424_v21 = vshrl.u32 %v1423_v20, 7 }
 0x12e   :  { %6118 = vmatprep.subr.msk.bf16.mxu0 %vm7530_vm2, %v6116_v22  ;;  %6127 = vmatpush1.bf16.msra.mxu1 %v8066_v31 }
 0x12f   :  { %6128 = vmatprep.subr.bf16.mxu1 %v7438_v10  ;;  %v1425_v22 = vsub.s32 0, %v1424_v21  ;;  %v1429_v24 = vsub.s32 1, %v1424_v21 }
 0x130   :  { %4994 = vmatmul.mubr.msk.f32.gmra.mrb[2].mxu0 %vm89_vm3, %v7605_v32 }
 0x131   :  { %965 = vmatprep.mubr.f32.mxu0 %v7436_v3  ;;  %6121 = vmatpush1.bf16.msk.msra.mxu0 %vm7530_vm2, %v6119_v25  ;;  %v8330_v25 = vrot.slane %v1421_v23, %v1425_v22  ;;  %v8332_v27 = vrot.slane %v1421_v23, %v1429_v24 }
 0x132   :  { %6473 = vmatprep.subr.bf16.mxu0 %v7438_v10  ;;  %6130 = vmatpush1.bf16.msra.mxu1 %v8079_v55 }
 0x133   :  { %6131 = vmatprep.subr.bf16.mxu1 %v7438_v10 }
 0x134   :  { %4995 = vmatmul.mubr.msk.f32.gmra.mrb[4].mxu0 %vm89_vm3, %v7613_v33 }
 0x135   :  { %971 = vmatprep.mubr.f32.mxu0 %v7436_v3 }
 0x136   :  { %6133 = vmatpush1.bf16.msra.mxu1 %v8092_v58 }
 0x137   :  { %6134 = vmatprep.subr.bf16.mxu1 %v7438_v10 }
 0x138   :  { %4996 = vmatmul.mubr.msk.f32.gmra.mrb[6].mxu0 %vm89_vm3, %v7621_v34 }
 0x139   :  { %977 = vmatprep.mubr.f32.mxu0 %v7436_v3 }
 0x13a   :  { %6136 = vmatpush1.bf16.msra.mxu1 %v8105_v61 }
 0x13b   :  { %6137 = vmatprep.subr.bf16.mxu1 %v7438_v10 }
 0x13c   :  { %4997 = vmatmul.mubr.msk.f32.gmra.mrb[8].mxu0 %vm89_vm3, %v7629_v35 }
 0x13d   :  { %983 = vmatprep.mubr.f32.mxu0 %v7436_v3 }
 0x13e   :  { %6139 = vmatpush1.bf16.msra.mxu1 %v8118_v0 }
 0x13f   :  { %6140 = vmatprep.subr.bf16.mxu1 %v7438_v10 }
 0x140   :  { %4998 = vmatmul.mubr.msk.f32.gmra.mrb[10].mxu0 %vm89_vm3, %v7637_v36 }
 0x141   :  { %989 = vmatprep.mubr.f32.mxu0 %v7436_v3 }
 0x144   :  { %4999 = vmatmul.mubr.msk.f32.gmra.mrb[12].mxu0 %vm89_vm3, %v7645_v37 }
 0x145   :  { %995 = vmatprep.mubr.f32.mxu0 %v7436_v3 }
 0x148   :  { %5000 = vmatmul.mubr.msk.f32.gmra.mrb[14].mxu0 %vm89_vm3, %v7653_v38 }
 0x149   :  { %1001 = vmatprep.mubr.f32.mxu0 %v7436_v3 }
 0x14c   :  { %5001 = vmatmul.mubr.msk.f32.gmra.mrb[16].mxu0 %vm89_vm3, %v7661_v39 }
 0x14d   :  { %1007 = vmatprep.mubr.f32.mxu0 %v7436_v3 }
 0x150   :  { %5002 = vmatmul.mubr.msk.f32.gmra.mrb[18].mxu0 %vm89_vm3, %v7669_v40 }
 0x151   :  { %1013 = vmatprep.mubr.f32.mxu0 %v7436_v3 }
 0x154   :  { %5003 = vmatmul.mubr.msk.f32.gmra.mrb[20].mxu0 %vm89_vm3, %v7677_v41 }
 0x155   :  { %1019 = vmatprep.mubr.f32.mxu0 %v7436_v3 }
 0x158   :  { %5004 = vmatmul.mubr.msk.f32.gmra.mrb[22].mxu0 %vm89_vm3, %v7685_v42 }
 0x159   :  { %1025 = vmatprep.mubr.f32.mxu0 %v7436_v3 }
 0x15c   :  { %5005 = vmatmul.mubr.msk.f32.gmra.mrb[24].mxu0 %vm89_vm3, %v7693_v43 }
 0x15d   :  { %1031 = vmatprep.mubr.f32.mxu0 %v7436_v3 }
 0x160   :  { %5006 = vmatmul.mubr.msk.f32.gmra.mrb[26].mxu0 %vm89_vm3, %v7701_v44 }
 0x161   :  { %1037 = vmatprep.mubr.f32.mxu0 %v7436_v3 }
 0x164   :  { %5007 = vmatmul.mubr.msk.f32.gmra.mrb[28].mxu0 %vm89_vm3, %v7709_v45 }
 0x165   :  { %1043 = vmatprep.mubr.f32.mxu0 %v7436_v3 }
 0x168   :  { %5008 = vmatmul.mubr.msk.f32.gmra.mrb[30].mxu0 %vm89_vm3, %v7717_v46 }
 0x169   :  { %1049 = vmatprep.mubr.f32.mxu0 %v7436_v3 }
 0x16c   :  { %5009 = vmatmul.mubr.msk.f32.gmra.mrb[32].mxu0 %vm89_vm3, %v7725_v47 }
 0x16d   :  { %1055 = vmatprep.mubr.f32.mxu0 %v7436_v3 }
 0x170   :  { %5010 = vmatmul.mubr.msk.f32.gmra.mrb[34].mxu0 %vm89_vm3, %v7733_v48 }
 0x171   :  { %1061 = vmatprep.mubr.f32.mxu0 %v7436_v3 }
 0x174   :  { %5011 = vmatmul.mubr.msk.f32.gmra.mrb[36].mxu0 %vm89_vm3, %v7741_v49 }
 0x175   :  { %1067 = vmatprep.mubr.f32.mxu0 %v7436_v3 }
 0x178   :  { %5012 = vmatmul.mubr.msk.f32.gmra.mrb[38].mxu0 %vm89_vm3, %v7749_v50 }
 0x179   :  { %1073 = vmatprep.mubr.f32.mxu0 %v7436_v3 }
 0x17c   :  { %5013 = vmatmul.mubr.msk.f32.gmra.mrb[40].mxu0 %vm89_vm3, %v7757_v51 }
 0x17d   :  { %1079 = vmatprep.mubr.f32.mxu0 %v7436_v3 }
 0x180   :  { %5014 = vmatmul.mubr.msk.f32.gmra.mrb[42].mxu0 %vm89_vm3, %v7765_v52 }
 0x181   :  { %1085 = vmatprep.mubr.f32.mxu0 %v7436_v3 }
 0x184   :  { %5015 = vmatmul.mubr.msk.f32.gmra.mrb[44].mxu0 %vm89_vm3, %v7972_v16 }
 0x185   :  { %1091 = vmatprep.mubr.f32.mxu0 %v7436_v3 }
 0x188   :  { %5016 = vmatmul.mubr.msk.f32.gmra.mrb[46].mxu0 %vm89_vm3, %v70_v1 }
 0x189   :  { %1228 = vmatprep.mubr.f32.mxu0 %v7436_v3 }
 0x18c   :  { %5027 = vmatmul.mubr.msk.f32.vlgmr.msra.gmra.mrb[0].mxu0 %vm89_vm3, %v7605_v32  ;;  %v1543_v32 = vld [vmem:[%s9741_s3 + $0x60] sm:$0xff] }
 0x18d   :  { %1234 = vmatprep.mubr.f32.mxu0 %v7436_v3 }
 0x190   :  { %5028 = vmatmul.mubr.msk.f32.gmra.mrb[2].mxu0 %vm89_vm3, %v7613_v33  ;;  %v1544_v33 = vld [vmem:[%s9741_s3 + $0x68] sm:$0xff] }
 0x191   :  { %1240 = vmatprep.mubr.f32.mxu0 %v7436_v3 }
 0x194   :  { %5029 = vmatmul.mubr.msk.f32.gmra.mrb[4].mxu0 %vm89_vm3, %v7621_v34  ;;  %v8204_v34 = vpack.c.bf16 %v1544_v33, %v1543_v32 }
 0x195   :  { %1246 = vmatprep.mubr.f32.mxu0 %v7436_v3 }
 0x196   :  { %6142 = vmatpush1.bf16.msra.mxu1 %v8204_v34 }
 0x197   :  { %6143 = vmatprep.subr.bf16.mxu1 %v7438_v10 }
 0x198   :  { %5030 = vmatmul.mubr.msk.f32.gmra.mrb[6].mxu0 %vm89_vm3, %v7629_v35  ;;  %v1545_v35 = vld [vmem:[%s9741_s3 + $0x70] sm:$0xff] }
 0x199   :  { %1252 = vmatprep.mubr.f32.mxu0 %v7436_v3 }
 0x19c   :  { %5031 = vmatmul.mubr.msk.f32.gmra.mrb[8].mxu0 %vm89_vm3, %v7637_v36  ;;  %v1546_v36 = vld [vmem:[%s9741_s3 + $0x78] sm:$0xff] }
 0x19d   :  { %1258 = vmatprep.mubr.f32.mxu0 %v7436_v3 }
 0x1a0   :  { %5032 = vmatmul.mubr.msk.f32.gmra.mrb[10].mxu0 %vm89_vm3, %v7645_v37  ;;  %v8217_v37 = vpack.c.bf16 %v1546_v36, %v1545_v35 }
 0x1a1   :  { %1264 = vmatprep.mubr.f32.mxu0 %v7436_v3 }
 0x1a2   :  { %6145 = vmatpush1.bf16.msra.mxu1 %v8217_v37 }
 0x1a3   :  { %6146 = vmatprep.subr.bf16.mxu1 %v7438_v10 }
 0x1a4   :  { %5033 = vmatmul.mubr.msk.f32.gmra.mrb[12].mxu0 %vm89_vm3, %v7653_v38  ;;  %v71_v38 = vld [vmem:[%s9740_s0 + $0xd8] sm:$0xff] }
 0x1a5   :  { %1270 = vmatprep.mubr.f32.mxu0 %v7436_v3 }
 0x1a8   :  { %5034 = vmatmul.mubr.msk.f32.gmra.mrb[14].mxu0 %vm89_vm3, %v7661_v39  ;;  %v1547_v39 = vld [vmem:[%s9741_s3 + $0x80] sm:$0xff] }
 0x1a9   :  { %1276 = vmatprep.mubr.f32.mxu0 %v7436_v3 }
 0x1ac   :  { %5035 = vmatmul.mubr.msk.f32.gmra.mrb[16].mxu0 %vm89_vm3, %v7669_v40  ;;  %v1548_v40 = vld [vmem:[%s9741_s3 + $0x88] sm:$0xff] }
 0x1ad   :  { %1282 = vmatprep.mubr.f32.mxu0 %v7436_v3 }
 0x1b0   :  { %5036 = vmatmul.mubr.msk.f32.gmra.mrb[18].mxu0 %vm89_vm3, %v7677_v41  ;;  %v8232_v41 = vpack.c.bf16 %v1548_v40, %v1547_v39 }
 0x1b1   :  { %1288 = vmatprep.mubr.f32.mxu0 %v7436_v3 }
 0x1b2   :  { %6148 = vmatpush1.bf16.msra.mxu1 %v8232_v41 }
 0x1b3   :  { %6149 = vmatprep.subr.bf16.mxu1 %v7438_v10 }
 0x1b4   :  { %5037 = vmatmul.mubr.msk.f32.gmra.mrb[20].mxu0 %vm89_vm3, %v7685_v42  ;;  %v5052_v42 = vld [vmem:[%s9741_s3 + $0x90] sm:$0xff] }
 0x1b5   :  { %1294 = vmatprep.mubr.f32.mxu0 %v7436_v3 }
 0x1b8   :  { %5038 = vmatmul.mubr.msk.f32.gmra.mrb[22].mxu0 %vm89_vm3, %v7693_v43  ;;  %v5053_v43 = vld [vmem:[%s9741_s3 + $0x98] sm:$0xff] }
 0x1b9   :  { %1300 = vmatprep.mubr.f32.mxu0 %v7436_v3 }
 0x1bc   :  { %5039 = vmatmul.mubr.msk.f32.gmra.mrb[24].mxu0 %vm89_vm3, %v7701_v44  ;;  %v8243_v44 = vpack.c.bf16 %v5053_v43, %v5052_v42 }
 0x1bd   :  { %1306 = vmatprep.mubr.f32.mxu0 %v7436_v3 }
 0x1be   :  { %6475 = vmatpush1.bf16.msra.mxu0 %v8243_v44 }
 0x1bf   :  { %6476 = vmatprep.subr.bf16.mxu0 %v7438_v10 }
 0x1c0   :  { %5040 = vmatmul.mubr.msk.f32.gmra.mrb[26].mxu0 %vm89_vm3, %v7709_v45  ;;  %v5054_v45 = vld [vmem:[%s9741_s3 + $0xa0] sm:$0xff] }
 0x1c1   :  { %1312 = vmatprep.mubr.f32.mxu0 %v7436_v3 }
 0x1c4   :  { %5041 = vmatmul.mubr.msk.f32.gmra.mrb[28].mxu0 %vm89_vm3, %v7717_v46  ;;  %v5055_v46 = vld [vmem:[%s9741_s3 + $0xa8] sm:$0xff] }
 0x1c5   :  { %1318 = vmatprep.mubr.f32.mxu0 %v7436_v3 }
 0x1c8   :  { %5042 = vmatmul.mubr.msk.f32.gmra.mrb[30].mxu0 %vm89_vm3, %v7725_v47  ;;  %v8253_v47 = vpack.c.bf16 %v5055_v46, %v5054_v45 }
 0x1c9   :  { %1324 = vmatprep.mubr.f32.mxu0 %v7436_v3 }
 0x1ca   :  { %6478 = vmatpush1.bf16.msra.mxu0 %v8253_v47 }
 0x1cb   :  { %6479 = vmatprep.subr.bf16.mxu0 %v7438_v10 }
 0x1cc   :  { %5043 = vmatmul.mubr.msk.f32.gmra.mrb[32].mxu0 %vm89_vm3, %v7733_v48  ;;  %v5056_v48 = vld [vmem:[%s9741_s3 + $0xb0] sm:$0xff] }
 0x1cd   :  { %1330 = vmatprep.mubr.f32.mxu0 %v7436_v3 }
 0x1d0   :  { %5044 = vmatmul.mubr.msk.f32.gmra.mrb[34].mxu0 %vm89_vm3, %v7741_v49  ;;  %v5057_v49 = vld [vmem:[%s9741_s3 + $0xb8] sm:$0xff] }
 0x1d1   :  { %1336 = vmatprep.mubr.f32.mxu0 %v7436_v3 }
 0x1d4   :  { %5045 = vmatmul.mubr.msk.f32.gmra.mrb[36].mxu0 %vm89_vm3, %v7749_v50  ;;  %v8263_v50 = vpack.c.bf16 %v5057_v49, %v5056_v48 }
 0x1d5   :  { %1342 = vmatprep.mubr.f32.mxu0 %v7436_v3 }
 0x1d6   :  { %6481 = vmatpush1.bf16.msra.mxu0 %v8263_v50 }
 0x1d7   :  { %6482 = vmatprep.subr.bf16.mxu0 %v7438_v10 }
 0x1d8   :  { %5046 = vmatmul.mubr.msk.f32.gmra.mrb[38].mxu0 %vm89_vm3, %v7757_v51  ;;  %v5058_v51 = vld [vmem:[%s9741_s3 + $0xc0] sm:$0xff] }
 0x1d9   :  { %1348 = vmatprep.mubr.f32.mxu0 %v7436_v3 }
 0x1dc   :  { %5047 = vmatmul.mubr.msk.f32.gmra.mrb[40].mxu0 %vm89_vm3, %v7765_v52  ;;  %v5059_v52 = vld [vmem:[%s9741_s3 + $0xc8] sm:$0xff] }
 0x1dd   :  { %1354 = vmatprep.mubr.f32.mxu0 %v7436_v3  ;;  %v8273_v2 = vpack.c.bf16 %v5059_v52, %v5058_v51 }
 0x1df   :  { %6484 = vmatpush1.bf16.msra.mxu0 %v8273_v2 }
 0x1e0   :  { %5048 = vmatmul.mubr.msk.f32.gmra.mrb[42].mxu0 %vm89_vm3, %v7972_v16  ;;  %6485 = vmatprep.subr.bf16.mxu0 %v7438_v10  ;;  %v8313_v16 = vpack.c.bf16 %v5067_v15, %v5066_v14 }
 0x1e1   :  { %1360 = vmatprep.mubr.f32.mxu0 %v7436_v3 }
 0x1e3   :  { %6487 = vmatpush1.bf16.msra.mxu0 %v8283_v6 }
 0x1e4   :  { %5049 = vmatmul.mubr.msk.f32.gmra.mrb[44].mxu0 %vm89_vm3, %v70_v1  ;;  %6488 = vmatprep.subr.bf16.mxu0 %v7438_v10 }
 0x1e5   :  { %1366 = vmatprep.mubr.f32.mxu0 %v7436_v3 }
 0x1e7   :  { %6490 = vmatpush1.bf16.msra.mxu0 %v8293_v9 }
 0x1e8   :  { %5050 = vmatmul.mubr.msk.f32.gmra.mrb[46].mxu0 %vm89_vm3, %v71_v38  ;;  %6491 = vmatprep.subr.bf16.mxu0 %v7438_v10 }
 0x1eb   :  { %6493 = vmatpush1.bf16.msra.mxu0 %v8303_v13 }
 0x1ec   :  { %6494 = vmatprep.subr.bf16.mxu0 %v7438_v10 }
 0x1ef   :  { %6496 = vmatpush1.bf16.msra.mxu0 %v8313_v16 }
 0x1f0   :  { %6497 = vmatprep.subr.bf16.mxu0 %v7438_v10 }
 0x1f3   :  { %6499 = vmatpush1.bf16.msra.mxu0 %v8323_v19 }
 0x1f4   :  { %6527 = vmatprep.subr.bf16.mxu0 %v7438_v10 }
 0x25f   :  { %v1230_v26 = vpop.f32.mrb[0].mxu0 }
 0x260   :  { %v1232_v28 = vpop.f32.mrb[1].mxu0  ;;  %v1433_v30 = vadd.f32 %v8330_v25, %v1230_v26 }
 0x261   :  { %v1434_v53 = vadd.f32 %v8332_v27, %v1232_v28 }
 0x262   :  { %v1481_v60 = vmax.f32 %v1433_v30, 0.0 }
 0x263   :  { %v1236_v54 = vpop.f32.mrb[2].mxu0  ;;  %v1482_v63 = vmax.f32 %v1434_v53, 0.0 }
 0x264   :  { %v1435_v56 = vadd.f32 %v8330_v25, %v1236_v54  ;;  %v1238_v57 = vpop.f32.mrb[3].mxu0 }
 0x265   :  { %v1436_v59 = vadd.f32 %v8332_v27, %v1238_v57 }
 0x266   :  { %v1483_v62 = vmax.f32 %v1435_v56, 0.0 }
 0x267   :  { %v1484_v1 = vmax.f32 %v1436_v59, 0.0  ;;  %v1242_v32 = vpop.f32.mrb[4].mxu0 }
 0x268   :  { %v8338_v33 = vmax.f32 %v1481_v60, %v1483_v62  ;;  %v1244_v35 = vpop.f32.mrb[5].mxu0  ;;  %v1437_v38 = vadd.f32 %v8330_v25, %v1242_v32 }
 0x269   :  { %v1530_v36 = vmax.f32 %v1482_v63, %v1484_v1  ;;  %v1438_v39 = vadd.f32 %v8332_v27, %v1244_v35 }
 0x26a   :  { %v1485_v46 = vmax.f32 %v1437_v38, 0.0 }
 0x26b   :  { %v1248_v40 = vpop.f32.mrb[6].mxu0  ;;  %5051 = vmatprep.mubr.msk.f32.mxu1 %vm1549_vm4, %v1530_v36  ;;  %v1486_v49 = vmax.f32 %v1438_v39, 0.0 }
 0x26c   :  { %v1439_v42 = vadd.f32 %v8330_v25, %v1248_v40  ;;  %v1250_v43 = vpop.f32.mrb[7].mxu0  ;;  %1618 = vmatmul.mubr.f32.vlgmr.msra.gmra.mrb[0].mxu1 %v8338_v33 }
 0x26d   :  { %v1440_v45 = vadd.f32 %v8332_v27, %v1250_v43  ;;  %6151 = vmatpush1.bf16.msra.mxu1 %v8243_v44  ;;  %5070 = vmatprep.mubr.msk.f32.mxu1 %vm1549_vm4, %v1530_v36 }
 0x26e   :  { %v1487_v48 = vmax.f32 %v1439_v42, 0.0  ;;  %6152 = vmatprep.subr.bf16.mxu1 %v7438_v10 }
 0x26f   :  { %v1488_v51 = vmax.f32 %v1440_v45, 0.0  ;;  %v1254_v52 = vpop.f32.mrb[8].mxu0 }
 0x270   :  { %v8349_v4 = vmax.f32 %v1485_v46, %v1487_v48  ;;  %v1256_v5 = vpop.f32.mrb[9].mxu0  ;;  %v1441_v8 = vadd.f32 %v8330_v25, %v1254_v52 }
 0x271   :  { %v8351_v7 = vmax.f32 %v1486_v49, %v1488_v51  ;;  %6154 = vmatpush1.bf16.msra.mxu1 %v8253_v47  ;;  %v1442_v11 = vadd.f32 %v8332_v27, %v1256_v5 }
 0x272   :  { %6155 = vmatprep.subr.bf16.mxu1 %v7438_v10  ;;  %v1489_v18 = vmax.f32 %v1441_v8, 0.0 }
 0x273   :  { %v1260_v12 = vpop.f32.mrb[10].mxu0  ;;  %v1490_v21 = vmax.f32 %v1442_v11, 0.0 }
 0x274   :  { %v1443_v14 = vadd.f32 %v8330_v25, %v1260_v12  ;;  %v1262_v15 = vpop.f32.mrb[11].mxu0 }
 0x275   :  { %v1444_v17 = vadd.f32 %v8332_v27, %v1262_v15  ;;  %6157 = vmatpush1.bf16.msra.mxu1 %v8263_v50 }
 0x276   :  { %v1491_v20 = vmax.f32 %v1443_v14, 0.0  ;;  %6158 = vmatprep.subr.bf16.mxu1 %v7438_v10 }
 0x277   :  { %v1492_v22 = vmax.f32 %v1444_v17, 0.0  ;;  %v1266_v23 = vpop.f32.mrb[12].mxu0 }
 0x278   :  { %v8361_v24 = vmax.f32 %v1489_v18, %v1491_v20  ;;  %v1268_v26 = vpop.f32.mrb[13].mxu0  ;;  %v1445_v30 = vadd.f32 %v8330_v25, %v1266_v23 }
 0x279   :  { %v8363_v28 = vmax.f32 %v1490_v21, %v1492_v22  ;;  %6160 = vmatpush1.bf16.msra.mxu1 %v8273_v2  ;;  %v1446_v53 = vadd.f32 %v8332_v27, %v1268_v26 }
 0x27a   :  { %6161 = vmatprep.subr.bf16.mxu1 %v7438_v10  ;;  %v1493_v60 = vmax.f32 %v1445_v30, 0.0 }
 0x27b   :  { %v1272_v54 = vpop.f32.mrb[14].mxu0  ;;  %v1494_v63 = vmax.f32 %v1446_v53, 0.0 }
 0x27c   :  { %v1447_v56 = vadd.f32 %v8330_v25, %v1272_v54  ;;  %v1274_v57 = vpop.f32.mrb[15].mxu0 }
 0x27d   :  { %v1448_v59 = vadd.f32 %v8332_v27, %v1274_v57  ;;  %6163 = vmatpush1.bf16.msra.mxu1 %v8283_v6 }
 0x27e   :  { %v1495_v62 = vmax.f32 %v1447_v56, 0.0  ;;  %6164 = vmatprep.subr.bf16.mxu1 %v7438_v10 }
 0x27f   :  { %v1496_v1 = vmax.f32 %v1448_v59, 0.0  ;;  %v1278_v32 = vpop.f32.mrb[16].mxu0 }
 0x280   :  { %v8373_v35 = vmax.f32 %v1493_v60, %v1495_v62  ;;  %v1280_v36 = vpop.f32.mrb[17].mxu0  ;;  %v1449_v39 = vadd.f32 %v8330_v25, %v1278_v32 }
 0x281   :  { %v8375_v38 = vmax.f32 %v1494_v63, %v1496_v1  ;;  %6166 = vmatpush1.bf16.msra.mxu1 %v8293_v9  ;;  %v1450_v40 = vadd.f32 %v8332_v27, %v1280_v36 }
 0x282   :  { %6167 = vmatprep.subr.bf16.mxu1 %v7438_v10  ;;  %v1497_v48 = vmax.f32 %v1449_v39, 0.0 }
 0x283   :  { %v1284_v42 = vpop.f32.mrb[18].mxu0  ;;  %v1498_v51 = vmax.f32 %v1450_v40, 0.0 }
 0x284   :  { %v1451_v43 = vadd.f32 %v8330_v25, %v1284_v42  ;;  %v1286_v45 = vpop.f32.mrb[19].mxu0 }
 0x285   :  { %v1452_v46 = vadd.f32 %v8332_v27, %v1286_v45  ;;  %6169 = vmatpush1.bf16.msra.mxu1 %v8303_v13 }
 0x286   :  { %v1499_v49 = vmax.f32 %v1451_v43, 0.0  ;;  %6170 = vmatprep.subr.bf16.mxu1 %v7438_v10 }
 0x287   :  { %v1500_v52 = vmax.f32 %v1452_v46, 0.0  ;;  %v1290_v5 = vpop.f32.mrb[20].mxu0 }
 0x288   :  { %v8385_v8 = vmax.f32 %v1497_v48, %v1499_v49  ;;  %v1292_v11 = vpop.f32.mrb[21].mxu0  ;;  %v1453_v14 = vadd.f32 %v8330_v25, %v1290_v5 }
 0x289   :  { %v8387_v12 = vmax.f32 %v1498_v51, %v1500_v52  ;;  %6172 = vmatpush1.bf16.msra.mxu1 %v8313_v16  ;;  %v1454_v15 = vadd.f32 %v8332_v27, %v1292_v11 }
 0x28a   :  { %6173 = vmatprep.subr.bf16.mxu1 %v7438_v10  ;;  %v1501_v22 = vmax.f32 %v1453_v14, 0.0 }
 0x28b   :  { %v1296_v17 = vpop.f32.mrb[22].mxu0  ;;  %v1502_v26 = vmax.f32 %v1454_v15, 0.0 }
 0x28c   :  { %v1455_v18 = vadd.f32 %v8330_v25, %v1296_v17  ;;  %v1298_v20 = vpop.f32.mrb[23].mxu0 }
 0x28d   :  { %v1456_v21 = vadd.f32 %v8332_v27, %v1298_v20  ;;  %6175 = vmatpush1.bf16.msra.mxu1 %v8323_v19 }
 0x28e   :  { %v1503_v23 = vmax.f32 %v1455_v18, 0.0  ;;  %6176 = vmatprep.subr.bf16.mxu1 %v7438_v10 }
 0x28f   :  { %v1504_v30 = vmax.f32 %v1456_v21, 0.0  ;;  %v1302_v53 = vpop.f32.mrb[24].mxu0 }
 0x290   :  { %v8397_v54 = vmax.f32 %v1501_v22, %v1503_v23  ;;  %1707 = vmatmul.mubr.f32.vlgmr.msra.gmra.mrb[2].mxu1 %v8338_v33  ;;  %v1304_v56 = vpop.f32.mrb[25].mxu0  ;;  %v1457_v59 = vadd.f32 %v8330_v25, %v1302_v53 }
 0x291   :  { %v8400_v57 = vmax.f32 %v1502_v26, %v1504_v30  ;;  %6178 = vmatpush1.bf16.msra.mxu1 %v8057_v29  ;;  %5071 = vmatprep.mubr.msk.f32.mxu1 %vm1549_vm4, %v8351_v7  ;;  %v1458_v60 = vadd.f32 %v8332_v27, %v1304_v56 }
 0x292   :  { %6179 = vmatprep.subr.bf16.mxu1 %v7438_v10  ;;  %v1505_v32 = vmax.f32 %v1457_v59, 0.0 }
 0x293   :  { %v1308_v62 = vpop.f32.mrb[26].mxu0  ;;  %v1506_v39 = vmax.f32 %v1458_v60, 0.0 }
 0x294   :  { %v1459_v63 = vadd.f32 %v8330_v25, %v1308_v62  ;;  %v1310_v1 = vpop.f32.mrb[27].mxu0 }
 0x295   :  { %v1460_v33 = vadd.f32 %v8332_v27, %v1310_v1  ;;  %6181 = vmatpush1.bf16.msra.mxu1 %v8066_v31 }
 0x296   :  { %v1507_v36 = vmax.f32 %v1459_v63, 0.0  ;;  %6182 = vmatprep.subr.bf16.mxu1 %v7438_v10 }
 0x297   :  { %v1508_v40 = vmax.f32 %v1460_v33, 0.0  ;;  %v1314_v42 = vpop.f32.mrb[28].mxu0 }
 0x298   :  { %v8412_v43 = vmax.f32 %v1505_v32, %v1507_v36  ;;  %v1316_v45 = vpop.f32.mrb[29].mxu0  ;;  %v1461_v48 = vadd.f32 %v8330_v25, %v1314_v42 }
 0x299   :  { %v8414_v46 = vmax.f32 %v1506_v39, %v1508_v40  ;;  %6184 = vmatpush1.bf16.msra.mxu1 %v8079_v55  ;;  %v1462_v49 = vadd.f32 %v8332_v27, %v1316_v45 }
 0x29a   :  { %6185 = vmatprep.subr.bf16.mxu1 %v7438_v10  ;;  %v1509_v14 = vmax.f32 %v1461_v48, 0.0 }
 0x29b   :  { %v1320_v51 = vpop.f32.mrb[30].mxu0  ;;  %5082 = vmatprep.mubr.msk.f32.mxu0 %vm1549_vm4, %v8414_v46  ;;  %v1510_v17 = vmax.f32 %v1462_v49, 0.0 }
 0x29c   :  { %v1463_v52 = vadd.f32 %v8330_v25, %v1320_v51  ;;  %v1322_v5 = vpop.f32.mrb[31].mxu0  ;;  %2583 = vmatmul.mubr.f32.vlgmr.msra.gmra.mrb[48].mxu0 %v8412_v43 }
 0x29d   :  { %v1464_v11 = vadd.f32 %v8332_v27, %v1322_v5  ;;  %6187 = vmatpush1.bf16.msra.mxu1 %v8092_v58  ;;  %6529 = vmatpush1.bf16.msra.mxu0 %v8243_v44 }
 0x29e   :  { %v1511_v15 = vmax.f32 %v1463_v52, 0.0  ;;  %6188 = vmatprep.subr.bf16.mxu1 %v7438_v10  ;;  %6530 = vmatprep.subr.bf16.mxu0 %v7438_v10 }
 0x29f   :  { %v1512_v18 = vmax.f32 %v1464_v11, 0.0  ;;  %v1326_v20 = vpop.f32.mrb[32].mxu0 }
 0x2a0   :  { %v8429_v21 = vmax.f32 %v1509_v14, %v1511_v15  ;;  %v1328_v22 = vpop.f32.mrb[33].mxu0  ;;  %v1465_v26 = vadd.f32 %v8330_v25, %v1326_v20 }
 0x2a1   :  { %v8431_v23 = vmax.f32 %v1510_v17, %v1512_v18  ;;  %6190 = vmatpush1.bf16.msra.mxu1 %v8105_v61  ;;  %6532 = vmatpush1.bf16.msra.mxu0 %v8253_v47  ;;  %v1466_v30 = vadd.f32 %v8332_v27, %v1328_v22 }
 0x2a2   :  { %6191 = vmatprep.subr.bf16.mxu1 %v7438_v10  ;;  %6533 = vmatprep.subr.bf16.mxu0 %v7438_v10  ;;  %v1513_v62 = vmax.f32 %v1465_v26, 0.0 }
 0x2a3   :  { %v1332_v53 = vpop.f32.mrb[34].mxu0  ;;  %5084 = vmatprep.mubr.msk.f32.mxu0 %vm1549_vm4, %v8431_v23  ;;  %v1514_v1 = vmax.f32 %v1466_v30, 0.0 }
 0x2a4   :  { %v1467_v56 = vadd.f32 %v8330_v25, %v1332_v53  ;;  %v1334_v59 = vpop.f32.mrb[35].mxu0 }
 0x2a5   :  { %v1468_v60 = vadd.f32 %v8332_v27, %v1334_v59  ;;  %6193 = vmatpush1.bf16.msra.mxu1 %v8118_v0  ;;  %6535 = vmatpush1.bf16.msra.mxu0 %v8263_v50 }
 0x2a6   :  { %v1515_v63 = vmax.f32 %v1467_v56, 0.0  ;;  %6194 = vmatprep.subr.bf16.mxu1 %v7438_v10  ;;  %6536 = vmatprep.subr.bf16.mxu0 %v7438_v10 }
 0x2a7   :  { %v1516_v33 = vmax.f32 %v1468_v60, 0.0  ;;  %v1338_v32 = vpop.f32.mrb[36].mxu0 }
 0x2a8   :  { %v8447_v36 = vmax.f32 %v1513_v62, %v1515_v63  ;;  %v1340_v39 = vpop.f32.mrb[37].mxu0  ;;  %v1469_v42 = vadd.f32 %v8330_v25, %v1338_v32 }
 0x2a9   :  { %v8449_v40 = vmax.f32 %v1514_v1, %v1516_v33  ;;  %6196 = vmatpush1.bf16.msra.mxu1 %v8204_v34  ;;  %6538 = vmatpush1.bf16.msra.mxu0 %v8273_v2  ;;  %v1470_v45 = vadd.f32 %v8332_v27, %v1340_v39 }
 0x2aa   :  { %6197 = vmatprep.subr.bf16.mxu1 %v7438_v10  ;;  %6539 = vmatprep.subr.bf16.mxu0 %v7438_v10  ;;  %v1517_v5 = vmax.f32 %v1469_v42, 0.0 }
 0x2ab   :  { %v1344_v48 = vpop.f32.mrb[38].mxu0  ;;  %v1518_v14 = vmax.f32 %v1470_v45, 0.0 }
 0x2ac   :  { %v1471_v49 = vadd.f32 %v8330_v25, %v1344_v48  ;;  %v1346_v51 = vpop.f32.mrb[39].mxu0 }
 0x2ad   :  { %v1472_v52 = vadd.f32 %v8332_v27, %v1346_v51  ;;  %6199 = vmatpush1.bf16.msra.mxu1 %v8217_v37  ;;  %6541 = vmatpush1.bf16.msra.mxu0 %v8283_v6 }
 0x2ae   :  { %v1519_v11 = vmax.f32 %v1471_v49, 0.0  ;;  %6200 = vmatprep.subr.bf16.mxu1 %v7438_v10  ;;  %6542 = vmatprep.subr.bf16.mxu0 %v7438_v10 }
 0x2af   :  { %v1520_v15 = vmax.f32 %v1472_v52, 0.0  ;;  %v1350_v17 = vpop.f32.mrb[40].mxu0 }
 0x2b0   :  { %v8463_v18 = vmax.f32 %v1517_v5, %v1519_v11  ;;  %v1352_v20 = vpop.f32.mrb[41].mxu0  ;;  %v1473_v26 = vadd.f32 %v8330_v25, %v1350_v17 }
 0x2b1   :  { %v8465_v22 = vmax.f32 %v1518_v14, %v1520_v15  ;;  %6202 = vmatpush1.bf16.msra.mxu1 %v8232_v41  ;;  %6544 = vmatpush1.bf16.msra.mxu0 %v8293_v9  ;;  %v1474_v30 = vadd.f32 %v8332_v27, %v1352_v20 }
 0x2b2   :  { %6203 = vmatprep.subr.bf16.mxu1 %v7438_v10  ;;  %6545 = vmatprep.subr.bf16.mxu0 %v7438_v10  ;;  %v1521_v62 = vmax.f32 %v1473_v26, 0.0 }
 0x2b3   :  { %v1356_v53 = vpop.f32.mrb[42].mxu0  ;;  %v1522_v1 = vmax.f32 %v1474_v30, 0.0 }
 0x2b4   :  { %v1475_v56 = vadd.f32 %v8330_v25, %v1356_v53  ;;  %1783 = vmatmul.mubr.f32.vlgmr.msra.gmra.mrb[4].mxu1 %v8349_v4  ;;  %v1358_v59 = vpop.f32.mrb[43].mxu0 }
 0x2b5   :  { %v1476_v60 = vadd.f32 %v8332_v27, %v1358_v59  ;;  %6205 = vmatpush1.bf16.msra.mxu1 %v8243_v44  ;;  %5072 = vmatprep.mubr.msk.f32.mxu1 %vm1549_vm4, %v8351_v7 }
 0x2b6   :  { %v1523_v63 = vmax.f32 %v1475_v56, 0.0  ;;  %6547 = vmatpush1.bf16.msra.mxu0 %v8303_v13  ;;  %6206 = vmatprep.subr.bf16.mxu1 %v7438_v10 }
 0x2b7   :  { %v1524_v33 = vmax.f32 %v1476_v60, 0.0  ;;  %v1362_v32 = vpop.f32.mrb[44].mxu0  ;;  %6548 = vmatprep.subr.bf16.mxu0 %v7438_v10 }
 0x2b8   :  { %v8482_v39 = vmax.f32 %v1521_v62, %v1523_v63  ;;  %v1364_v42 = vpop.f32.mrb[45].mxu0  ;;  %v1477_v7 = vadd.f32 %v8330_v25, %v1362_v32 }
 0x2b9   :  { %v8484_v45 = vmax.f32 %v1522_v1, %v1524_v33  ;;  %6208 = vmatpush1.bf16.msra.mxu1 %v8253_v47  ;;  %v1478_v48 = vadd.f32 %v8332_v27, %v1364_v42 }
 0x2ba   :  { %6550 = vmatpush1.bf16.msra.mxu0 %v8313_v16  ;;  %6209 = vmatprep.subr.bf16.mxu1 %v7438_v10  ;;  %v1525_v11 = vmax.f32 %v1477_v7, 0.0  ;;  %v5098_v7 = vld [vmem:[%s9743_s4 + $0xa8] sm:$0xff] }
 0x2bb   :  { %v1368_v49 = vpop.f32.mrb[46].mxu0  ;;  %6551 = vmatprep.subr.bf16.mxu0 %v7438_v10  ;;  %v1526_v15 = vmax.f32 %v1478_v48, 0.0 }
 0x2bc   :  { %v1479_v51 = vadd.f32 %v8330_v25, %v1368_v49  ;;  %v1370_v52 = vpop.f32.mrb[47].mxu0  ;;  %v5100_v49 = vld [vmem:[%s9743_s4 + $0xb8] sm:$0xff] }
 0x2bd   :  { %v1480_v5 = vadd.f32 %v8332_v27, %v1370_v52  ;;  %6211 = vmatpush1.bf16.msra.mxu1 %v8263_v50  ;;  %v5101_v52 = vld [vmem:[%s9743_s4 + $0xc0] sm:$0xff] }
 0x2be   :  { %v1527_v14 = vmax.f32 %v1479_v51, 0.0  ;;  %6553 = vmatpush1.bf16.msra.mxu0 %v8323_v19  ;;  %6212 = vmatprep.subr.bf16.mxu1 %v7438_v10 }
 0x2bf   :  { %v1528_v17 = vmax.f32 %v1480_v5, 0.0  ;;  %6581 = vmatprep.subr.bf16.mxu0 %v7438_v10  ;;  %v5102_v5 = vld [vmem:[%s9743_s4 + $0xc8] sm:$0xff] }
 0x2c0   :  { %v8498_v20 = vmax.f32 %v1525_v11, %v1527_v14  ;;  %v6786_v11 = vpack.c.bf16 %v5102_v5, %v5101_v52  ;;  %v5103_v14 = vld [vmem:[%s9743_s4 + $0xd0] sm:$0xff]  ;;  %v3980_v5 = vld [vmem:[%s9744_s6 + $0x20] sm:$0xff] }
 0x2c1   :  { %v8500_v26 = vmax.f32 %v1526_v15, %v1528_v17  ;;  %2729 = vmatmul.mubr.f32.vlgmr.msra.gmra.mrb[50].mxu0 %v8429_v21  ;;  %6214 = vmatpush1.bf16.msra.mxu1 %v8273_v2  ;;  %v5104_v15 = vld [vmem:[%s9743_s4 + $0xd8] sm:$0xff] }
 0x2c2   :  { %6583 = vmatpush1.bf16.msra.mxu0 %v8243_v44  ;;  %5086 = vmatprep.mubr.msk.f32.mxu0 %vm1549_vm4, %v8449_v40  ;;  %v6790_v17 = vpack.c.bf16 %v5104_v15, %v5103_v14  ;;  %v3982_v15 = vld [vmem:[%s9744_s6 + $0x30] sm:$0xff] }
 0x2c3   :  { %6215 = vmatprep.subr.bf16.mxu1 %v7438_v10  ;;  %6584 = vmatprep.subr.bf16.mxu0 %v7438_v10 }
 0x2c5   :  { %6217 = vmatpush1.bf16.msra.mxu1 %v8283_v6 }
 0x2c6   :  { %6586 = vmatpush1.bf16.msra.mxu0 %v8253_v47  ;;  %6218 = vmatprep.subr.bf16.mxu1 %v7438_v10 }
 0x2c7   :  { %6587 = vmatprep.subr.bf16.mxu0 %v7438_v10 }
 0x2c9   :  { %6220 = vmatpush1.bf16.msra.mxu1 %v8293_v9 }
 0x2ca   :  { %6589 = vmatpush1.bf16.msra.mxu0 %v8263_v50  ;;  %6221 = vmatprep.subr.bf16.mxu1 %v7438_v10 }
 0x2cb   :  { %6590 = vmatprep.subr.bf16.mxu0 %v7438_v10 }
 0x2cd   :  { %6223 = vmatpush1.bf16.msra.mxu1 %v8303_v13 }
 0x2ce   :  { %6592 = vmatpush1.bf16.msra.mxu0 %v8273_v2  ;;  %6224 = vmatprep.subr.bf16.mxu1 %v7438_v10 }
 0x2cf   :  { %6593 = vmatprep.subr.bf16.mxu0 %v7438_v10 }
 0x2d1   :  { %6226 = vmatpush1.bf16.msra.mxu1 %v8313_v16 }
 0x2d2   :  { %6595 = vmatpush1.bf16.msra.mxu0 %v8283_v6  ;;  %6227 = vmatprep.subr.bf16.mxu1 %v7438_v10 }
 0x2d3   :  { %6596 = vmatprep.subr.bf16.mxu0 %v7438_v10 }
 0x2d5   :  { %6229 = vmatpush1.bf16.msra.mxu1 %v8323_v19 }
 0x2d6   :  { %6598 = vmatpush1.bf16.msra.mxu0 %v8293_v9  ;;  %6230 = vmatprep.subr.bf16.mxu1 %v7438_v10 }
 0x2d7   :  { %6599 = vmatprep.subr.bf16.mxu0 %v7438_v10 }
 0x2d8   :  { %1853 = vmatmul.mubr.f32.vlgmr.msra.gmra.mrb[6].mxu1 %v8349_v4 }
 0x2d9   :  { %6232 = vmatpush1.bf16.msra.mxu1 %v8057_v29  ;;  %5073 = vmatprep.mubr.msk.f32.mxu1 %vm1549_vm4, %v8363_v28 }
 0x2da   :  { %6601 = vmatpush1.bf16.msra.mxu0 %v8303_v13  ;;  %6233 = vmatprep.subr.bf16.mxu1 %v7438_v10 }
 0x2db   :  { %6602 = vmatprep.subr.bf16.mxu0 %v7438_v10 }
 0x2dd   :  { %6235 = vmatpush1.bf16.msra.mxu1 %v8066_v31 }
 0x2de   :  { %6604 = vmatpush1.bf16.msra.mxu0 %v8313_v16  ;;  %6236 = vmatprep.subr.bf16.mxu1 %v7438_v10 }
 0x2df   :  { %6605 = vmatprep.subr.bf16.mxu0 %v7438_v10 }
 0x2e1   :  { %6238 = vmatpush1.bf16.msra.mxu1 %v8079_v55 }
 0x2e2   :  { %6607 = vmatpush1.bf16.msra.mxu0 %v8323_v19  ;;  %6239 = vmatprep.subr.bf16.mxu1 %v7438_v10 }
 0x2e3   :  { %6635 = vmatprep.subr.bf16.mxu0 %v7438_v10 }
 0x2e5   :  { %2875 = vmatmul.mubr.f32.vlgmr.msra.gmra.mrb[52].mxu0 %v8447_v36  ;;  %6241 = vmatpush1.bf16.msra.mxu1 %v8092_v58 }
 0x2e6   :  { %6637 = vmatpush1.bf16.msra.mxu0 %v8243_v44  ;;  %5088 = vmatprep.mubr.msk.f32.mxu0 %vm1549_vm4, %v8465_v22 }
 0x2e7   :  { %6242 = vmatprep.subr.bf16.mxu1 %v7438_v10  ;;  %6638 = vmatprep.subr.bf16.mxu0 %v7438_v10 }
 0x2e9   :  { %6244 = vmatpush1.bf16.msra.mxu1 %v8105_v61 }
 0x2ea   :  { %6640 = vmatpush1.bf16.msra.mxu0 %v8253_v47  ;;  %6245 = vmatprep.subr.bf16.mxu1 %v7438_v10 }
 0x2eb   :  { %6641 = vmatprep.subr.bf16.mxu0 %v7438_v10 }
 0x2ed   :  { %6247 = vmatpush1.bf16.msra.mxu1 %v8118_v0 }
 0x2ee   :  { %6643 = vmatpush1.bf16.msra.mxu0 %v8263_v50  ;;  %6248 = vmatprep.subr.bf16.mxu1 %v7438_v10 }
 0x2ef   :  { %6644 = vmatprep.subr.bf16.mxu0 %v7438_v10 }
 0x2f1   :  { %6250 = vmatpush1.bf16.msra.mxu1 %v8204_v34 }
 0x2f2   :  { %6646 = vmatpush1.bf16.msra.mxu0 %v8273_v2  ;;  %6251 = vmatprep.subr.bf16.mxu1 %v7438_v10 }
 0x2f3   :  { %6647 = vmatprep.subr.bf16.mxu0 %v7438_v10 }
 0x2f5   :  { %6253 = vmatpush1.bf16.msra.mxu1 %v8217_v37 }
 0x2f6   :  { %6649 = vmatpush1.bf16.msra.mxu0 %v8283_v6  ;;  %6254 = vmatprep.subr.bf16.mxu1 %v7438_v10 }
 0x2f7   :  { %6650 = vmatprep.subr.bf16.mxu0 %v7438_v10 }
 0x2f9   :  { %6256 = vmatpush1.bf16.msra.mxu1 %v8232_v41 }
 0x2fa   :  { %6652 = vmatpush1.bf16.msra.mxu0 %v8293_v9  ;;  %6257 = vmatprep.subr.bf16.mxu1 %v7438_v10 }
 0x2fb   :  { %6653 = vmatprep.subr.bf16.mxu0 %v7438_v10 }
 0x2fc   :  { %1929 = vmatmul.mubr.f32.vlgmr.msra.gmra.mrb[8].mxu1 %v8361_v24 }
 0x2fd   :  { %6259 = vmatpush1.bf16.msra.mxu1 %v8243_v44  ;;  %5074 = vmatprep.mubr.msk.f32.mxu1 %vm1549_vm4, %v8363_v28 }
 0x2fe   :  { %6655 = vmatpush1.bf16.msra.mxu0 %v8303_v13  ;;  %6260 = vmatprep.subr.bf16.mxu1 %v7438_v10 }
 0x2ff   :  { %6656 = vmatprep.subr.bf16.mxu0 %v7438_v10 }
 0x301   :  { %6262 = vmatpush1.bf16.msra.mxu1 %v8253_v47 }
 0x302   :  { %6658 = vmatpush1.bf16.msra.mxu0 %v8313_v16  ;;  %6263 = vmatprep.subr.bf16.mxu1 %v7438_v10 }
 0x303   :  { %6659 = vmatprep.subr.bf16.mxu0 %v7438_v10 }
 0x305   :  { %6265 = vmatpush1.bf16.msra.mxu1 %v8263_v50 }
 0x306   :  { %6661 = vmatpush1.bf16.msra.mxu0 %v8323_v19  ;;  %6266 = vmatprep.subr.bf16.mxu1 %v7438_v10 }
 0x307   :  { %6689 = vmatprep.subr.bf16.mxu0 %v7438_v10 }
 0x309   :  { %3021 = vmatmul.mubr.f32.vlgmr.msra.gmra.mrb[54].mxu0 %v8463_v18  ;;  %6268 = vmatpush1.bf16.msra.mxu1 %v8273_v2 }
 0x30a   :  { %6691 = vmatpush1.bf16.msra.mxu0 %v8243_v44  ;;  %5090 = vmatprep.mubr.msk.f32.mxu0 %vm1549_vm4, %v8484_v45 }
 0x30b   :  { %6269 = vmatprep.subr.bf16.mxu1 %v7438_v10  ;;  %6692 = vmatprep.subr.bf16.mxu0 %v7438_v10 }
 0x30d   :  { %6271 = vmatpush1.bf16.msra.mxu1 %v8283_v6 }
 0x30e   :  { %6694 = vmatpush1.bf16.msra.mxu0 %v8253_v47  ;;  %6272 = vmatprep.subr.bf16.mxu1 %v7438_v10 }
 0x30f   :  { %6695 = vmatprep.subr.bf16.mxu0 %v7438_v10 }
 0x311   :  { %6274 = vmatpush1.bf16.msra.mxu1 %v8293_v9 }
 0x312   :  { %6697 = vmatpush1.bf16.msra.mxu0 %v8263_v50  ;;  %6275 = vmatprep.subr.bf16.mxu1 %v7438_v10 }
 0x313   :  { %6698 = vmatprep.subr.bf16.mxu0 %v7438_v10 }
 0x315   :  { %6277 = vmatpush1.bf16.msra.mxu1 %v8303_v13 }
 0x316   :  { %6700 = vmatpush1.bf16.msra.mxu0 %v8273_v2  ;;  %6278 = vmatprep.subr.bf16.mxu1 %v7438_v10 }
 0x317   :  { %6701 = vmatprep.subr.bf16.mxu0 %v7438_v10 }
 0x319   :  { %6280 = vmatpush1.bf16.msra.mxu1 %v8313_v16 }
 0x31a   :  { %6703 = vmatpush1.bf16.msra.mxu0 %v8283_v6  ;;  %6281 = vmatprep.subr.bf16.mxu1 %v7438_v10 }
 0x31b   :  { %6704 = vmatprep.subr.bf16.mxu0 %v7438_v10 }
 0x31d   :  { %6283 = vmatpush1.bf16.msra.mxu1 %v8323_v19 }
 0x31e   :  { %6706 = vmatpush1.bf16.msra.mxu0 %v8293_v9  ;;  %6284 = vmatprep.subr.bf16.mxu1 %v7438_v10 }
 0x31f   :  { %6707 = vmatprep.subr.bf16.mxu0 %v7438_v10 }
 0x320   :  { %1999 = vmatmul.mubr.f32.vlgmr.msra.gmra.mrb[10].mxu1 %v8361_v24 }
 0x321   :  { %6286 = vmatpush1.bf16.msra.mxu1 %v8057_v29  ;;  %5075 = vmatprep.mubr.msk.f32.mxu1 %vm1549_vm4, %v8375_v38 }
 0x322   :  { %6709 = vmatpush1.bf16.msra.mxu0 %v8303_v13  ;;  %6287 = vmatprep.subr.bf16.mxu1 %v7438_v10 }
 0x323   :  { %6710 = vmatprep.subr.bf16.mxu0 %v7438_v10 }
 0x325   :  { %6289 = vmatpush1.bf16.msra.mxu1 %v8066_v31 }
 0x326   :  { %6712 = vmatpush1.bf16.msra.mxu0 %v8313_v16  ;;  %6290 = vmatprep.subr.bf16.mxu1 %v7438_v10 }
 0x327   :  { %6713 = vmatprep.subr.bf16.mxu0 %v7438_v10 }
 0x329   :  { %6292 = vmatpush1.bf16.msra.mxu1 %v8079_v55 }
 0x32a   :  { %6715 = vmatpush1.bf16.msra.mxu0 %v8323_v19  ;;  %6293 = vmatprep.subr.bf16.mxu1 %v7438_v10 }
 0x32b   :  { %6743 = vmatprep.subr.bf16.mxu0 %v7438_v10 }
 0x32d   :  { %3167 = vmatmul.mubr.f32.vlgmr.msra.gmra.mrb[56].mxu0 %v8482_v39  ;;  %6295 = vmatpush1.bf16.msra.mxu1 %v8092_v58 }
 0x32e   :  { %6745 = vmatpush1.bf16.msra.mxu0 %v8243_v44  ;;  %5092 = vmatprep.mubr.msk.f32.mxu0 %vm1549_vm4, %v8500_v26 }
 0x32f   :  { %6296 = vmatprep.subr.bf16.mxu1 %v7438_v10  ;;  %6746 = vmatprep.subr.bf16.mxu0 %v7438_v10 }
 0x331   :  { %6298 = vmatpush1.bf16.msra.mxu1 %v8105_v61 }
 0x332   :  { %6748 = vmatpush1.bf16.msra.mxu0 %v8253_v47  ;;  %6299 = vmatprep.subr.bf16.mxu1 %v7438_v10 }
 0x333   :  { %6749 = vmatprep.subr.bf16.mxu0 %v7438_v10 }
 0x335   :  { %6301 = vmatpush1.bf16.msra.mxu1 %v8118_v0 }
 0x336   :  { %6751 = vmatpush1.bf16.msra.mxu0 %v8263_v50  ;;  %6302 = vmatprep.subr.bf16.mxu1 %v7438_v10 }
 0x337   :  { %6752 = vmatprep.subr.bf16.mxu0 %v7438_v10 }
 0x339   :  { %6304 = vmatpush1.bf16.msra.mxu1 %v8204_v34 }
 0x33a   :  { %6754 = vmatpush1.bf16.msra.mxu0 %v8273_v2  ;;  %6305 = vmatprep.subr.bf16.mxu1 %v7438_v10 }
 0x33b   :  { %6755 = vmatprep.subr.bf16.mxu0 %v7438_v10 }
 0x33d   :  { %6307 = vmatpush1.bf16.msra.mxu1 %v8217_v37 }
 0x33e   :  { %6757 = vmatpush1.bf16.msra.mxu0 %v8283_v6  ;;  %6308 = vmatprep.subr.bf16.mxu1 %v7438_v10 }
 0x33f   :  { %v8650_v25 = vpop.f32.mrb[0].mxu1  ;;  %6758 = vmatprep.subr.bf16.mxu0 %v7438_v10 }
 0x340   :  { %v1621_v27 = vpop.f32.mrb[1].mxu1 }
 0x341   :  { %6310 = vmatpush1.bf16.msra.mxu1 %v8232_v41 }
 0x342   :  { %6760 = vmatpush1.bf16.msra.mxu0 %v8293_v9  ;;  %6311 = vmatprep.subr.bf16.mxu1 %v7438_v10 }
 0x343   :  { %6761 = vmatprep.subr.bf16.mxu0 %v7438_v10 }
 0x344   :  { %2075 = vmatmul.mubr.f32.vlgmr.msra.gmra.mrb[12].mxu1 %v8373_v35 }
 0x345   :  { %6313 = vmatpush1.bf16.msra.mxu1 %v8243_v44  ;;  %5076 = vmatprep.mubr.msk.f32.mxu1 %vm1549_vm4, %v8375_v38 }
 0x346   :  { %6763 = vmatpush1.bf16.msra.mxu0 %v8303_v13  ;;  %6314 = vmatprep.subr.bf16.mxu1 %v7438_v10 }
 0x347   :  { %6764 = vmatprep.subr.bf16.mxu0 %v7438_v10 }
 0x349   :  { %6316 = vmatpush1.bf16.msra.mxu1 %v8253_v47 }
 0x34a   :  { %6766 = vmatpush1.bf16.msra.mxu0 %v8313_v16  ;;  %6317 = vmatprep.subr.bf16.mxu1 %v7438_v10 }
 0x34b   :  { %6767 = vmatprep.subr.bf16.mxu0 %v7438_v10 }
 0x34d   :  { %6319 = vmatpush1.bf16.msra.mxu1 %v8263_v50 }
 0x34e   :  { %6769 = vmatpush1.bf16.msra.mxu0 %v8323_v19  ;;  %6320 = vmatprep.subr.bf16.mxu1 %v7438_v10 }
 0x34f   :  { %6930 = vmatprep.subr.bf16.mxu0 %v7438_v10 }
 0x351   :  { %3313 = vmatmul.mubr.f32.vlgmr.msra.gmra.mrb[58].mxu0 %v8498_v20  ;;  %6322 = vmatpush1.bf16.msra.mxu1 %v8273_v2 }
 0x352   :  { %6323 = vmatprep.subr.bf16.mxu1 %v7438_v10  ;;  %5754 = vmatprep.mubr.msk.f32.mxu0 %vm7439_vm5, %v7436_v3 }
 0x355   :  { %6325 = vmatpush1.bf16.msra.mxu1 %v8283_v6 }
 0x356   :  { %6326 = vmatprep.subr.bf16.mxu1 %v7438_v10 }
 0x359   :  { %6328 = vmatpush1.bf16.msra.mxu1 %v8293_v9 }
 0x35a   :  { %6329 = vmatprep.subr.bf16.mxu1 %v7438_v10 }
 0x35d   :  { %6331 = vmatpush1.bf16.msra.mxu1 %v8303_v13 }
 0x35e   :  { %6332 = vmatprep.subr.bf16.mxu1 %v7438_v10 }
 0x361   :  { %6334 = vmatpush1.bf16.msra.mxu1 %v8313_v16 }
 0x362   :  { %6335 = vmatprep.subr.bf16.mxu1 %v7438_v10 }
 0x363   :  { %v8683_v4 = vpop.f32.mrb[2].mxu1 }
 0x364   :  { %v1712_v24 = vmax.f32 %v8650_v25, %v8683_v4  ;;  %v1710_v28 = vpop.f32.mrb[3].mxu1  ;;  %v5114_v25 = vld [vmem:[%s9743_s4 + $0x128] sm:$0xff] }
 0x365   :  { %6337 = vmatpush1.bf16.msra.mxu1 %v8323_v19  ;;  %v5107_v28 = vld [vmem:[%s9743_s4 + $0xf0] sm:$0xff] }
 0x366   :  { %6338 = vmatprep.subr.bf16.mxu1 %v7438_v10 }
 0x368   :  { %2145 = vmatmul.mubr.f32.vlgmr.msra.gmra.mrb[14].mxu1 %v8373_v35 }
 0x369   :  { %6340 = vmatpush1.bf16.msra.mxu1 %v8057_v29  ;;  %5077 = vmatprep.mubr.msk.f32.mxu1 %vm1549_vm4, %v8387_v12 }
 0x36a   :  { %6341 = vmatprep.subr.bf16.mxu1 %v7438_v10 }
 0x36d   :  { %6343 = vmatpush1.bf16.msra.mxu1 %v8066_v31 }
 0x36e   :  { %6344 = vmatprep.subr.bf16.mxu1 %v7438_v10 }
 0x36f   :  { %v8696_v38 = vpop.f32.mrb[48].mxu0 }
 0x370   :  { %v2586_v30 = vpop.f32.mrb[49].mxu0 }
 0x371   :  { %6346 = vmatpush1.bf16.msra.mxu1 %v8079_v55  ;;  %v5108_v30 = vld [vmem:[%s9743_s4 + $0xf8] sm:$0xff] }
 0x372   :  { %6347 = vmatprep.subr.bf16.mxu1 %v7438_v10 }
 0x375   :  { %6349 = vmatpush1.bf16.msra.mxu1 %v8092_v58 }
 0x376   :  { %6350 = vmatprep.subr.bf16.mxu1 %v7438_v10 }
 0x379   :  { %6352 = vmatpush1.bf16.msra.mxu1 %v8105_v61 }
 0x37a   :  { %6353 = vmatprep.subr.bf16.mxu1 %v7438_v10 }
 0x37d   :  { %6355 = vmatpush1.bf16.msra.mxu1 %v8118_v0 }
 0x37e   :  { %6356 = vmatprep.subr.bf16.mxu1 %v7438_v10 }
 0x381   :  { %6358 = vmatpush1.bf16.msra.mxu1 %v8204_v34 }
 0x382   :  { %6359 = vmatprep.subr.bf16.mxu1 %v7438_v10 }
 0x385   :  { %6361 = vmatpush1.bf16.msra.mxu1 %v8217_v37 }
 0x386   :  { %6362 = vmatprep.subr.bf16.mxu1 %v7438_v10 }
 0x387   :  { %v1784_v35 = vpop.f32.mrb[4].mxu1 }
 0x388   :  { %v1786_v53 = vpop.f32.mrb[5].mxu1 }
 0x389   :  { %6364 = vmatpush1.bf16.msra.mxu1 %v8232_v41  ;;  %v3319_v53 = vld [vmem:[%s9743_s4] sm:$0xff] }
 0x38a   :  { %6365 = vmatprep.subr.bf16.mxu1 %v7438_v10 }
 0x38c   :  { %2221 = vmatmul.mubr.f32.vlgmr.msra.gmra.mrb[16].mxu1 %v8385_v8 }
 0x38d   :  { %6367 = vmatpush1.bf16.msra.mxu1 %v8243_v44  ;;  %5078 = vmatprep.mubr.msk.f32.mxu1 %vm1549_vm4, %v8387_v12 }
 0x38e   :  { %6368 = vmatprep.subr.bf16.mxu1 %v7438_v10 }
 0x391   :  { %6370 = vmatpush1.bf16.msra.mxu1 %v8253_v47 }
 0x392   :  { %6371 = vmatprep.subr.bf16.mxu1 %v7438_v10 }
 0x394   :  { %v8719_v56 = vpop.f32.mrb[50].mxu0 }
 0x395   :  { %v2732_v59 = vpop.f32.mrb[51].mxu0  ;;  %6373 = vmatpush1.bf16.msra.mxu1 %v8263_v50 }
 0x396   :  { %6374 = vmatprep.subr.bf16.mxu1 %v7438_v10  ;;  %v3320_v59 = vld [vmem:[%s9743_s4 + $0x8] sm:$0xff] }
 0x399   :  { %6376 = vmatpush1.bf16.msra.mxu1 %v8273_v2 }
 0x39a   :  { %6377 = vmatprep.subr.bf16.mxu1 %v7438_v10 }
 0x39d   :  { %6379 = vmatpush1.bf16.msra.mxu1 %v8283_v6 }
 0x39e   :  { %6380 = vmatprep.subr.bf16.mxu1 %v7438_v10 }
 0x3a1   :  { %6382 = vmatpush1.bf16.msra.mxu1 %v8293_v9 }
 0x3a2   :  { %6383 = vmatprep.subr.bf16.mxu1 %v7438_v10 }
 0x3a5   :  { %6385 = vmatpush1.bf16.msra.mxu1 %v8303_v13 }
 0x3a6   :  { %6386 = vmatprep.subr.bf16.mxu1 %v7438_v10 }
 0x3a9   :  { %6388 = vmatpush1.bf16.msra.mxu1 %v8313_v16 }
 0x3aa   :  { %6389 = vmatprep.subr.bf16.mxu1 %v7438_v10 }
 0x3ab   :  { %v1854_v12 = vpop.f32.mrb[6].mxu1 }
 0x3ac   :  { %v8733_v60 = vmax.f32 %v1784_v35, %v1854_v12  ;;  %v1856_v62 = vpop.f32.mrb[7].mxu1  ;;  %v6798_v35 = vpack.c.bf16 %v5108_v30, %v5107_v28  ;;  %v6802_v12 = vpack.c.bf16 %v3320_v59, %v3319_v53  ;;  %v3985_v28 = vld [vmem:[%s9744_s6 + $0x48] sm:$0xff]  ;;  %v5111_v53 = vld [vmem:[%s9743_s4 + $0x110] sm:$0xff]  ;;  %v5112_v59 = vld [vmem:[%s9743_s4 + $0x118] sm:$0xff] }
 0x3ad   :  { %6391 = vmatpush1.bf16.msra.mxu1 %v8323_v19  ;;  %v3321_v62 = vld [vmem:[%s9743_s4 + $0x10] sm:$0xff] }
 0x3ae   :  { %6392 = vmatprep.subr.bf16.mxu1 %v7438_v10 }
 0x3b0   :  { %2291 = vmatmul.mubr.f32.vlgmr.msra.gmra.mrb[18].mxu1 %v8385_v8 }
 0x3b1   :  { %6394 = vmatpush1.bf16.msra.mxu1 %v8057_v29  ;;  %5079 = vmatprep.mubr.msk.f32.mxu1 %vm1549_vm4, %v8400_v57 }
 0x3b2   :  { %6395 = vmatprep.subr.bf16.mxu1 %v7438_v10 }
 0x3b5   :  { %6397 = vmatpush1.bf16.msra.mxu1 %v8066_v31 }
 0x3b6   :  { %6398 = vmatprep.subr.bf16.mxu1 %v7438_v10 }
 0x3b8   :  { %v8744_v63 = vpop.f32.mrb[52].mxu0 }
 0x3b9   :  { %v2878_v1 = vpop.f32.mrb[53].mxu0  ;;  %6400 = vmatpush1.bf16.msra.mxu1 %v8079_v55 }
 0x3ba   :  { %6401 = vmatprep.subr.bf16.mxu1 %v7438_v10  ;;  %v3322_v1 = vld [vmem:[%s9743_s4 + $0x18] sm:$0xff] }
 0x3bd   :  { %6403 = vmatpush1.bf16.msra.mxu1 %v8092_v58 }
 0x3be   :  { %6404 = vmatprep.subr.bf16.mxu1 %v7438_v10 }
 0x3c1   :  { %6406 = vmatpush1.bf16.msra.mxu1 %v8105_v61 }
 0x3c2   :  { %6407 = vmatprep.subr.bf16.mxu1 %v7438_v10 }
 0x3c5   :  { %6409 = vmatpush1.bf16.msra.mxu1 %v8118_v0 }
 0x3c6   :  { %6410 = vmatprep.subr.bf16.mxu1 %v7438_v10 }
 0x3c9   :  { %6412 = vmatpush1.bf16.msra.mxu1 %v8204_v34 }
 0x3ca   :  { %6413 = vmatprep.subr.bf16.mxu1 %v7438_v10 }
 0x3cd   :  { %6415 = vmatpush1.bf16.msra.mxu1 %v8217_v37 }
 0x3ce   :  { %6416 = vmatprep.subr.bf16.mxu1 %v7438_v10 }
 0x3cf   :  { %v1930_v8 = vpop.f32.mrb[8].mxu1 }
 0x3d0   :  { %v1932_v33 = vpop.f32.mrb[9].mxu1 }
 0x3d1   :  { %6418 = vmatpush1.bf16.msra.mxu1 %v8232_v41 }
 0x3d2   :  { %6419 = vmatprep.subr.bf16.mxu1 %v7438_v10 }
 0x3d4   :  { %2367 = vmatmul.mubr.f32.vlgmr.msra.gmra.mrb[20].mxu1 %v8397_v54 }
 0x3d5   :  { %6421 = vmatpush1.bf16.msra.mxu1 %v8243_v44  ;;  %5080 = vmatprep.mubr.msk.f32.mxu1 %vm1549_vm4, %v8400_v57 }
 0x3d6   :  { %6422 = vmatprep.subr.bf16.mxu1 %v7438_v10 }
 0x3d9   :  { %6424 = vmatpush1.bf16.msra.mxu1 %v8253_v47 }
 0x3da   :  { %6425 = vmatprep.subr.bf16.mxu1 %v7438_v10 }
 0x3dc   :  { %v8767_v32 = vpop.f32.mrb[54].mxu0 }
 0x3dd   :  { %v3024_v42 = vpop.f32.mrb[55].mxu0  ;;  %6427 = vmatpush1.bf16.msra.mxu1 %v8263_v50 }
 0x3de   :  { %6428 = vmatprep.subr.bf16.mxu1 %v7438_v10  ;;  %v3323_v42 = vld [vmem:[%s9743_s4 + $0x20] sm:$0xff] }
 0x3e1   :  { %6430 = vmatpush1.bf16.msra.mxu1 %v8273_v2 }
 0x3e2   :  { %6431 = vmatprep.subr.bf16.mxu1 %v7438_v10 }
 0x3e5   :  { %6433 = vmatpush1.bf16.msra.mxu1 %v8283_v6 }
 0x3e6   :  { %6434 = vmatprep.subr.bf16.mxu1 %v7438_v10 }
 0x3e9   :  { %6436 = vmatpush1.bf16.msra.mxu1 %v8293_v9 }
 0x3ea   :  { %6437 = vmatprep.subr.bf16.mxu1 %v7438_v10 }
 0x3ed   :  { %6439 = vmatpush1.bf16.msra.mxu1 %v8303_v13 }
 0x3ee   :  { %6440 = vmatprep.subr.bf16.mxu1 %v7438_v10 }
 0x3f1   :  { %6442 = vmatpush1.bf16.msra.mxu1 %v8313_v16 }
 0x3f2   :  { %6443 = vmatprep.subr.bf16.mxu1 %v7438_v10 }
 0x3f3   :  { %v2000_v44 = vpop.f32.mrb[10].mxu1 }
 0x3f4   :  { %v8781_v47 = vmax.f32 %v1930_v8, %v2000_v44  ;;  %v2002_v50 = vpop.f32.mrb[11].mxu1  ;;  %v6806_v8 = vpack.c.bf16 %v3322_v1, %v3321_v62  ;;  %v3324_v44 = vld [vmem:[%s9743_s4 + $0x28] sm:$0xff]  ;;  %v3987_v62 = vld [vmem:[%s9744_s6 + $0x58] sm:$0xff]  ;;  %v6838_v1 = vpack.c.bf16 %v5112_v59, %v5111_v53  ;;  %v5141_v59 = vld [vmem:[%s9743_s4 + $0x200] sm:$0xff] }
 0x3f5   :  { %6445 = vmatpush1.bf16.msra.mxu1 %v8323_v19 }
 0x3f6   :  { %6446 = vmatprep.subr.bf16.mxu1 %v7438_v10 }
 0x3f8   :  { %2437 = vmatmul.mubr.f32.vlgmr.msra.gmra.mrb[22].mxu1 %v8397_v54 }
 0x3f9   :  { %6448 = vmatpush1.bf16.msra.mxu1 %v8057_v29  ;;  %5081 = vmatprep.mubr.msk.f32.mxu1 %vm1549_vm4, %v8414_v46 }
 0x3fa   :  { %6449 = vmatprep.subr.bf16.mxu1 %v7438_v10 }
 0x3fd   :  { %6451 = vmatpush1.bf16.msra.mxu1 %v8066_v31 }
 0x3fe   :  { %6452 = vmatprep.subr.bf16.mxu1 %v7438_v10 }
 0x400   :  { %v8792_v2 = vpop.f32.mrb[56].mxu0 }
 0x401   :  { %v3170_v6 = vpop.f32.mrb[57].mxu0  ;;  %6454 = vmatpush1.bf16.msra.mxu1 %v8079_v55 }
 0x402   :  { %6455 = vmatprep.subr.bf16.mxu1 %v7438_v10 }
 0x405   :  { %6457 = vmatpush1.bf16.msra.mxu1 %v8092_v58 }
 0x406   :  { %6458 = vmatprep.subr.bf16.mxu1 %v7438_v10 }
 0x409   :  { %6460 = vmatpush1.bf16.msra.mxu1 %v8105_v61 }
 0x40a   :  { %6461 = vmatprep.subr.bf16.mxu1 %v7438_v10 }
 0x40d   :  { %6463 = vmatpush1.bf16.msra.mxu1 %v8118_v0 }
 0x40e   :  { %6464 = vmatprep.subr.bf16.mxu1 %v7438_v10 }
 0x411   :  { %6466 = vmatpush1.bf16.msra.mxu1 %v8204_v34 }
 0x412   :  { %6467 = vmatprep.subr.bf16.mxu1 %v7438_v10 }
 0x415   :  { %6469 = vmatpush1.bf16.msra.mxu1 %v8217_v37 }
 0x416   :  { %6470 = vmatprep.subr.bf16.mxu1 %v7438_v10 }
 0x417   :  { %v2076_v9 = vpop.f32.mrb[12].mxu1 }
 0x418   :  { %v2078_v13 = vpop.f32.mrb[13].mxu1 }
 0x419   :  { %6472 = vmatpush1.bf16.msra.mxu1 %v8232_v41  ;;  %v3325_v13 = vld [vmem:[%s9743_s4 + $0x30] sm:$0xff] }
 0x41a   :  { %6500 = vmatprep.subr.bf16.mxu1 %v7438_v10 }
 0x41c   :  { %2513 = vmatmul.mubr.f32.vlgmr.msra.gmra.mrb[24].mxu1 %v8412_v43 }
 0x41d   :  { %6502 = vmatpush1.bf16.msra.mxu1 %v8057_v29  ;;  %5083 = vmatprep.mubr.msk.f32.mxu1 %vm1549_vm4, %v8431_v23 }
 0x41e   :  { %6503 = vmatprep.subr.bf16.mxu1 %v7438_v10 }
 0x421   :  { %6505 = vmatpush1.bf16.msra.mxu1 %v8066_v31 }
 0x422   :  { %6506 = vmatprep.subr.bf16.mxu1 %v7438_v10 }
 0x424   :  { %v8815_v16 = vpop.f32.mrb[58].mxu0 }
 0x425   :  { %v3316_v19 = vpop.f32.mrb[59].mxu0  ;;  %6508 = vmatpush1.bf16.msra.mxu1 %v8079_v55 }
 0x426   :  { %6509 = vmatprep.subr.bf16.mxu1 %v7438_v10  ;;  %v3326_v19 = vld [vmem:[%s9743_s4 + $0x38] sm:$0xff] }
 0x429   :  { %6511 = vmatpush1.bf16.msra.mxu1 %v8092_v58 }
 0x42a   :  { %6512 = vmatprep.subr.bf16.mxu1 %v7438_v10 }
 0x42d   :  { %6514 = vmatpush1.bf16.msra.mxu1 %v8105_v61 }
 0x42e   :  { %6515 = vmatprep.subr.bf16.mxu1 %v7438_v10 }
 0x431   :  { %6517 = vmatpush1.bf16.msra.mxu1 %v8118_v0 }
 0x432   :  { %6518 = vmatprep.subr.bf16.mxu1 %v7438_v10 }
 0x435   :  { %6520 = vmatpush1.bf16.msra.mxu1 %v8204_v34 }
 0x436   :  { %6521 = vmatprep.subr.bf16.mxu1 %v7438_v10 }
 0x439   :  { %6523 = vmatpush1.bf16.msra.mxu1 %v8217_v37 }
 0x43a   :  { %6524 = vmatprep.subr.bf16.mxu1 %v7438_v10 }
 0x43b   :  { %v2146_v54 = vpop.f32.mrb[14].mxu1 }
 0x43c   :  { %v8829_v57 = vmax.f32 %v2076_v9, %v2146_v54  ;;  %v2148_v43 = vpop.f32.mrb[15].mxu1  ;;  %v6810_v9 = vpack.c.bf16 %v3324_v44, %v3323_v42  ;;  %v3327_v54 = vld [vmem:[%s9743_s4 + $0x40] sm:$0xff]  ;;  %v5116_v42 = vld [vmem:[%s9743_s4 + $0x138] sm:$0xff] }
 0x43d   :  { %6526 = vmatpush1.bf16.msra.mxu1 %v8232_v41  ;;  %v3328_v43 = vld [vmem:[%s9743_s4 + $0x48] sm:$0xff]  ;;  %v5117_v44 = vld [vmem:[%s9743_s4 + $0x140] sm:$0xff] }
 0x43e   :  { %6554 = vmatprep.subr.bf16.mxu1 %v7438_v10 }
 0x440   :  { %2659 = vmatmul.mubr.f32.vlgmr.msra.gmra.mrb[26].mxu1 %v8429_v21 }
 0x441   :  { %6556 = vmatpush1.bf16.msra.mxu1 %v8057_v29  ;;  %5085 = vmatprep.mubr.msk.f32.mxu1 %vm1549_vm4, %v8449_v40 }
 0x442   :  { %6557 = vmatprep.subr.bf16.mxu1 %v7438_v10 }
 0x445   :  { %6559 = vmatpush1.bf16.msra.mxu1 %v8066_v31 }
 0x446   :  { %6560 = vmatprep.subr.bf16.mxu1 %v7438_v10 }
 0x449   :  { %6562 = vmatpush1.bf16.msra.mxu1 %v8079_v55 }
 0x44a   :  { %6563 = vmatprep.subr.bf16.mxu1 %v7438_v10 }
 0x44d   :  { %6565 = vmatpush1.bf16.msra.mxu1 %v8092_v58 }
 0x44e   :  { %6566 = vmatprep.subr.bf16.mxu1 %v7438_v10 }
 0x451   :  { %6568 = vmatpush1.bf16.msra.mxu1 %v8105_v61 }
 0x452   :  { %6569 = vmatprep.subr.bf16.mxu1 %v7438_v10 }
 0x455   :  { %6571 = vmatpush1.bf16.msra.mxu1 %v8118_v0 }
 0x456   :  { %6572 = vmatprep.subr.bf16.mxu1 %v7438_v10 }
 0x459   :  { %6574 = vmatpush1.bf16.msra.mxu1 %v8204_v34 }
 0x45a   :  { %6575 = vmatprep.subr.bf16.mxu1 %v7438_v10 }
 0x45d   :  { %6577 = vmatpush1.bf16.msra.mxu1 %v8217_v37 }
 0x45e   :  { %6578 = vmatprep.subr.bf16.mxu1 %v7438_v10 }
 0x45f   :  { %v2222_v46 = vpop.f32.mrb[16].mxu1 }
 0x460   :  { %v2224_v21 = vpop.f32.mrb[17].mxu1 }
 0x461   :  { %6580 = vmatpush1.bf16.msra.mxu1 %v8232_v41  ;;  %v3329_v21 = vld [vmem:[%s9743_s4 + $0x50] sm:$0xff] }
 0x462   :  { %6608 = vmatprep.subr.bf16.mxu1 %v7438_v10 }
 0x464   :  { %2805 = vmatmul.mubr.f32.vlgmr.msra.gmra.mrb[28].mxu1 %v8447_v36 }
 0x465   :  { %6610 = vmatpush1.bf16.msra.mxu1 %v8057_v29  ;;  %5087 = vmatprep.mubr.msk.f32.mxu1 %vm1549_vm4, %v8465_v22 }
 0x466   :  { %6611 = vmatprep.subr.bf16.mxu1 %v7438_v10 }
 0x469   :  { %6613 = vmatpush1.bf16.msra.mxu1 %v8066_v31 }
 0x46a   :  { %6614 = vmatprep.subr.bf16.mxu1 %v7438_v10 }
 0x46d   :  { %6616 = vmatpush1.bf16.msra.mxu1 %v8079_v55 }
 0x46e   :  { %6617 = vmatprep.subr.bf16.mxu1 %v7438_v10 }
 0x471   :  { %6619 = vmatpush1.bf16.msra.mxu1 %v8092_v58 }
 0x472   :  { %6620 = vmatprep.subr.bf16.mxu1 %v7438_v10 }
 0x475   :  { %6622 = vmatpush1.bf16.msra.mxu1 %v8105_v61 }
 0x476   :  { %6623 = vmatprep.subr.bf16.mxu1 %v7438_v10 }
 0x479   :  { %6625 = vmatpush1.bf16.msra.mxu1 %v8118_v0 }
 0x47a   :  { %6626 = vmatprep.subr.bf16.mxu1 %v7438_v10 }
 0x47d   :  { %6628 = vmatpush1.bf16.msra.mxu1 %v8204_v34 }
 0x47e   :  { %6629 = vmatprep.subr.bf16.mxu1 %v7438_v10 }
 0x481   :  { %6631 = vmatpush1.bf16.msra.mxu1 %v8217_v37 }
 0x482   :  { %6632 = vmatprep.subr.bf16.mxu1 %v7438_v10 }
 0x483   :  { %v2292_v23 = vpop.f32.mrb[18].mxu1 }
 0x484   :  { %v8873_v36 = vmax.f32 %v2222_v46, %v2292_v23  ;;  %v2294_v40 = vpop.f32.mrb[19].mxu1  ;;  %v6818_v46 = vpack.c.bf16 %v3328_v43, %v3327_v54  ;;  %v3330_v23 = vld [vmem:[%s9743_s4 + $0x58] sm:$0xff]  ;;  %v5121_v54 = vld [vmem:[%s9743_s4 + $0x160] sm:$0xff]  ;;  %v5122_v43 = vld [vmem:[%s9743_s4 + $0x168] sm:$0xff] }
 0x485   :  { %6634 = vmatpush1.bf16.msra.mxu1 %v8232_v41  ;;  %v6822_v40 = vpack.c.bf16 %v3330_v23, %v3329_v21  ;;  %v5123_v21 = vld [vmem:[%s9743_s4 + $0x170] sm:$0xff] }
 0x486   :  { %6662 = vmatprep.subr.bf16.mxu1 %v7438_v10 }
 0x488   :  { %2951 = vmatmul.mubr.f32.vlgmr.msra.gmra.mrb[30].mxu1 %v8463_v18 }
 0x489   :  { %6664 = vmatpush1.bf16.msra.mxu1 %v8057_v29  ;;  %5089 = vmatprep.mubr.msk.f32.mxu1 %vm1549_vm4, %v8484_v45 }
 0x48a   :  { %6665 = vmatprep.subr.bf16.mxu1 %v7438_v10 }
 0x48d   :  { %6667 = vmatpush1.bf16.msra.mxu1 %v8066_v31 }
 0x48e   :  { %6668 = vmatprep.subr.bf16.mxu1 %v7438_v10 }
 0x491   :  { %6670 = vmatpush1.bf16.msra.mxu1 %v8079_v55 }
 0x492   :  { %6671 = vmatprep.subr.bf16.mxu1 %v7438_v10 }
 0x495   :  { %6673 = vmatpush1.bf16.msra.mxu1 %v8092_v58 }
 0x496   :  { %6674 = vmatprep.subr.bf16.mxu1 %v7438_v10 }
 0x499   :  { %6676 = vmatpush1.bf16.msra.mxu1 %v8105_v61 }
 0x49a   :  { %6677 = vmatprep.subr.bf16.mxu1 %v7438_v10 }
 0x49d   :  { %6679 = vmatpush1.bf16.msra.mxu1 %v8118_v0 }
 0x49e   :  { %6680 = vmatprep.subr.bf16.mxu1 %v7438_v10 }
 0x4a1   :  { %6682 = vmatpush1.bf16.msra.mxu1 %v8204_v34 }
 0x4a2   :  { %6683 = vmatprep.subr.bf16.mxu1 %v7438_v10 }
 0x4a5   :  { %6685 = vmatpush1.bf16.msra.mxu1 %v8217_v37 }
 0x4a6   :  { %6686 = vmatprep.subr.bf16.mxu1 %v7438_v10 }
 0x4a7   :  { %v2368_v18 = vpop.f32.mrb[20].mxu1 }
 0x4a8   :  { %v2370_v22 = vpop.f32.mrb[21].mxu1 }
 0x4a9   :  { %6688 = vmatpush1.bf16.msra.mxu1 %v8232_v41  ;;  %v3332_v22 = vld [vmem:[%s9743_s4 + $0x68] sm:$0xff] }
 0x4aa   :  { %6716 = vmatprep.subr.bf16.mxu1 %v7438_v10 }
 0x4ac   :  { %3097 = vmatmul.mubr.f32.vlgmr.msra.gmra.mrb[32].mxu1 %v8482_v39 }
 0x4ad   :  { %6718 = vmatpush1.bf16.msra.mxu1 %v8057_v29  ;;  %5091 = vmatprep.mubr.msk.f32.mxu1 %vm1549_vm4, %v8500_v26  ;;  %v5093_v29 = vld [vmem:[%s9743_s4 + $0x80] sm:$0xff]  ;;  %v5106_v26 = vld [vmem:[%s9743_s4 + $0xe8] sm:$0xff] }
 0x4ae   :  { %6719 = vmatprep.subr.bf16.mxu1 %v7438_v10 }
 0x4b1   :  { %6721 = vmatpush1.bf16.msra.mxu1 %v8066_v31  ;;  %v5094_v31 = vld [vmem:[%s9743_s4 + $0x88] sm:$0xff] }
 0x4b2   :  { %6722 = vmatprep.subr.bf16.mxu1 %v7438_v10 }
 0x4b5   :  { %6724 = vmatpush1.bf16.msra.mxu1 %v8079_v55  ;;  %v6770_v55 = vpack.c.bf16 %v5094_v31, %v5093_v29  ;;  %v3333_v31 = vld [vmem:[%s9743_s4 + $0x70] sm:$0xff] }
 0x4b6   :  { %6725 = vmatprep.subr.bf16.mxu1 %v7438_v10 }
 0x4b9   :  { %6727 = vmatpush1.bf16.msra.mxu1 %v8092_v58 }
 0x4ba   :  { %6728 = vmatprep.subr.bf16.mxu1 %v7438_v10 }
 0x4bd   :  { %6730 = vmatpush1.bf16.msra.mxu1 %v8105_v61  ;;  %v5095_v61 = vld [vmem:[%s9743_s4 + $0x90] sm:$0xff] }
 0x4be   :  { %6731 = vmatprep.subr.bf16.mxu1 %v7438_v10 }
 0x4c1   :  { %6733 = vmatpush1.bf16.msra.mxu1 %v8118_v0  ;;  %v5096_v0 = vld [vmem:[%s9743_s4 + $0x98] sm:$0xff] }
 0x4c2   :  { %6734 = vmatprep.subr.bf16.mxu1 %v7438_v10  ;;  %v6774_v45 = vpack.c.bf16 %v5096_v0, %v5095_v61  ;;  %v5109_v61 = vld [vmem:[%s9743_s4 + $0x100] sm:$0xff]  ;;  %v5110_v0 = vld [vmem:[%s9743_s4 + $0x108] sm:$0xff] }
 0x4c5   :  { %6736 = vmatpush1.bf16.msra.mxu1 %v8204_v34 }
 0x4c6   :  { %6737 = vmatprep.subr.bf16.mxu1 %v7438_v10 }
 0x4c9   :  { %6739 = vmatpush1.bf16.msra.mxu1 %v8217_v37  ;;  %v5097_v37 = vld [vmem:[%s9743_s4 + $0xa0] sm:$0xff] }
 0x4ca   :  { %6740 = vmatprep.subr.bf16.mxu1 %v7438_v10  ;;  %v6778_v48 = vpack.c.bf16 %v5098_v7, %v5097_v37 }
 0x4cb   :  { %v2438_v58 = vpop.f32.mrb[22].mxu1 }
 0x4cc   :  { %v8929_v34 = vmax.f32 %v2368_v18, %v2438_v58  ;;  %v2440_v39 = vpop.f32.mrb[23].mxu1  ;;  %v3331_v18 = vld [vmem:[%s9743_s4 + $0x60] sm:$0xff] }
 0x4cd   :  { %6742 = vmatpush1.bf16.msra.mxu1 %v8232_v41  ;;  %v5099_v41 = vld [vmem:[%s9743_s4 + $0xb0] sm:$0xff]  ;;  %v6826_v29 = vpack.c.bf16 %v3332_v22, %v3331_v18  ;;  %v6834_v39 = vpack.c.bf16 %v5110_v0, %v5109_v61  ;;  %v5126_v18 = vld [vmem:[%s9743_s4 + $0x188] sm:$0xff] }
 0x4ce   :  { %6771 = vmatprep.subr.bf16.mxu1 %v6770_v55  ;;  %v6782_v51 = vpack.c.bf16 %v5100_v49, %v5099_v41  ;;  %v3977_v41 = vld [vmem:[%s9744_s6 + $0x8] sm:$0xff]  ;;  %v3978_v49 = vld [vmem:[%s9744_s6 + $0x10] sm:$0xff] }
 0x4d0   :  { %3243 = vmatmul.mubr.f32.vlgmr.msra.gmra.mrb[34].mxu1 %v8498_v20  ;;  %v5105_v20 = vld [vmem:[%s9743_s4 + $0xe0] sm:$0xff] }
 0x4d1   :  { %6773 = vmatpush3.bf16.msra.mxu1 %v6770_v55  ;;  %5534 = vmatprep.mubr.f32.mxu1 %v8733_v60  ;;  %v6794_v27 = vpack.c.bf16 %v5106_v26, %v5105_v20  ;;  %v3334_v55 = vld [vmem:[%s9743_s4 + $0x78] sm:$0xff] }
 0x4d2   :  { %6775 = vmatprep.subr.bf16.mxu1 %v6774_v45  ;;  %v6830_v58 = vpack.c.bf16 %v3334_v55, %v3333_v31  ;;  %v5128_v31 = vld [vmem:[%s9743_s4 + $0x198] sm:$0xff] }
 0x4d5   :  { %6777 = vmatpush3.bf16.msra.mxu1 %v6774_v45 }
 0x4d6   :  { %6779 = vmatprep.subr.bf16.mxu1 %v6778_v48 }
 0x4d9   :  { %6781 = vmatpush3.bf16.msra.mxu1 %v6778_v48  ;;  %v3976_v48 = vld [vmem:[%s9744_s6] sm:$0xff] }
 0x4da   :  { %6783 = vmatprep.subr.bf16.mxu1 %v6782_v51 }
 0x4dd   :  { %6785 = vmatpush3.bf16.msra.mxu1 %v6782_v51  ;;  %v9045_v51 = vpack.c.bf16 %v3977_v41, %v3976_v48  ;;  %v5132_v48 = vld [vmem:[%s9743_s4 + $0x1b8] sm:$0xff] }
 0x4de   :  { %6787 = vmatprep.subr.bf16.mxu1 %v6786_v11 }
 0x4df   :  { %6932 = vmatpush3.bf16.msra.mxu0 %v9045_v51 }
 0x4e0   :  { %6933 = vmatprep.subr.bf16.mxu0 %v7438_v10 }
 0x4e1   :  { %6789 = vmatpush3.bf16.msra.mxu1 %v6786_v11  ;;  %v3981_v11 = vld [vmem:[%s9744_s6 + $0x28] sm:$0xff] }
 0x4e2   :  { %6791 = vmatprep.subr.bf16.mxu1 %v6790_v17  ;;  %v9061_v14 = vpack.c.bf16 %v3981_v11, %v3980_v5  ;;  %v5135_v11 = vld [vmem:[%s9743_s4 + $0x1d0] sm:$0xff] }
 0x4e5   :  { %6793 = vmatpush3.bf16.msra.mxu1 %v6790_v17  ;;  %v3983_v17 = vld [vmem:[%s9744_s6 + $0x38] sm:$0xff] }
 0x4e6   :  { %6795 = vmatprep.subr.bf16.mxu1 %v6794_v27  ;;  %v9071_v20 = vpack.c.bf16 %v3983_v17, %v3982_v15  ;;  %v5136_v15 = vld [vmem:[%s9743_s4 + $0x1d8] sm:$0xff] }
 0x4e7   :  { %v6886_v17 = vpack.c.bf16 %v5136_v15, %v5135_v11  ;;  %v3990_v15 = vld [vmem:[%s9744_s6 + $0x70] sm:$0xff] }
 0x4e9   :  { %6797 = vmatpush3.bf16.msra.mxu1 %v6794_v27  ;;  %v3984_v27 = vld [vmem:[%s9744_s6 + $0x40] sm:$0xff] }
 0x4ea   :  { %6799 = vmatprep.subr.bf16.mxu1 %v6798_v35 }
 0x4ed   :  { %6801 = vmatpush3.bf16.msra.mxu1 %v6798_v35 }
 0x4ee   :  { %6803 = vmatprep.subr.bf16.mxu1 %v6802_v12 }
 0x4ef   :  { %v2514_v33 = vpop.f32.mrb[24].mxu1 }
 0x4f0   :  { %v8989_v50 = vmax.f32 %v2514_v33, %v8696_v38  ;;  %v2516_v6 = vpop.f32.mrb[25].mxu1  ;;  %5535 = vmatmul.mubr.f32.vlgmr.msra.gmra.mrb[36].mxu1 %v8781_v47  ;;  %v6814_v38 = vpack.c.bf16 %v3326_v19, %v3325_v13  ;;  %v5115_v33 = vld [vmem:[%s9743_s4 + $0x130] sm:$0xff]  ;;  %v5120_v19 = vld [vmem:[%s9743_s4 + $0x158] sm:$0xff] }
 0x4f1   :  { %5537 = vmatprep.mubr.f32.mxu1 %v8829_v57  ;;  %6805 = vmatpush3.bf16.msra.mxu1 %v6802_v12  ;;  %v9091_v12 = vpack.c.bf16 %v3985_v28, %v3984_v27  ;;  %v5118_v6 = vld [vmem:[%s9743_s4 + $0x148] sm:$0xff]  ;;  %v5119_v13 = vld [vmem:[%s9743_s4 + $0x150] sm:$0xff] }
 0x4f2   :  { %6807 = vmatprep.subr.bf16.mxu1 %v6806_v8  ;;  %v5138_v27 = vld [vmem:[%s9743_s4 + $0x1e8] sm:$0xff] }
 0x4f4   :  { %5538 = vmatmul.mubr.f32.gmra.mrb[38].mxu1 %v8873_v36 }
 0x4f5   :  { %5540 = vmatprep.mubr.f32.mxu1 %v8929_v34  ;;  %6809 = vmatpush3.bf16.msra.mxu1 %v6806_v8  ;;  %v5113_v8 = vld [vmem:[%s9743_s4 + $0x120] sm:$0xff] }
 0x4f6   :  { %6811 = vmatprep.subr.bf16.mxu1 %v6810_v9 }
 0x4f8   :  { %5541 = vmatmul.mubr.f32.gmra.mrb[40].mxu1 %v8989_v50 }
 0x4f9   :  { %6813 = vmatpush3.bf16.msra.mxu1 %v6810_v9  ;;  %v6850_v9 = vpack.c.bf16 %v5118_v6, %v5117_v44 }
 0x4fa   :  { %6815 = vmatprep.subr.bf16.mxu1 %v6814_v38 }
 0x4fd   :  { %6817 = vmatpush3.bf16.msra.mxu1 %v6814_v38  ;;  %v6854_v38 = vpack.c.bf16 %v5120_v19, %v5119_v13  ;;  %v5148_v13 = vld [vmem:[%s9743_s4 + $0x238] sm:$0xff] }
 0x4fe   :  { %6819 = vmatprep.subr.bf16.mxu1 %v6818_v46 }
 0x501   :  { %6821 = vmatpush3.bf16.msra.mxu1 %v6818_v46  ;;  %v6858_v46 = vpack.c.bf16 %v5122_v43, %v5121_v54  ;;  %v5151_v43 = vld [vmem:[%s9743_s4 + $0x250] sm:$0xff] }
 0x502   :  { %6823 = vmatprep.subr.bf16.mxu1 %v6822_v40 }
 0x505   :  { %6825 = vmatpush3.bf16.msra.mxu1 %v6822_v40  ;;  %v5125_v40 = vld [vmem:[%s9743_s4 + $0x180] sm:$0xff] }
 0x506   :  { %6827 = vmatprep.subr.bf16.mxu1 %v6826_v29  ;;  %v6866_v22 = vpack.c.bf16 %v5126_v18, %v5125_v40  ;;  %v5155_v18 = vld [vmem:[%s9743_s4 + $0x270] sm:$0xff] }
 0x509   :  { %6829 = vmatpush3.bf16.msra.mxu1 %v6826_v29  ;;  %v5127_v29 = vld [vmem:[%s9743_s4 + $0x190] sm:$0xff] }
 0x50a   :  { %6831 = vmatprep.subr.bf16.mxu1 %v6830_v58  ;;  %v6870_v0 = vpack.c.bf16 %v5128_v31, %v5127_v29  ;;  %v5158_v29 = vld [vmem:[%s9744_s6 + $0x80] sm:$0xff]  ;;  %v5159_v31 = vld [vmem:[%s9744_s6 + $0x88] sm:$0xff] }
 0x50d   :  { %6833 = vmatpush3.bf16.msra.mxu1 %v6830_v58 }
 0x50e   :  { %6835 = vmatprep.subr.bf16.mxu1 %v6834_v39 }
 0x513   :  { %v2660_v45 = vpop.f32.mrb[26].mxu1 }
 0x514   :  { %v9033_v37 = vmax.f32 %v2660_v45, %v8719_v56  ;;  %v2662_v7 = vpop.f32.mrb[27].mxu1  ;;  %v3979_v56 = vld [vmem:[%s9744_s6 + $0x18] sm:$0xff]  ;;  %v5130_v45 = vld [vmem:[%s9743_s4 + $0x1a8] sm:$0xff] }
 0x515   :  { %v9051_v52 = vpack.c.bf16 %v3979_v56, %v3978_v49  ;;  %v5133_v49 = vld [vmem:[%s9743_s4 + $0x1c0] sm:$0xff]  ;;  %v5134_v56 = vld [vmem:[%s9743_s4 + $0x1c8] sm:$0xff] }
 0x516   :  { %5543 = vmatprep.mubr.f32.mxu1 %v9033_v37  ;;  %v6882_v5 = vpack.c.bf16 %v5134_v56, %v5133_v49  ;;  %v5166_v49 = vld [vmem:[%s9744_s6 + $0xc0] sm:$0xff] }
 0x517   :  { %6935 = vmatpush3.bf16.msra.mxu0 %v9051_v52 }
 0x518   :  { %6936 = vmatprep.subr.bf16.mxu0 %v7438_v10 }
 0x51b   :  { %6938 = vmatpush3.bf16.msra.mxu0 %v9061_v14 }
 0x51c   :  { %6939 = vmatprep.subr.bf16.mxu0 %v7438_v10 }
 0x51f   :  { %6941 = vmatpush3.bf16.msra.mxu0 %v9071_v20 }
 0x520   :  { %6942 = vmatprep.subr.bf16.mxu0 %v7438_v10 }
 0x523   :  { %6944 = vmatpush3.bf16.msra.mxu0 %v9091_v12 }
 0x524   :  { %6945 = vmatprep.subr.bf16.mxu0 %v7438_v10 }
 0x537   :  { %v2806_v26 = vpop.f32.mrb[28].mxu1 }
 0x538   :  { %v9081_v30 = vmax.f32 %v2806_v26, %v8744_v63  ;;  %v2808_v35 = vpop.f32.mrb[29].mxu1  ;;  %v3986_v63 = vld [vmem:[%s9744_s6 + $0x50] sm:$0xff]  ;;  %v5137_v26 = vld [vmem:[%s9743_s4 + $0x1e0] sm:$0xff] }
 0x539   :  { %v9111_v4 = vpack.c.bf16 %v3987_v62, %v3986_v63  ;;  %v6890_v28 = vpack.c.bf16 %v5138_v27, %v5137_v26  ;;  %v5139_v35 = vld [vmem:[%s9743_s4 + $0x1f0] sm:$0xff]  ;;  %v5142_v63 = vld [vmem:[%s9743_s4 + $0x208] sm:$0xff] }
 0x53a   :  { %5544 = vmatmul.mubr.f32.gmra.mrb[42].mxu1 %v9081_v30  ;;  %v6898_v62 = vpack.c.bf16 %v5142_v63, %v5141_v59  ;;  %v5168_v26 = vld [vmem:[%s9744_s6 + $0xd0] sm:$0xff] }
 0x53b   :  { %5578 = vmatprep.mubr.f32.mxu1 %v1712_v24  ;;  %v6842_v24 = vpack.c.bf16 %v5114_v25, %v5113_v8  ;;  %6947 = vmatpush3.bf16.msra.mxu0 %v9111_v4  ;;  %v5144_v8 = vld [vmem:[%s9743_s4 + $0x218] sm:$0xff]  ;;  %v5172_v63 = vld [vmem:[%s9744_s6 + $0xf0] sm:$0xff] }
 0x53c   :  { %6948 = vmatprep.subr.bf16.mxu0 %v7438_v10 }
 0x53e   :  { %5579 = vmatmul.mubr.f32.vlgmr.msra.gmra.mrb[36].mxu1 %v8733_v60  ;;  %v6846_v60 = vpack.c.bf16 %v5116_v42, %v5115_v33  ;;  %v5146_v33 = vld [vmem:[%s9743_s4 + $0x228] sm:$0xff] }
 0x53f   :  { %6837 = vmatpush3.bf16.msra.mxu1 %v6834_v39  ;;  %5581 = vmatprep.mubr.f32.mxu1 %v8781_v47  ;;  %v5129_v39 = vld [vmem:[%s9743_s4 + $0x1a0] sm:$0xff] }
 0x540   :  { %6839 = vmatprep.subr.bf16.mxu1 %v6838_v1  ;;  %v6874_v7 = vpack.c.bf16 %v5130_v45, %v5129_v39  ;;  %v5162_v45 = vld [vmem:[%s9744_s6 + $0xa0] sm:$0xff] }
 0x542   :  { %5582 = vmatmul.mubr.f32.gmra.mrb[38].mxu1 %v8829_v57 }
 0x543   :  { %6841 = vmatpush3.bf16.msra.mxu1 %v6838_v1  ;;  %5584 = vmatprep.mubr.f32.mxu1 %v8873_v36  ;;  %v5143_v1 = vld [vmem:[%s9743_s4 + $0x210] sm:$0xff] }
 0x544   :  { %6843 = vmatprep.subr.bf16.mxu1 %v6842_v24  ;;  %v6902_v25 = vpack.c.bf16 %v5144_v8, %v5143_v1  ;;  %v5157_v8 = vld [vmem:[%s9745_s5] ss:$0 sm:$0xff] }
 0x546   :  { %5585 = vmatmul.mubr.f32.gmra.mrb[40].mxu1 %v8929_v34 }
 0x547   :  { %6845 = vmatpush3.bf16.msra.mxu1 %v6842_v24  ;;  %5587 = vmatprep.mubr.f32.mxu1 %v8989_v50  ;;  %v5145_v24 = vld [vmem:[%s9743_s4 + $0x220] sm:$0xff] }
 0x548   :  { %6847 = vmatprep.subr.bf16.mxu1 %v6846_v60  ;;  %v6906_v6 = vpack.c.bf16 %v5146_v33, %v5145_v24 }
 0x54a   :  { %5588 = vmatmul.mubr.f32.gmra.mrb[42].mxu1 %v9033_v37 }
 0x54b   :  { %6849 = vmatpush3.bf16.msra.mxu1 %v6846_v60  ;;  %5622 = vmatprep.mubr.f32.mxu1 %v8781_v47  ;;  %v5124_v47 = vld [vmem:[%s9743_s4 + $0x178] sm:$0xff] }
 0x54c   :  { %6851 = vmatprep.subr.bf16.mxu1 %v6850_v9  ;;  %v6862_v23 = vpack.c.bf16 %v5124_v47, %v5123_v21  ;;  %v5153_v47 = vld [vmem:[%s9743_s4 + $0x260] sm:$0xff] }
 0x54f   :  { %6853 = vmatpush3.bf16.msra.mxu1 %v6850_v9  ;;  %v5147_v9 = vld [vmem:[%s9743_s4 + $0x230] sm:$0xff] }
 0x550   :  { %6855 = vmatprep.subr.bf16.mxu1 %v6854_v38  ;;  %v6910_v19 = vpack.c.bf16 %v5148_v13, %v5147_v9 }
 0x553   :  { %6857 = vmatpush3.bf16.msra.mxu1 %v6854_v38  ;;  %v5150_v38 = vld [vmem:[%s9743_s4 + $0x248] sm:$0xff] }
 0x554   :  { %6859 = vmatprep.subr.bf16.mxu1 %v6858_v46 }
 0x557   :  { %6861 = vmatpush3.bf16.msra.mxu1 %v6858_v46  ;;  %v5152_v46 = vld [vmem:[%s9743_s4 + $0x258] sm:$0xff] }
 0x558   :  { %6863 = vmatprep.subr.bf16.mxu1 %v6862_v23  ;;  %v6918_v21 = vpack.c.bf16 %v5152_v46, %v5151_v43 }
 0x55b   :  { %6865 = vmatpush3.bf16.msra.mxu1 %v6862_v23  ;;  %v2952_v55 = vpop.f32.mrb[30].mxu1  ;;  %v5154_v23 = vld [vmem:[%s9743_s4 + $0x268] sm:$0xff] }
 0x55c   :  { %v9166_v58 = vmax.f32 %v2952_v55, %v8767_v32  ;;  %v2954_v61 = vpop.f32.mrb[31].mxu1  ;;  %6867 = vmatprep.subr.bf16.mxu1 %v6866_v22  ;;  %v5131_v32 = vld [vmem:[%s9743_s4 + $0x1b0] sm:$0xff]  ;;  %v6922_v40 = vpack.c.bf16 %v5154_v23, %v5153_v47  ;;  %v9274_v55 = vpack.c.bf16 %v5159_v31, %v5158_v29 }
 0x55d   :  { %v6878_v41 = vpack.c.bf16 %v5132_v48, %v5131_v32  ;;  %v5160_v61 = vld [vmem:[%s9744_s6 + $0x90] sm:$0xff] }
 0x55e   :  { %5623 = vmatmul.mubr.f32.vlgmr.msra.gmra.mrb[36].mxu1 %v8829_v57 }
 0x55f   :  { %5625 = vmatprep.mubr.f32.mxu1 %v8873_v36  ;;  %6869 = vmatpush3.bf16.msra.mxu1 %v6866_v22 }
 0x560   :  { %6871 = vmatprep.subr.bf16.mxu1 %v6870_v0 }
 0x562   :  { %5626 = vmatmul.mubr.f32.gmra.mrb[38].mxu1 %v8929_v34 }
 0x563   :  { %5628 = vmatprep.mubr.f32.mxu1 %v8989_v50  ;;  %6873 = vmatpush3.bf16.msra.mxu1 %v6870_v0  ;;  %v5161_v0 = vld [vmem:[%s9744_s6 + $0x98] sm:$0xff] }
 0x564   :  { %6875 = vmatprep.subr.bf16.mxu1 %v6874_v7  ;;  %v9286_v39 = vpack.c.bf16 %v5161_v0, %v5160_v61 }
 0x566   :  { %5629 = vmatmul.mubr.f32.gmra.mrb[40].mxu1 %v9033_v37 }
 0x567   :  { %5631 = vmatprep.mubr.f32.mxu1 %v9081_v30  ;;  %6877 = vmatpush3.bf16.msra.mxu1 %v6874_v7  ;;  %v5163_v7 = vld [vmem:[%s9744_s6 + $0xa8] sm:$0xff] }
 0x568   :  { %6879 = vmatprep.subr.bf16.mxu1 %v6878_v41 }
 0x56a   :  { %5632 = vmatmul.mubr.f32.gmra.mrb[42].mxu1 %v9166_v58 }
 0x56b   :  { %6881 = vmatpush3.bf16.msra.mxu1 %v6878_v41  ;;  %5666 = vmatprep.mubr.f32.mxu1 %v8829_v57  ;;  %v5140_v57 = vld [vmem:[%s9743_s4 + $0x1f8] sm:$0xff]  ;;  %v5164_v41 = vld [vmem:[%s9744_s6 + $0xb0] sm:$0xff] }
 0x56c   :  { %6883 = vmatprep.subr.bf16.mxu1 %v6882_v5  ;;  %v6894_v53 = vpack.c.bf16 %v5140_v57, %v5139_v35  ;;  %v5170_v57 = vld [vmem:[%s9744_s6 + $0xe0] sm:$0xff] }
 0x56f   :  { %6885 = vmatpush3.bf16.msra.mxu1 %v6882_v5  ;;  %v5167_v5 = vld [vmem:[%s9744_s6 + $0xc8] sm:$0xff] }
 0x570   :  { %6887 = vmatprep.subr.bf16.mxu1 %v6886_v17  ;;  %v9329_v11 = vpack.c.bf16 %v5167_v5, %v5166_v49  ;;  %v4589_v49 = vld [vmem:[%s9746_s7 + $0x10] sm:$0xff]  ;;  %v4607_v5 = vld [vmem:[%s9746_s7 + $0xa0] sm:$0xff] }
 0x573   :  { %6889 = vmatpush3.bf16.msra.mxu1 %v6886_v17  ;;  %v3991_v17 = vld [vmem:[%s9744_s6 + $0x78] sm:$0xff] }
 0x574   :  { %6891 = vmatprep.subr.bf16.mxu1 %v6890_v28  ;;  %v9344_v27 = vpack.c.bf16 %v3991_v17, %v3990_v15  ;;  %v4608_v15 = vld [vmem:[%s9746_s7 + $0xa8] sm:$0xff] }
 0x577   :  { %6893 = vmatpush3.bf16.msra.mxu1 %v6890_v28  ;;  %v5169_v28 = vld [vmem:[%s9744_s6 + $0xd8] sm:$0xff] }
 0x578   :  { %6895 = vmatprep.subr.bf16.mxu1 %v6894_v53  ;;  %v9349_v35 = vpack.c.bf16 %v5169_v28, %v5168_v26  ;;  %v7130_v26 = vpack.c.bf16 %v4608_v15, %v4607_v5  ;;  %v4592_v28 = vld [vmem:[%s9746_s7 + $0x28] sm:$0xff] }
 0x57b   :  { %6897 = vmatpush3.bf16.msra.mxu1 %v6894_v53  ;;  %v5171_v53 = vld [vmem:[%s9744_s6 + $0xe8] sm:$0xff] }
 0x57c   :  { %6899 = vmatprep.subr.bf16.mxu1 %v6898_v62  ;;  %v9363_v59 = vpack.c.bf16 %v5171_v53, %v5170_v57  ;;  %v4610_v57 = vld [vmem:[%s9746_s7 + $0xb8] sm:$0xff] }
 0x57e   :  { %5667 = vmatmul.mubr.f32.vlgmr.msra.gmra.mrb[36].mxu1 %v8873_v36 }
 0x57f   :  { %5669 = vmatprep.mubr.f32.mxu1 %v8929_v34  ;;  %6901 = vmatpush3.bf16.msra.mxu1 %v6898_v62  ;;  %v3098_v42 = vpop.f32.mrb[32].mxu1  ;;  %v5173_v62 = vld [vmem:[%s9744_s6 + $0xf8] sm:$0xff] }
 0x580   :  { %v3172_v60 = vmax.f32 %v3098_v42, %v8792_v2  ;;  %v3100_v44 = vpop.f32.mrb[33].mxu1  ;;  %6903 = vmatprep.subr.bf16.mxu1 %v6902_v25  ;;  %v5149_v2 = vld [vmem:[%s9743_s4 + $0x240] sm:$0xff]  ;;  %v9375_v1 = vpack.c.bf16 %v5173_v62, %v5172_v63  ;;  %v4593_v63 = vld [vmem:[%s9746_s7 + $0x30] sm:$0xff]  ;;  %v4594_v62 = vld [vmem:[%s9746_s7 + $0x38] sm:$0xff] }
 0x581   :  { %v6914_v54 = vpack.c.bf16 %v5150_v38, %v5149_v2 }
 0x582   :  { %5670 = vmatmul.mubr.f32.gmra.mrb[38].mxu1 %v8989_v50 }
 0x583   :  { %5672 = vmatprep.mubr.f32.mxu1 %v9033_v37  ;;  %6905 = vmatpush3.bf16.msra.mxu1 %v6902_v25 }
 0x584   :  { %6907 = vmatprep.subr.bf16.mxu1 %v6906_v6 }
 0x586   :  { %5673 = vmatmul.mubr.f32.gmra.mrb[40].mxu1 %v9081_v30 }
 0x587   :  { %5675 = vmatprep.mubr.f32.mxu1 %v9166_v58  ;;  %6909 = vmatpush3.bf16.msra.mxu1 %v6906_v6 }
 0x588   :  { %6911 = vmatprep.subr.bf16.mxu1 %v6910_v19 }
 0x58a   :  { %5676 = vmatmul.mubr.f32.gmra.mrb[42].mxu1 %v3172_v60 }
 0x58b   :  { %6913 = vmatpush3.bf16.msra.mxu1 %v6910_v19  ;;  %5710 = vmatprep.mubr.f32.mxu1 %v8873_v36  ;;  %v5156_v36 = vld [vmem:[%s9743_s4 + $0x278] sm:$0xff] }
 0x58c   :  { %6915 = vmatprep.subr.bf16.mxu1 %v6914_v54  ;;  %v6926_v22 = vpack.c.bf16 %v5156_v36, %v5155_v18 }
 0x58f   :  { %6917 = vmatpush3.bf16.msra.mxu1 %v6914_v54 }
 0x590   :  { %6919 = vmatprep.subr.bf16.mxu1 %v6918_v21 }
 0x593   :  { %6921 = vmatpush3.bf16.msra.mxu1 %v6918_v21 }
 0x594   :  { %6923 = vmatprep.subr.bf16.mxu1 %v6922_v40 }
 0x597   :  { %6925 = vmatpush3.bf16.msra.mxu1 %v6922_v40 }
 0x598   :  { %6927 = vmatprep.subr.bf16.mxu1 %v6926_v22 }
 0x59b   :  { %6929 = vmatpush3.bf16.msra.mxu1 %v6926_v22 }
 0x59c   :  { %7050 = vmatprep.subr.bf16.mxu1 %v7438_v10 }
 0x59e   :  { %5711 = vmatmul.mubr.f32.vlgmr.msra.gmra.mrb[36].mxu1 %v8929_v34 }
 0x59f   :  { %5713 = vmatprep.mubr.f32.mxu1 %v8989_v50  ;;  %7052 = vmatpush3.bf16.msra.mxu1 %v9274_v55  ;;  %v9298_v50 = vpack.c.bf16 %v5163_v7, %v5162_v45 }
 0x5a0   :  { %7053 = vmatprep.subr.bf16.mxu1 %v7438_v10 }
 0x5a2   :  { %5714 = vmatmul.mubr.f32.gmra.mrb[38].mxu1 %v9033_v37  ;;  %v5165_v37 = vld [vmem:[%s9744_s6 + $0xb8] sm:$0xff] }
 0x5a3   :  { %5716 = vmatprep.mubr.f32.mxu1 %v9081_v30  ;;  %v3244_v34 = vpop.f32.mrb[34].mxu1  ;;  %7055 = vmatpush3.bf16.msra.mxu1 %v9286_v39  ;;  %v9310_v30 = vpack.c.bf16 %v5165_v37, %v5164_v41  ;;  %v4605_v41 = vld [vmem:[%s9746_s7 + $0x90] sm:$0xff]  ;;  %v4606_v37 = vld [vmem:[%s9746_s7 + $0x98] sm:$0xff] }
 0x5a4   :  { %v3318_v32 = vmax.f32 %v3244_v34, %v8815_v16  ;;  %v3246_v48 = vpop.f32.mrb[35].mxu1  ;;  %7056 = vmatprep.subr.bf16.mxu1 %v7438_v10  ;;  %v3988_v16 = vld [vmem:[%s9744_s6 + $0x60] sm:$0xff]  ;;  %v4604_v34 = vld [vmem:[%s9746_s7 + $0x88] sm:$0xff] }
 0x5a5   :  { %v4588_v48 = vld [vmem:[%s9746_s7 + $0x8] sm:$0xff] }
 0x5a6   :  { %5717 = vmatmul.mubr.f32.gmra.mrb[40].mxu1 %v9166_v58  ;;  %v3989_v58 = vld [vmem:[%s9744_s6 + $0x68] sm:$0xff] }
 0x5a7   :  { %5719 = vmatprep.mubr.f32.mxu1 %v3172_v60  ;;  %7058 = vmatpush3.bf16.msra.mxu1 %v9298_v50  ;;  %v9324_v56 = vpack.c.bf16 %v3989_v58, %v3988_v16  ;;  %v7126_v58 = vpack.c.bf16 %v4606_v37, %v4605_v41 }
 0x5a8   :  { %7059 = vmatprep.subr.bf16.mxu1 %v7438_v10 }
 0x5a9   :  { %6950 = vmatpush3.bf16.msra.mxu0 %v9324_v56 }
 0x5aa   :  { %5720 = vmatmul.mubr.f32.gmra.mrb[42].mxu1 %v3318_v32  ;;  %6951 = vmatprep.subr.bf16.mxu0 %v7438_v10 }
 0x5ab   :  { %7061 = vmatpush3.bf16.msra.mxu1 %v9310_v30  ;;  %5929 = vmatprep.mubr.msk.f32.mxu1 %vm7439_vm5, %v7436_v3 }
 0x5ac   :  { %7062 = vmatprep.subr.bf16.mxu1 %v7438_v10 }
 0x5ad   :  { %6953 = vmatpush3.bf16.msra.mxu0 %v9344_v27 }
 0x5ae   :  { %6954 = vmatprep.subr.bf16.mxu0 %v7438_v10 }
 0x5af   :  { %7064 = vmatpush3.bf16.msra.mxu1 %v9329_v11 }
 0x5b0   :  { %7065 = vmatprep.subr.bf16.mxu1 %v7438_v10 }
 0x5b3   :  { %7067 = vmatpush3.bf16.msra.mxu1 %v9349_v35 }
 0x5b4   :  { %7068 = vmatprep.subr.bf16.mxu1 %v7438_v10 }
 0x5b7   :  { %7070 = vmatpush3.bf16.msra.mxu1 %v9363_v59 }
 0x5b8   :  { %7071 = vmatprep.subr.bf16.mxu1 %v7438_v10 }
 0x5bb   :  { %7073 = vmatpush3.bf16.msra.mxu1 %v9375_v1 }
 0x5bc   :  { %7098 = vmatprep.subr.bf16.mxu1 %v7438_v10 }
 0x671   :  { %v5712_v25 = vpop.f32.mrb[36].mxu1 }
 0x672   :  { %v3960_v24 = vadd.f32 %v5712_v25, %v5157_v8  ;;  %v3905_v33 = vpop.f32.mrb[37].mxu1  ;;  %v7136_v25 = vpack.c.bf16 %v4594_v62, %v4593_v63 }
 0x673   :  { %v3959_v42 = vadd.f32 %v5157_v8, %v3905_v33  ;;  %v4595_v33 = vld [vmem:[%s9746_s7 + $0x40] sm:$0xff] }
 0x674   :  { %v3968_v60 = vmax.f32 %v3960_v24, 0.0 }
 0x675   :  { %v3967_v44 = vmax.f32 %v3959_v42, 0.0  ;;  %v5715_v6 = vpop.f32.mrb[38].mxu1  ;;  %v4596_v42 = vld [vmem:[%s9746_s7 + $0x48] sm:$0xff] }
 0x676   :  { %v3962_v9 = vadd.f32 %v5715_v6, %v5157_v8  ;;  %v3915_v13 = vpop.f32.mrb[39].mxu1  ;;  %v7140_v6 = vpack.c.bf16 %v4596_v42, %v4595_v33  ;;  %v4792_v33 = vld [vmem:[%s9748_s11 + $0x8] sm:$0xff]  ;;  %v4793_v42 = vld [vmem:[%s9748_s11 + $0x10] sm:$0xff] }
 0x677   :  { %v3975_v19 = vmax.f32 %v3967_v44, %v3968_v60  ;;  %v3961_v2 = vadd.f32 %v5157_v8, %v3915_v13  ;;  %v4613_v60 = vld [vmem:[%s9746_s7 + $0xd0] sm:$0xff]  ;;  %v4614_v44 = vld [vmem:[%s9746_s7 + $0xd8] sm:$0xff] }
 0x678   :  { %v3970_v38 = vmax.f32 %v3962_v9, 0.0  ;;  %v7142_v9 = vpack.c.bf16 %v4614_v44, %v4613_v60  ;;  %v4597_v13 = vld [vmem:[%s9746_s7 + $0x50] sm:$0xff]  ;;  %v4794_v44 = vld [vmem:[%s9748_s11 + $0x18] sm:$0xff] }
 0x679   :  { %v3969_v54 = vmax.f32 %v3961_v2, 0.0  ;;  %v5718_v43 = vpop.f32.mrb[40].mxu1  ;;  %5755 = vmatmul.mubr.f32.vlgmr.msra.gmra.mrb[60].mxu0 %v3975_v19  ;;  %v4615_v2 = vld [vmem:[%s9746_s7 + $0xe0] sm:$0xff] }
 0x67a   :  { %v3964_v46 = vadd.f32 %v5718_v43, %v5157_v8  ;;  %6956 = vmatpush3.bf16.msra.mxu0 %v9274_v55  ;;  %v3925_v21 = vpop.f32.mrb[41].mxu1  ;;  %5789 = vmatprep.mubr.msk.f32.mxu0 %vm7439_vm5, %v7436_v3 }
 0x67b   :  { %v9385_v47 = vmax.f32 %v3969_v54, %v3970_v38  ;;  %v3963_v23 = vadd.f32 %v5157_v8, %v3925_v21  ;;  %6957 = vmatprep.subr.bf16.mxu0 %v7438_v10  ;;  %v4616_v38 = vld [vmem:[%s9746_s7 + $0xe8] sm:$0xff] }
 0x67c   :  { %v3972_v40 = vmax.f32 %v3964_v46, 0.0  ;;  %v7146_v43 = vpack.c.bf16 %v4616_v38, %v4615_v2  ;;  %v4599_v46 = vld [vmem:[%s9746_s7 + $0x60] sm:$0xff]  ;;  %v4600_v21 = vld [vmem:[%s9746_s7 + $0x68] sm:$0xff]  ;;  %v4797_v2 = vld [vmem:[%s9748_s11 + $0x30] sm:$0xff] }
 0x67d   :  { %v3971_v18 = vmax.f32 %v3963_v23, 0.0  ;;  %v5721_v36 = vpop.f32.mrb[42].mxu1  ;;  %v4798_v38 = vld [vmem:[%s9748_s11 + $0x38] sm:$0xff] }
 0x67e   :  { %v3966_v22 = vadd.f32 %v5721_v36, %v5157_v8  ;;  %6959 = vmatpush3.bf16.msra.mxu0 %v9286_v39  ;;  %v3935_v29 = vpop.f32.mrb[43].mxu1 }
 0x67f   :  { %v9389_v31 = vmax.f32 %v3971_v18, %v3972_v40  ;;  %v3965_v61 = vadd.f32 %v5157_v8, %v3935_v29  ;;  %6960 = vmatprep.subr.bf16.mxu0 %v7438_v10  ;;  %v4612_v8 = vld [vmem:[%s9746_s7 + $0xc8] sm:$0xff] }
 0x680   :  { %v3974_v0 = vmax.f32 %v3966_v22, 0.0 }
 0x681   :  { %v3973_v45 = vmax.f32 %v3965_v61, 0.0  ;;  %5930 = vmatmul.mubr.f32.vlgmr.msra.gmra.mrb[44].mxu1 %v9389_v31 }
 0x682   :  { %6962 = vmatpush3.bf16.msra.mxu0 %v9298_v50  ;;  %7100 = vmatpush3.bf16.msra.mxu1 %v9274_v55 }
 0x683   :  { %v9395_v7 = vmax.f32 %v3973_v45, %v3974_v0  ;;  %6963 = vmatprep.subr.bf16.mxu0 %v7438_v10  ;;  %7101 = vmatprep.subr.bf16.mxu1 %v7438_v10  ;;  %v4617_v0 = vld [vmem:[%s9746_s7 + $0xf0] sm:$0xff]  ;;  %v4618_v45 = vld [vmem:[%s9746_s7 + $0xf8] sm:$0xff] }
 0x684   :  { %5999 = vmatprep.mubr.msk.f32.mxu1 %vm7439_vm5, %v7436_v3 }
 0x686   :  { %6965 = vmatpush3.bf16.msra.mxu0 %v9310_v30  ;;  %7103 = vmatpush3.bf16.msra.mxu1 %v9286_v39 }
 0x687   :  { %6966 = vmatprep.subr.bf16.mxu0 %v7438_v10  ;;  %7104 = vmatprep.subr.bf16.mxu1 %v7438_v10 }
 0x68a   :  { %6968 = vmatpush3.bf16.msra.mxu0 %v9329_v11  ;;  %7106 = vmatpush3.bf16.msra.mxu1 %v9298_v50 }
 0x68b   :  { %6969 = vmatprep.subr.bf16.mxu0 %v7438_v10  ;;  %7107 = vmatprep.subr.bf16.mxu1 %v7438_v10 }
 0x68e   :  { %6971 = vmatpush3.bf16.msra.mxu0 %v9349_v35  ;;  %7109 = vmatpush3.bf16.msra.mxu1 %v9310_v30 }
 0x68f   :  { %6972 = vmatprep.subr.bf16.mxu0 %v7438_v10  ;;  %7110 = vmatprep.subr.bf16.mxu1 %v7438_v10 }
 0x692   :  { %6974 = vmatpush3.bf16.msra.mxu0 %v9363_v59  ;;  %7112 = vmatpush3.bf16.msra.mxu1 %v9329_v11 }
 0x693   :  { %6975 = vmatprep.subr.bf16.mxu0 %v7438_v10  ;;  %7113 = vmatprep.subr.bf16.mxu1 %v7438_v10 }
 0x696   :  { %6977 = vmatpush3.bf16.msra.mxu0 %v9375_v1  ;;  %7115 = vmatpush3.bf16.msra.mxu1 %v9349_v35 }
 0x697   :  { %6978 = vmatprep.subr.bf16.mxu0 %v7438_v10  ;;  %7116 = vmatprep.subr.bf16.mxu1 %v7438_v10 }
 0x699   :  { %5790 = vmatmul.mubr.f32.vlgmr.msra.gmra.mrb[62].mxu0 %v3975_v19  ;;  %v4598_v19 = vld [vmem:[%s9746_s7 + $0x58] sm:$0xff] }
 0x69a   :  { %6980 = vmatpush3.bf16.msra.mxu0 %v9045_v51  ;;  %7118 = vmatpush3.bf16.msra.mxu1 %v9363_v59  ;;  %v7144_v54 = vpack.c.bf16 %v4598_v19, %v4597_v13  ;;  %v4796_v13 = vld [vmem:[%s9748_s11 + $0x28] sm:$0xff] }
 0x69b   :  { %6981 = vmatprep.subr.bf16.mxu0 %v7438_v10  ;;  %7119 = vmatprep.subr.bf16.mxu1 %v7438_v10 }
 0x69c   :  { %5824 = vmatprep.mubr.msk.f32.mxu0 %vm7439_vm5, %v7436_v3 }
 0x69e   :  { %6983 = vmatpush3.bf16.msra.mxu0 %v9051_v52  ;;  %7121 = vmatpush3.bf16.msra.mxu1 %v9375_v1 }
 0x69f   :  { %6984 = vmatprep.subr.bf16.mxu0 %v7438_v10  ;;  %7154 = vmatprep.subr.bf16.mxu1 %v7438_v10 }
 0x6a1   :  { %6000 = vmatmul.mubr.f32.vlgmr.msra.gmra.mrb[46].mxu1 %v9395_v7 }
 0x6a2   :  { %6986 = vmatpush3.bf16.msra.mxu0 %v9061_v14  ;;  %6034 = vmatprep.mubr.msk.f32.mxu1 %vm7439_vm5, %v7436_v3 }
 0x6a3   :  { %6987 = vmatprep.subr.bf16.mxu0 %v7438_v10 }
 0x6a6   :  { %6989 = vmatpush3.bf16.msra.mxu0 %v9071_v20 }
 0x6a7   :  { %6990 = vmatprep.subr.bf16.mxu0 %v7438_v10 }
 0x6aa   :  { %6992 = vmatpush3.bf16.msra.mxu0 %v9091_v12 }
 0x6ab   :  { %6993 = vmatprep.subr.bf16.mxu0 %v7438_v10 }
 0x6ae   :  { %6995 = vmatpush3.bf16.msra.mxu0 %v9111_v4 }
 0x6af   :  { %6996 = vmatprep.subr.bf16.mxu0 %v7438_v10 }
 0x6b2   :  { %6998 = vmatpush3.bf16.msra.mxu0 %v9324_v56 }
 0x6b3   :  { %6999 = vmatprep.subr.bf16.mxu0 %v7438_v10 }
 0x6b6   :  { %7001 = vmatpush3.bf16.msra.mxu0 %v9344_v27 }
 0x6b7   :  { %7002 = vmatprep.subr.bf16.mxu0 %v7438_v10 }
 0x6b9   :  { %5825 = vmatmul.mubr.f32.vlgmr.msra.gmra.mrb[64].mxu0 %v9385_v47 }
 0x6ba   :  { %7004 = vmatpush3.bf16.msra.mxu0 %v9274_v55  ;;  %5859 = vmatprep.mubr.msk.f32.mxu0 %vm7439_vm5, %v7436_v3 }
 0x6bb   :  { %7005 = vmatprep.subr.bf16.mxu0 %v7438_v10 }
 0x6be   :  { %7007 = vmatpush3.bf16.msra.mxu0 %v9286_v39  ;;  %v4603_v39 = vld [vmem:[%s9746_s7 + $0x80] sm:$0xff] }
 0x6bf   :  { %7008 = vmatprep.subr.bf16.mxu0 %v7438_v10  ;;  %v7122_v32 = vpack.c.bf16 %v4604_v34, %v4603_v39  ;;  %v4698_v39 = vld [vmem:[%s9747_s9 + $0x8] sm:$0xff]  ;;  %v4699_v34 = vld [vmem:[%s9747_s9 + $0x10] sm:$0xff] }
 0x6c2   :  { %7010 = vmatpush3.bf16.msra.mxu0 %v9298_v50  ;;  %v4587_v50 = vld [vmem:[%s9746_s7] sm:$0xff] }
 0x6c3   :  { %7011 = vmatprep.subr.bf16.mxu0 %v7438_v10  ;;  %v7124_v16 = vpack.c.bf16 %v4588_v48, %v4587_v50 }
 0x6c6   :  { %7013 = vmatpush3.bf16.msra.mxu0 %v9310_v30 }
 0x6c7   :  { %7014 = vmatprep.subr.bf16.mxu0 %v7438_v10 }
 0x6ca   :  { %7016 = vmatpush3.bf16.msra.mxu0 %v9329_v11 }
 0x6cb   :  { %7017 = vmatprep.subr.bf16.mxu0 %v7438_v10 }
 0x6ce   :  { %7019 = vmatpush3.bf16.msra.mxu0 %v9349_v35  ;;  %v4609_v35 = vld [vmem:[%s9746_s7 + $0xb0] sm:$0xff] }
 0x6cf   :  { %7020 = vmatprep.subr.bf16.mxu0 %v7438_v10 }
 0x6d2   :  { %7022 = vmatpush3.bf16.msra.mxu0 %v9363_v59  ;;  %v7134_v59 = vpack.c.bf16 %v4610_v57, %v4609_v35  ;;  %v4708_v35 = vld [vmem:[%s9747_s9 + $0x58] sm:$0xff] }
 0x6d3   :  { %7023 = vmatprep.subr.bf16.mxu0 %v7438_v10 }
 0x6d6   :  { %7025 = vmatpush3.bf16.msra.mxu0 %v9375_v1  ;;  %v4611_v1 = vld [vmem:[%s9746_s7 + $0xc0] sm:$0xff] }
 0x6d7   :  { %7026 = vmatprep.subr.bf16.mxu0 %v7438_v10  ;;  %v7138_v24 = vpack.c.bf16 %v4612_v8, %v4611_v1  ;;  %v4709_v8 = vld [vmem:[%s9747_s9 + $0x60] sm:$0xff] }
 0x6d9   :  { %5860 = vmatmul.mubr.f32.vlgmr.msra.gmra.mrb[66].mxu0 %v9385_v47  ;;  %v7148_v47 = vpack.c.bf16 %v4600_v21, %v4599_v46  ;;  %v4800_v46 = vld [vmem:[%s9748_s11 + $0x48] sm:$0xff] }
 0x6da   :  { %7028 = vmatpush3.bf16.msra.mxu0 %v9045_v51  ;;  %5894 = vmatprep.mubr.msk.f32.mxu0 %vm7439_vm5, %v7436_v3 }
 0x6db   :  { %7029 = vmatprep.subr.bf16.mxu0 %v7438_v10 }
 0x6de   :  { %7031 = vmatpush3.bf16.msra.mxu0 %v9051_v52 }
 0x6df   :  { %7032 = vmatprep.subr.bf16.mxu0 %v7438_v10 }
 0x6e2   :  { %7034 = vmatpush3.bf16.msra.mxu0 %v9061_v14 }
 0x6e3   :  { %7035 = vmatprep.subr.bf16.mxu0 %v7438_v10 }
 0x6e6   :  { %7037 = vmatpush3.bf16.msra.mxu0 %v9071_v20 }
 0x6e7   :  { %7038 = vmatprep.subr.bf16.mxu0 %v7438_v10 }
 0x6ea   :  { %7040 = vmatpush3.bf16.msra.mxu0 %v9091_v12 }
 0x6eb   :  { %7041 = vmatprep.subr.bf16.mxu0 %v7438_v10 }
 0x6ee   :  { %7043 = vmatpush3.bf16.msra.mxu0 %v9111_v4 }
 0x6ef   :  { %7044 = vmatprep.subr.bf16.mxu0 %v7438_v10 }
 0x6f2   :  { %7046 = vmatpush3.bf16.msra.mxu0 %v9324_v56 }
 0x6f3   :  { %7047 = vmatprep.subr.bf16.mxu0 %v7438_v10 }
 0x6f6   :  { %7049 = vmatpush3.bf16.msra.mxu0 %v9344_v27 }
 0x6f7   :  { %7074 = vmatprep.subr.bf16.mxu0 %v7438_v10 }
 0x6f9   :  { %5895 = vmatmul.mubr.f32.vlgmr.msra.gmra.mrb[68].mxu0 %v9389_v31 }
 0x6fa   :  { %7076 = vmatpush3.bf16.msra.mxu0 %v9045_v51  ;;  %5964 = vmatprep.mubr.msk.f32.mxu0 %vm7439_vm5, %v7436_v3 }
 0x6fb   :  { %7077 = vmatprep.subr.bf16.mxu0 %v7438_v10 }
 0x6fe   :  { %7079 = vmatpush3.bf16.msra.mxu0 %v9051_v52 }
 0x6ff   :  { %7080 = vmatprep.subr.bf16.mxu0 %v7438_v10 }
 0x702   :  { %7082 = vmatpush3.bf16.msra.mxu0 %v9061_v14 }
 0x703   :  { %7083 = vmatprep.subr.bf16.mxu0 %v7438_v10 }
 0x706   :  { %7085 = vmatpush3.bf16.msra.mxu0 %v9071_v20 }
 0x707   :  { %7086 = vmatprep.subr.bf16.mxu0 %v7438_v10 }
 0x70a   :  { %7088 = vmatpush3.bf16.msra.mxu0 %v9091_v12 }
 0x70b   :  { %7089 = vmatprep.subr.bf16.mxu0 %v7438_v10 }
 0x70e   :  { %7091 = vmatpush3.bf16.msra.mxu0 %v9111_v4 }
 0x70f   :  { %7092 = vmatprep.subr.bf16.mxu0 %v7438_v10 }
 0x712   :  { %7094 = vmatpush3.bf16.msra.mxu0 %v9324_v56  ;;  %v4590_v56 = vld [vmem:[%s9746_s7 + $0x18] sm:$0xff] }
 0x713   :  { %7095 = vmatprep.subr.bf16.mxu0 %v7438_v10  ;;  %v7128_v17 = vpack.c.bf16 %v4590_v56, %v4589_v49  ;;  %v4702_v49 = vld [vmem:[%s9747_s9 + $0x28] sm:$0xff] }
 0x716   :  { %7097 = vmatpush3.bf16.msra.mxu0 %v9344_v27  ;;  %v4591_v27 = vld [vmem:[%s9746_s7 + $0x20] sm:$0xff] }
 0x717   :  { %7123 = vmatprep.subr.bf16.mxu0 %v7122_v32  ;;  %v7132_v53 = vpack.c.bf16 %v4592_v28, %v4591_v27  ;;  %v4700_v32 = vld [vmem:[%s9747_s9 + $0x18] sm:$0xff]  ;;  %v4707_v28 = vld [vmem:[%s9747_s9 + $0x50] sm:$0xff] }
 0x718   :  { %v7158_v41 = vpack.c.bf16 %v4700_v32, %v4699_v34  ;;  %v7170_v57 = vpack.c.bf16 %v4708_v35, %v4707_v28  ;;  %v5176_v32 = vld [vmem:[%s9751_s12] ss:$0 sm:$0xff] }
 0x719   :  { %5965 = vmatmul.mubr.f32.vlgmr.msra.gmra.mrb[70].mxu0 %v9395_v7  ;;  %v7150_v7 = vpack.c.bf16 %v4618_v45, %v4617_v0 }
 0x71a   :  { %7125 = vmatpush3.bf16.msra.mxu0 %v7124_v16 }
 0x71b   :  { %7127 = vmatprep.subr.bf16.mxu0 %v7126_v58  ;;  %v4701_v58 = vld [vmem:[%s9747_s9 + $0x20] sm:$0xff] }
 0x71c   :  { %v7161_v5 = vpack.c.bf16 %v4702_v49, %v4701_v58 }
 0x71e   :  { %7129 = vmatpush3.bf16.msra.mxu0 %v7128_v17  ;;  %v4705_v17 = vld [vmem:[%s9747_s9 + $0x40] sm:$0xff] }
 0x71f   :  { %7131 = vmatprep.subr.bf16.mxu0 %v7130_v26  ;;  %v4706_v26 = vld [vmem:[%s9747_s9 + $0x48] sm:$0xff] }
 0x720   :  { %v7167_v27 = vpack.c.bf16 %v4706_v26, %v4705_v17 }
 0x722   :  { %7133 = vmatpush3.bf16.msra.mxu0 %v7132_v53 }
 0x723   :  { %7135 = vmatprep.subr.bf16.mxu0 %v7134_v59 }
 0x726   :  { %7137 = vmatpush3.bf16.msra.mxu0 %v7136_v25  ;;  %v4710_v25 = vld [vmem:[%s9747_s9 + $0x68] sm:$0xff] }
 0x727   :  { %7139 = vmatprep.subr.bf16.mxu0 %v7138_v24  ;;  %v7173_v24 = vpack.c.bf16 %v4710_v25, %v4709_v8 }
 0x72a   :  { %7141 = vmatpush3.bf16.msra.mxu0 %v7140_v6  ;;  %v7182_v6 = vpack.c.bf16 %v4794_v44, %v4793_v42 }
 0x72b   :  { %7143 = vmatprep.subr.bf16.mxu0 %v7142_v9  ;;  %v4795_v9 = vld [vmem:[%s9748_s11 + $0x20] sm:$0xff] }
 0x72c   :  { %v7185_v19 = vpack.c.bf16 %v4796_v13, %v4795_v9 }
 0x72e   :  { %7145 = vmatpush3.bf16.msra.mxu0 %v7144_v54  ;;  %v7188_v54 = vpack.c.bf16 %v4798_v38, %v4797_v2 }
 0x72f   :  { %7147 = vmatprep.subr.bf16.mxu0 %v7146_v43  ;;  %v4799_v43 = vld [vmem:[%s9748_s11 + $0x40] sm:$0xff] }
 0x730   :  { %v7191_v21 = vpack.c.bf16 %v4800_v46, %v4799_v43 }
 0x732   :  { %7149 = vmatpush3.bf16.msra.mxu0 %v7148_v47  ;;  %v4801_v47 = vld [vmem:[%s9748_s11 + $0x50] sm:$0xff] }
 0x733   :  { %7151 = vmatprep.subr.bf16.mxu0 %v7150_v7 }
 0x74c   :  { %v9503_v51 = vpop.f32.mrb[60].mxu0 }
 0x74d   :  { %v5756_v52 = vpop.f32.mrb[61].mxu0 }
 0x74e   :  { %v4601_v52 = vld [vmem:[%s9746_s7 + $0x70] sm:$0xff] }
 0x754   :  { %v9505_v14 = vpop.f32.mrb[44].mxu1 }
 0x755   :  { %v5931_v20 = vpop.f32.mrb[45].mxu1 }
 0x756   :  { %v4602_v20 = vld [vmem:[%s9746_s7 + $0x78] sm:$0xff] }
 0x76c   :  { %v9507_v12 = vpop.f32.mrb[62].mxu0 }
 0x76d   :  { %v4149_v4 = vmax.f32 %v9503_v51, %v9507_v12  ;;  %v5791_v55 = vpop.f32.mrb[63].mxu0  ;;  %v4711_v51 = vld [vmem:[%s9747_s9 + $0x70] sm:$0xff] }
 0x76e   :  { %v7152_v55 = vpack.c.bf16 %v4602_v20, %v4601_v52  ;;  %v4805_v52 = vld [vmem:[%s9748_s11 + $0x70] sm:$0xff]  ;;  %v4806_v20 = vld [vmem:[%s9748_s11 + $0x78] sm:$0xff] }
 0x770   :  { %7153 = vmatpush3.bf16.msra.mxu0 %v7152_v55  ;;  %v7200_v55 = vpack.c.bf16 %v4806_v20, %v4805_v52 }
 0x771   :  { %7178 = vmatprep.subr.bf16.mxu0 %v7438_v10 }
 0x774   :  { %v9529_v30 = vpop.f32.mrb[46].mxu1 }
 0x775   :  { %v6001_v11 = vpop.f32.mrb[47].mxu1 }
 0x776   :  { %v4704_v11 = vld [vmem:[%s9747_s9 + $0x38] sm:$0xff] }
 0x78c   :  { %v4217_v23 = vpop.f32.mrb[64].mxu0 }
 0x78d   :  { %v5826_v40 = vpop.f32.mrb[65].mxu0 }
 0x7ac   :  { %v4287_v18 = vpop.f32.mrb[66].mxu0 }
 0x7ad   :  { %v4291_v36 = vmax.f32 %v4217_v23, %v4287_v18  ;;  %v5861_v22 = vpop.f32.mrb[67].mxu0  ;;  %v4802_v23 = vld [vmem:[%s9748_s11 + $0x58] sm:$0xff]  ;;  %v4803_v18 = vld [vmem:[%s9748_s11 + $0x60] sm:$0xff] }
 0x7ae   :  { %v7194_v40 = vpack.c.bf16 %v4802_v23, %v4801_v47 }
 0x7cc   :  { %v4359_v29 = vpop.f32.mrb[68].mxu0 }
 0x7cd   :  { %v4433_v31 = vmax.f32 %v4359_v29, %v9505_v14  ;;  %v5896_v61 = vpop.f32.mrb[69].mxu0  ;;  %v4697_v14 = vld [vmem:[%s9747_s9] sm:$0xff] }
 0x7ce   :  { %v7155_v50 = vpack.c.bf16 %v4698_v39, %v4697_v14 }
 0x7d0   :  { %7156 = vmatpush3.bf16.msra.mxu1 %v7155_v50 }
 0x7d1   :  { %7157 = vmatprep.subr.bf16.mxu1 %v7438_v10 }
 0x7d4   :  { %7159 = vmatpush3.bf16.msra.mxu1 %v7158_v41 }
 0x7d5   :  { %7160 = vmatprep.subr.bf16.mxu1 %v7438_v10 }
 0x7d8   :  { %7162 = vmatpush3.bf16.msra.mxu1 %v7161_v5 }
 0x7d9   :  { %7163 = vmatprep.subr.bf16.mxu1 %v7438_v10 }
 0x7ec   :  { %v4501_v48 = vpop.f32.mrb[70].mxu0 }
 0x7ed   :  { %v4575_v37 = vmax.f32 %v4501_v48, %v9529_v30  ;;  %v5966_v16 = vpop.f32.mrb[71].mxu0  ;;  %v4703_v30 = vld [vmem:[%s9747_s9 + $0x30] sm:$0xff] }
 0x7ee   :  { %v7164_v15 = vpack.c.bf16 %v4704_v11, %v4703_v30 }
 0x7ef   :  { %v7431_v56 = vpack.i.bf16 %v4291_v36, %v4575_v37  ;;  %v4804_v36 = vld [vmem:[%s9748_s11 + $0x68] sm:$0xff] }
 0x7f0   :  { %7165 = vmatpush3.bf16.msra.mxu1 %v7164_v15  ;;  %v7197_v22 = vpack.c.bf16 %v4804_v36, %v4803_v18 }
 0x7f1   :  { %7432 = vrot.lane.b32.xlu0 %v7431_v56, %s7440_s19  ;;  %7166 = vmatprep.subr.bf16.mxu1 %v7438_v10 }
 0x7f4   :  { %7168 = vmatpush3.bf16.msra.mxu1 %v7167_v27 }
 0x7f5   :  { %7169 = vmatprep.subr.bf16.mxu1 %v7438_v10 }
 0x7f8   :  { %7171 = vmatpush3.bf16.msra.mxu1 %v7170_v57 }
 0x7f9   :  { %7172 = vmatprep.subr.bf16.mxu1 %v7438_v10 }
 0x7fc   :  { %7174 = vmatpush3.bf16.msra.mxu1 %v7173_v24 }
 0x7fd   :  { %7175 = vmatprep.subr.bf16.mxu1 %v7438_v10 }
 0x863   :  { %v7433_v53 = vpop.permute.xlu0 %7432 }
 0x864   :  { %v7435_v59 = vunpack.i.h.bf16 %v7433_v53  ;;  %v7434_v63 = vunpack.i.l.bf16 %v7433_v53 }
 0x866   :  { %v4586_v62 = vsel %vm4584_vm6, %v4433_v31, %v7434_v63  ;;  %v4585_v1 = vsel %vm4584_vm6, %v4149_v4, %v7435_v59  ;;  %v4791_v4 = vld [vmem:[%s9748_s11] sm:$0xff] }
 0x867   :  { %4690 = vmatprep.mubr.f32.mxu0 %v4586_v62  ;;  %v7179_v60 = vpack.c.bf16 %v4792_v33, %v4791_v4  ;;  %v5174_v31 = vld [vmem:[%s9749_s8] ss:$0 sm:$0xff] }
 0x868   :  { %4691 = vmatmul.mubr.f32.vlgmr.msra.gmra.mrb[72].mxu0 %v4585_v1 }
 0x869   :  { %6069 = vmatprep.mubr.msk.f32.mxu0 %vm7439_vm5, %v7436_v3  ;;  %v4712_v3 = vld [vmem:[%s9747_s9 + $0x78] sm:$0xff]  ;;  %7180 = vmatpush3.bf16.msra.mxu0 %v7179_v60 }
 0x86a   :  { %v7176_v12 = vpack.c.bf16 %v4712_v3, %v4711_v51  ;;  %7181 = vmatprep.subr.bf16.mxu0 %v7438_v10 }
 0x86c   :  { %7177 = vmatpush3.bf16.msra.mxu1 %v7176_v12 }
 0x86d   :  { %7183 = vmatpush3.bf16.msra.mxu0 %v7182_v6 }
 0x86e   :  { %7184 = vmatprep.subr.bf16.mxu0 %v7438_v10 }
 0x871   :  { %7186 = vmatpush3.bf16.msra.mxu0 %v7185_v19 }
 0x872   :  { %7187 = vmatprep.subr.bf16.mxu0 %v7438_v10 }
 0x875   :  { %7189 = vmatpush3.bf16.msra.mxu0 %v7188_v54 }
 0x876   :  { %7190 = vmatprep.subr.bf16.mxu0 %v7438_v10 }
 0x879   :  { %7192 = vmatpush3.bf16.msra.mxu0 %v7191_v21 }
 0x87a   :  { %7193 = vmatprep.subr.bf16.mxu0 %v7438_v10 }
 0x87d   :  { %7195 = vmatpush3.bf16.msra.mxu0 %v7194_v40 }
 0x87e   :  { %7196 = vmatprep.subr.bf16.mxu0 %v7438_v10 }
 0x881   :  { %7198 = vmatpush3.bf16.msra.mxu0 %v7197_v22 }
 0x882   :  { %7199 = vmatprep.subr.bf16.mxu0 %v7438_v10  ;;  %v5175_v10 = vld [vmem:[%s9750_s10] ss:$0 sm:$0xff] }
 0x885   :  { %7201 = vmatpush3.bf16.msra.mxu0 %v7200_v55 }
 0x93b   :  { %v5465_v29 = vpop.f32.mrb[72].mxu0 }
 0x93c   :  { %v5466_v61 = vpop.f32.mrb[73].mxu0 }
 0x93d   :  { %v5467_v0 = vadd.f32 %v5466_v61, %v5465_v29 }
 0x93f   :  { %v4693_v45 = vadd.f32 %v5467_v0, %v5174_v31 }
 0x941   :  { %v4696_v7 = vmax.f32 %v4693_v45, 0.0 }
 0x943   :  { %6035 = vmatmul.mubr.f32.vlgmr.msra.gmra.mrb[48].mxu1 %v4696_v7 }
 0xa16   :  { %v4786_v14 = vpop.f32.mrb[48].mxu1 }
 0xa17   :  { %v4787_v39 = vadd.f32 %v5175_v10, %v4786_v14  ;;  %v6036_v34 = vpop.f32.mrb[49].mxu1 }
 0xa19   :  { %v4790_v50 = vmax.f32 %v4787_v39, 0.0 }
 0xa1b   :  { %6070 = vmatmul.mubr.f32.vlgmr.msra.gmra.mrb[74].mxu0 %v4790_v50 }
 0xaee   :  { %v4880_v48 = vpop.f32.mrb[74].mxu0 }
 0xaef   :  { %v4881_v41 = vadd.f32 %v5176_v32, %v4880_v48  ;;  %v6071_v37 = vpop.f32.mrb[75].mxu0 }
 0xaf1   :  { %4884 = vst [vmem:[%s9752_s13] sm:$0xff] %v4881_v41 }

</bundles_post_ra>
